<compile_context>
chip_gen: v5e
topology: v5e:2x2
jax: 0.10.0
libtpu: 0.0.40
codegen_flags: <defaults>
</compile_context>

<pallas_src>
import functools
import math

import jax
import jax.numpy as jnp
from jax import lax
from jax.experimental import pallas as pl
from jax.experimental.pallas import tpu as pltpu


_MXU_DTYPE = jnp.bfloat16  # MXU inputs; accumulation stays f32 everywhere.


def _mm(a, b):
    return jnp.dot(a.astype(_MXU_DTYPE), b.astype(_MXU_DTYPE),
                   preferred_element_type=jnp.float32)


def _mm_t(a, b):
    # a @ b.T without an explicit transpose op (MXU handles the contraction).
    return lax.dot_general(a.astype(_MXU_DTYPE), b.astype(_MXU_DTYPE),
                           dimension_numbers=(((1,), (1,)), ((), ())),
                           preferred_element_type=jnp.float32)


def _layernorm(x, g, b):
    xf = x.astype(jnp.float32)
    mu = jnp.mean(xf, axis=-1, keepdims=True)
    var = jnp.mean(jnp.square(xf - mu), axis=-1, keepdims=True)
    return (xf - mu) * lax.rsqrt(var + 1e-12) * g + b


def _gelu(x):  # exact (erf) GELU, as in HF BERT
    return 0.5 * x * (1.0 + lax.erf(x * (1.0 / math.sqrt(2.0))))


# ------------------------- fused whole-model kernel ------------------------- #

def bert_fused_kernel(x_ref, mask_ref,
                      emb_ln_g_ref, emb_ln_b_ref,
                      wqkv_ref, bqkv_ref, wo_ref, bo_ref,
                      ln1_g_ref, ln1_b_ref,
                      w1_ref, b1_ref, w2_ref, b2_ref,
                      ln2_g_ref, ln2_b_ref,
                      pool_w_ref, pool_b_ref, out_w_ref, out_b_ref,
                      logits_ref,
                      ctx_ref, cls_ref,
                      *, B, S, H, nH, Dh, L):
    scale = 1.0 / math.sqrt(Dh)
    mask = mask_ref[...]                                  # (B, S) additive 0 / -1e9

    # ---- embedding LayerNorm (embedding dropout = identity at inference) ----
    x = _layernorm(x_ref[...], emb_ln_g_ref[...], emb_ln_b_ref[...])   # (M, H) f32

    # ---- encoder layers (L is tiny & static -> unrolled) ----
    for l in range(L):
        # fused QKV projection: one (M, 3H) matmul instead of three (M, H)
        qkv = _mm(x, wqkv_ref[l]) + bqkv_ref[l]           # (M, 3H) f32
        q = qkv[:, 0 * H:1 * H] * scale                   # fold 1/sqrt(Dh) into q
        k = qkv[:, 1 * H:2 * H]
        v = qkv[:, 2 * H:3 * H]

        # per-(batch, head) attention; heads sliced in-kernel, ctx stays in VMEM
        for b in range(B):
            r0, r1 = b * S, (b + 1) * S
            mask_b = mask[b:b + 1, :]                     # (1, S)
            for h in range(nH):
                c0, c1 = h * Dh, (h + 1) * Dh
                s = _mm_t(q[r0:r1, c0:c1], k[r0:r1, c0:c1]) + mask_b   # (S, S)
                m = jnp.max(s, axis=-1, keepdims=True)
                p = jnp.exp(s - m)
                p = p * pl.reciprocal(jnp.sum(p, axis=-1, keepdims=True),
                                      approx=True)
                ctx_ref[r0:r1, c0:c1] = _mm(p, v[r0:r1, c0:c1])

        # attention output projection + residual + LayerNorm1 (fused epilogue)
        attn_out = _mm(ctx_ref[...], wo_ref[l]) + bo_ref[l]
        x = _layernorm(x + attn_out, ln1_g_ref[l], ln1_b_ref[l])

        # FFN (W1 + GELU + W2) + residual + LayerNorm2 (fused epilogue)
        hmid = _gelu(_mm(x, w1_ref[l]) + b1_ref[l])
        ffn = _mm(hmid, w2_ref[l]) + b2_ref[l]
        x = _layernorm(x + ffn, ln2_g_ref[l], ln2_b_ref[l])

    # ---- pooler: tanh(W @ hidden[CLS]) ----
    for b in range(B):
        cls_ref[b:b + 1, :] = x[b * S:b * S + 1, :]
    pooled = jnp.tanh(_mm(cls_ref[...], pool_w_ref[...]) + pool_b_ref[...])

    # ---- self.drop (p=0.3): identity at inference; self.out linear head ----
    logits_ref[...] = (_mm(pooled, out_w_ref[...])
                       + out_b_ref[...]).astype(logits_ref.dtype)


# --------------------------- model config / params -------------------------- #

class Config:
    vocab_size = 50
    max_position = 16
    hidden = 32
    num_heads = 4
    head_dim = 8
    intermediate = 64
    num_layers = 2
    n_classes = 3


def init_params(key, cfg):
    H, I, L, C = cfg.hidden, cfg.intermediate, cfg.num_layers, cfg.n_classes

    def nrm(k, shape, scale=0.02):
        return scale * jax.random.normal(k, shape, dtype=jnp.float32)

    ks = iter(jax.random.split(key, 16))
    return {
        "word_emb": nrm(next(ks), (cfg.vocab_size, H)),
        "pos_emb": nrm(next(ks), (cfg.max_position, H)),
        "type_emb": nrm(next(ks), (2, H)),
        "emb_ln_g": jnp.ones((1, H), jnp.float32),
        "emb_ln_b": jnp.zeros((1, H), jnp.float32),
        # per-layer weights stacked along a leading L axis; QKV fused -> (H, 3H)
        "wqkv": nrm(next(ks), (L, H, 3 * H)),
        "bqkv": jnp.zeros((L, 1, 3 * H), jnp.float32),
        "wo": nrm(next(ks), (L, H, H)),
        "bo": jnp.zeros((L, 1, H), jnp.float32),
        "ln1_g": jnp.ones((L, 1, H), jnp.float32),
        "ln1_b": jnp.zeros((L, 1, H), jnp.float32),
        "w1": nrm(next(ks), (L, H, I)),
        "b1": jnp.zeros((L, 1, I), jnp.float32),
        "w2": nrm(next(ks), (L, I, H)),
        "b2": jnp.zeros((L, 1, H), jnp.float32),
        "ln2_g": jnp.ones((L, 1, H), jnp.float32),
        "ln2_b": jnp.zeros((L, 1, H), jnp.float32),
        "pool_w": nrm(next(ks), (H, H)),
        "pool_b": jnp.zeros((1, H), jnp.float32),
        "out_w": nrm(next(ks), (H, C)),
        "out_b": jnp.zeros((1, C), jnp.float32),
    }


# ------------------------------ forward wrapper ------------------------------ #

def bert_class_forward(params, input_ids, attention_mask, cfg):
    B, S = input_ids.shape
    H, nH, Dh = cfg.hidden, cfg.num_heads, cfg.head_dim
    L, C = cfg.num_layers, cfg.n_classes

    # ---- embeddings (gather = plain-JAX glue before the fused kernel) ----
    x = (params["word_emb"][input_ids]
         + params["pos_emb"][jnp.arange(S)][None, :, :]
         + params["type_emb"][0][None, None, :])           # (B, S, H)
    x = x.reshape(B * S, H).astype(jnp.float32)

    # additive attention mask: 0 where attended, -1e9 where padded
    add_mask = (1.0 - attention_mask.astype(jnp.float32)) * -1e9      # (B, S)

    kernel = functools.partial(bert_fused_kernel,
                               B=B, S=S, H=H, nH=nH, Dh=Dh, L=L)

    def vmem_spec():
        return pl.BlockSpec(memory_space=pltpu.MemorySpace.VMEM)

    inputs = (x, add_mask,
              params["emb_ln_g"], params["emb_ln_b"],
              params["wqkv"], params["bqkv"], params["wo"], params["bo"],
              params["ln1_g"], params["ln1_b"],
              params["w1"], params["b1"], params["w2"], params["b2"],
              params["ln2_g"], params["ln2_b"],
              params["pool_w"], params["pool_b"],
              params["out_w"], params["out_b"])

    logits = pl.pallas_call(
        kernel,
        out_shape=jax.ShapeDtypeStruct((B, C), jnp.float32),
        in_specs=[vmem_spec() for _ in inputs],
        out_specs=vmem_spec(),
        scratch_shapes=[pltpu.VMEM((B * S, H), jnp.float32),   # attention context
                        pltpu.VMEM((B, H), jnp.float32)],      # [CLS] rows
    )(*inputs)
    return logits                                              # (B, n_classes)


if __name__ == "__main__":
    cfg = Config()
    key = jax.random.PRNGKey(0)
    k_params, k_ids = jax.random.split(key)

    params = init_params(k_params, cfg)

    B, S = 2, 8
    input_ids = jax.random.randint(k_ids, (B, S), 0, cfg.vocab_size,
                                   dtype=jnp.int32)
    attention_mask = jnp.array(
        [[1, 1, 1, 1, 1, 1, 1, 1],
         [1, 1, 1, 1, 1, 0, 0, 0]], dtype=jnp.int32)

    fwd = jax.jit(functools.partial(bert_class_forward, cfg=cfg))
    logits = jax.block_until_ready(fwd(params, input_ids, attention_mask))

    assert logits.shape == (B, cfg.n_classes)
    assert bool(jnp.all(jnp.isfinite(logits)))
    print("KERNEL_OK")
</pallas_src>

<mosaic_0001>
module attributes {stable_mosaic.version = 11 : i64} {
  func.func @bert_fused_kernel(%arg0: memref<16x32xf32, #tpu.memory_space<vmem>>, %arg1: memref<2x8xf32, #tpu.memory_space<vmem>>, %arg2: memref<1x32xf32, #tpu.memory_space<vmem>>, %arg3: memref<1x32xf32, #tpu.memory_space<vmem>>, %arg4: memref<2x32x96xf32, #tpu.memory_space<vmem>>, %arg5: memref<2x1x96xf32, #tpu.memory_space<vmem>>, %arg6: memref<2x32x32xf32, #tpu.memory_space<vmem>>, %arg7: memref<2x1x32xf32, #tpu.memory_space<vmem>>, %arg8: memref<2x1x32xf32, #tpu.memory_space<vmem>>, %arg9: memref<2x1x32xf32, #tpu.memory_space<vmem>>, %arg10: memref<2x32x64xf32, #tpu.memory_space<vmem>>, %arg11: memref<2x1x64xf32, #tpu.memory_space<vmem>>, %arg12: memref<2x64x32xf32, #tpu.memory_space<vmem>>, %arg13: memref<2x1x32xf32, #tpu.memory_space<vmem>>, %arg14: memref<2x1x32xf32, #tpu.memory_space<vmem>>, %arg15: memref<2x1x32xf32, #tpu.memory_space<vmem>>, %arg16: memref<32x32xf32, #tpu.memory_space<vmem>>, %arg17: memref<1x32xf32, #tpu.memory_space<vmem>>, %arg18: memref<32x3xf32, #tpu.memory_space<vmem>>, %arg19: memref<1x3xf32, #tpu.memory_space<vmem>>, %arg20: memref<2x3xf32, #tpu.memory_space<vmem>>, %arg21: memref<16x32xf32, #tpu.memory_space<vmem>>, %arg22: memref<2x32xf32, #tpu.memory_space<vmem>>) attributes {dimension_semantics = [], scalar_prefetch = 0 : i64, scratch_operands = 2 : i64, tpu.core_type = #tpu.core_type<tc>} {
    %c0 = arith.constant 0 : index
    %c0_0 = arith.constant 0 : index
    %0 = vector.load %arg1[%c0, %c0_0] : memref<2x8xf32, #tpu.memory_space<vmem>>, vector<2x8xf32>
    %c0_1 = arith.constant 0 : index
    %c0_2 = arith.constant 0 : index
    %1 = vector.load %arg0[%c0_1, %c0_2] : memref<16x32xf32, #tpu.memory_space<vmem>>, vector<16x32xf32>
    %c0_3 = arith.constant 0 : index
    %c0_4 = arith.constant 0 : index
    %2 = vector.load %arg2[%c0_3, %c0_4] : memref<1x32xf32, #tpu.memory_space<vmem>>, vector<1x32xf32>
    %c0_5 = arith.constant 0 : index
    %c0_6 = arith.constant 0 : index
    %3 = vector.load %arg3[%c0_5, %c0_6] : memref<1x32xf32, #tpu.memory_space<vmem>>, vector<1x32xf32>
    %cst = arith.constant dense<0.000000e+00> : vector<16xf32>
    %4 = vector.multi_reduction <add>, %1, %cst [1] : vector<16x32xf32> to vector<16xf32>
    %5 = vector.shape_cast %4 : vector<16xf32> to vector<16x1xf32>
    %cst_7 = arith.constant 3.200000e+01 : f32
    %6 = vector.broadcast %cst_7 : f32 to vector<16x1xf32>
    %7 = arith.divf %5, %6 : vector<16x1xf32>
    %8 = vector.broadcast %7 : vector<16x1xf32> to vector<16x32xf32>
    %9 = arith.subf %1, %8 : vector<16x32xf32>
    %10 = arith.mulf %9, %9 : vector<16x32xf32>
    %cst_8 = arith.constant dense<0.000000e+00> : vector<16xf32>
    %11 = vector.multi_reduction <add>, %10, %cst_8 [1] : vector<16x32xf32> to vector<16xf32>
    %12 = vector.shape_cast %11 : vector<16xf32> to vector<16x1xf32>
    %cst_9 = arith.constant 3.200000e+01 : f32
    %13 = vector.broadcast %cst_9 : f32 to vector<16x1xf32>
    %14 = arith.divf %12, %13 : vector<16x1xf32>
    %15 = vector.broadcast %7 : vector<16x1xf32> to vector<16x32xf32>
    %16 = arith.subf %1, %15 : vector<16x32xf32>
    %cst_10 = arith.constant 9.99999996E-13 : f32
    %17 = vector.broadcast %cst_10 : f32 to vector<16x1xf32>
    %18 = arith.addf %14, %17 : vector<16x1xf32>
    %19 = math.rsqrt %18 : vector<16x1xf32>
    %20 = vector.broadcast %19 : vector<16x1xf32> to vector<16x32xf32>
    %21 = arith.mulf %16, %20 : vector<16x32xf32>
    %22 = vector.broadcast %2 : vector<1x32xf32> to vector<16x32xf32>
    %23 = arith.mulf %21, %22 : vector<16x32xf32>
    %24 = vector.broadcast %3 : vector<1x32xf32> to vector<16x32xf32>
    %25 = arith.addf %23, %24 : vector<16x32xf32>
    %c0_11 = arith.constant 0 : index
    %c0_12 = arith.constant 0 : index
    %c0_13 = arith.constant 0 : index
    %26 = vector.load %arg4[%c0_11, %c0_12, %c0_13] : memref<2x32x96xf32, #tpu.memory_space<vmem>>, vector<1x32x96xf32>
    %27 = vector.shape_cast %26 : vector<1x32x96xf32> to vector<32x96xf32>
    %28 = arith.truncf %25 : vector<16x32xf32> to vector<16x32xbf16>
    %29 = arith.truncf %27 : vector<32x96xf32> to vector<32x96xbf16>
    %cst_14 = arith.constant dense<0.000000e+00> : vector<16x96xf32>
    %30 = tpu.matmul %28, %29, %cst_14 {dimension_numbers = #tpu.dot_dimension_numbers<[1], [0], [0], [1], [0, 0, 1, 1], [], []>} : vector<16x32xbf16>, vector<32x96xbf16>, vector<16x96xf32> -> vector<16x96xf32>
    %c0_15 = arith.constant 0 : index
    %c0_16 = arith.constant 0 : index
    %c0_17 = arith.constant 0 : index
    %31 = vector.load %arg5[%c0_15, %c0_16, %c0_17] : memref<2x1x96xf32, #tpu.memory_space<vmem>>, vector<1x1x96xf32>
    %32 = vector.shape_cast %31 : vector<1x1x96xf32> to vector<1x96xf32>
    %33 = vector.broadcast %32 : vector<1x96xf32> to vector<16x96xf32>
    %34 = arith.addf %30, %33 : vector<16x96xf32>
    %35 = vector.extract_strided_slice %34 {offsets = [0, 0], sizes = [16, 32], strides = [1, 1]} : vector<16x96xf32> to vector<16x32xf32>
    %cst_18 = arith.constant 0.353553385 : f32
    %36 = vector.broadcast %cst_18 : f32 to vector<16x32xf32>
    %37 = arith.mulf %35, %36 : vector<16x32xf32>
    %38 = vector.extract_strided_slice %34 {offsets = [0, 32], sizes = [16, 32], strides = [1, 1]} : vector<16x96xf32> to vector<16x32xf32>
    %39 = vector.extract_strided_slice %34 {offsets = [0, 64], sizes = [16, 32], strides = [1, 1]} : vector<16x96xf32> to vector<16x32xf32>
    %40 = vector.extract_strided_slice %0 {offsets = [0, 0], sizes = [1, 8], strides = [1, 1]} : vector<2x8xf32> to vector<1x8xf32>
    %41 = vector.extract_strided_slice %37 {offsets = [0, 0], sizes = [8, 8], strides = [1, 1]} : vector<16x32xf32> to vector<8x8xf32>
    %42 = vector.extract_strided_slice %38 {offsets = [0, 0], sizes = [8, 8], strides = [1, 1]} : vector<16x32xf32> to vector<8x8xf32>
    %43 = arith.truncf %41 : vector<8x8xf32> to vector<8x8xbf16>
    %44 = arith.truncf %42 : vector<8x8xf32> to vector<8x8xbf16>
    %cst_19 = arith.constant dense<0.000000e+00> : vector<8x8xf32>
    %45 = tpu.matmul %43, %44, %cst_19 {dimension_numbers = #tpu.dot_dimension_numbers<[1], [1], [0], [0], [0, 0, 1, 0], [], []>} : vector<8x8xbf16>, vector<8x8xbf16>, vector<8x8xf32> -> vector<8x8xf32>
    %46 = vector.broadcast %40 : vector<1x8xf32> to vector<8x8xf32>
    %47 = arith.addf %45, %46 : vector<8x8xf32>
    %cst_20 = arith.constant dense<0xFF800000> : vector<8xf32>
    %48 = vector.multi_reduction <maximumf>, %47, %cst_20 [1] : vector<8x8xf32> to vector<8xf32>
    %49 = vector.shape_cast %48 : vector<8xf32> to vector<8x1xf32>
    %50 = vector.broadcast %49 : vector<8x1xf32> to vector<8x8xf32>
    %51 = arith.subf %47, %50 : vector<8x8xf32>
    %52 = math.exp %51 : vector<8x8xf32>
    %cst_21 = arith.constant dense<0.000000e+00> : vector<8xf32>
    %53 = vector.multi_reduction <add>, %52, %cst_21 [1] : vector<8x8xf32> to vector<8xf32>
    %54 = vector.shape_cast %53 : vector<8xf32> to vector<8x1xf32>
    %55 = tpu.reciprocal %54 {approx = true} : vector<8x1xf32> -> vector<8x1xf32>
    %56 = vector.broadcast %55 : vector<8x1xf32> to vector<8x8xf32>
    %57 = arith.mulf %52, %56 : vector<8x8xf32>
    %58 = vector.extract_strided_slice %39 {offsets = [0, 0], sizes = [8, 8], strides = [1, 1]} : vector<16x32xf32> to vector<8x8xf32>
    %59 = arith.truncf %57 : vector<8x8xf32> to vector<8x8xbf16>
    %60 = arith.truncf %58 : vector<8x8xf32> to vector<8x8xbf16>
    %cst_22 = arith.constant dense<0.000000e+00> : vector<8x8xf32>
    %61 = tpu.matmul %59, %60, %cst_22 {dimension_numbers = #tpu.dot_dimension_numbers<[1], [0], [0], [1], [0, 0, 1, 1], [], []>} : vector<8x8xbf16>, vector<8x8xbf16>, vector<8x8xf32> -> vector<8x8xf32>
    %c0_23 = arith.constant 0 : index
    %c0_24 = arith.constant 0 : index
    %62 = vector.load %arg21[%c0_23, %c0_24] : memref<16x32xf32, #tpu.memory_space<vmem>>, vector<8x8xf32>
    tpu.vector_store %arg21[%c0_23, %c0_24], %61 {strides = array<i32>} : memref<16x32xf32, #tpu.memory_space<vmem>>, vector<8x8xf32>,
    %63 = vector.extract_strided_slice %37 {offsets = [0, 8], sizes = [8, 8], strides = [1, 1]} : vector<16x32xf32> to vector<8x8xf32>
    %64 = vector.extract_strided_slice %38 {offsets = [0, 8], sizes = [8, 8], strides = [1, 1]} : vector<16x32xf32> to vector<8x8xf32>
    %65 = arith.truncf %63 : vector<8x8xf32> to vector<8x8xbf16>
    %66 = arith.truncf %64 : vector<8x8xf32> to vector<8x8xbf16>
    %cst_25 = arith.constant dense<0.000000e+00> : vector<8x8xf32>
    %67 = tpu.matmul %65, %66, %cst_25 {dimension_numbers = #tpu.dot_dimension_numbers<[1], [1], [0], [0], [0, 0, 1, 0], [], []>} : vector<8x8xbf16>, vector<8x8xbf16>, vector<8x8xf32> -> vector<8x8xf32>
    %68 = vector.broadcast %40 : vector<1x8xf32> to vector<8x8xf32>
    %69 = arith.addf %67, %68 : vector<8x8xf32>
    %cst_26 = arith.constant dense<0xFF800000> : vector<8xf32>
    %70 = vector.multi_reduction <maximumf>, %69, %cst_26 [1] : vector<8x8xf32> to vector<8xf32>
    %71 = vector.shape_cast %70 : vector<8xf32> to vector<8x1xf32>
    %72 = vector.broadcast %71 : vector<8x1xf32> to vector<8x8xf32>
    %73 = arith.subf %69, %72 : vector<8x8xf32>
    %74 = math.exp %73 : vector<8x8xf32>
    %cst_27 = arith.constant dense<0.000000e+00> : vector<8xf32>
    %75 = vector.multi_reduction <add>, %74, %cst_27 [1] : vector<8x8xf32> to vector<8xf32>
    %76 = vector.shape_cast %75 : vector<8xf32> to vector<8x1xf32>
    %77 = tpu.reciprocal %76 {approx = true} : vector<8x1xf32> -> vector<8x1xf32>
    %78 = vector.broadcast %77 : vector<8x1xf32> to vector<8x8xf32>
    %79 = arith.mulf %74, %78 : vector<8x8xf32>
    %80 = vector.extract_strided_slice %39 {offsets = [0, 8], sizes = [8, 8], strides = [1, 1]} : vector<16x32xf32> to vector<8x8xf32>
    %81 = arith.truncf %79 : vector<8x8xf32> to vector<8x8xbf16>
    %82 = arith.truncf %80 : vector<8x8xf32> to vector<8x8xbf16>
    %cst_28 = arith.constant dense<0.000000e+00> : vector<8x8xf32>
    %83 = tpu.matmul %81, %82, %cst_28 {dimension_numbers = #tpu.dot_dimension_numbers<[1], [0], [0], [1], [0, 0, 1, 1], [], []>} : vector<8x8xbf16>, vector<8x8xbf16>, vector<8x8xf32> -> vector<8x8xf32>
    %c0_29 = arith.constant 0 : index
    %c8 = arith.constant 8 : index
    %84 = vector.load %arg21[%c0_29, %c8] : memref<16x32xf32, #tpu.memory_space<vmem>>, vector<8x8xf32>
    tpu.vector_store %arg21[%c0_29, %c8], %83 {strides = array<i32>} : memref<16x32xf32, #tpu.memory_space<vmem>>, vector<8x8xf32>,
    %85 = vector.extract_strided_slice %37 {offsets = [0, 16], sizes = [8, 8], strides = [1, 1]} : vector<16x32xf32> to vector<8x8xf32>
    %86 = vector.extract_strided_slice %38 {offsets = [0, 16], sizes = [8, 8], strides = [1, 1]} : vector<16x32xf32> to vector<8x8xf32>
    %87 = arith.truncf %85 : vector<8x8xf32> to vector<8x8xbf16>
    %88 = arith.truncf %86 : vector<8x8xf32> to vector<8x8xbf16>
    %cst_30 = arith.constant dense<0.000000e+00> : vector<8x8xf32>
    %89 = tpu.matmul %87, %88, %cst_30 {dimension_numbers = #tpu.dot_dimension_numbers<[1], [1], [0], [0], [0, 0, 1, 0], [], []>} : vector<8x8xbf16>, vector<8x8xbf16>, vector<8x8xf32> -> vector<8x8xf32>
    %90 = vector.broadcast %40 : vector<1x8xf32> to vector<8x8xf32>
    %91 = arith.addf %89, %90 : vector<8x8xf32>
    %cst_31 = arith.constant dense<0xFF800000> : vector<8xf32>
    %92 = vector.multi_reduction <maximumf>, %91, %cst_31 [1] : vector<8x8xf32> to vector<8xf32>
    %93 = vector.shape_cast %92 : vector<8xf32> to vector<8x1xf32>
    %94 = vector.broadcast %93 : vector<8x1xf32> to vector<8x8xf32>
    %95 = arith.subf %91, %94 : vector<8x8xf32>
    %96 = math.exp %95 : vector<8x8xf32>
    %cst_32 = arith.constant dense<0.000000e+00> : vector<8xf32>
    %97 = vector.multi_reduction <add>, %96, %cst_32 [1] : vector<8x8xf32> to vector<8xf32>
    %98 = vector.shape_cast %97 : vector<8xf32> to vector<8x1xf32>
    %99 = tpu.reciprocal %98 {approx = true} : vector<8x1xf32> -> vector<8x1xf32>
    %100 = vector.broadcast %99 : vector<8x1xf32> to vector<8x8xf32>
    %101 = arith.mulf %96, %100 : vector<8x8xf32>
    %102 = vector.extract_strided_slice %39 {offsets = [0, 16], sizes = [8, 8], strides = [1, 1]} : vector<16x32xf32> to vector<8x8xf32>
    %103 = arith.truncf %101 : vector<8x8xf32> to vector<8x8xbf16>
    %104 = arith.truncf %102 : vector<8x8xf32> to vector<8x8xbf16>
    %cst_33 = arith.constant dense<0.000000e+00> : vector<8x8xf32>
    %105 = tpu.matmul %103, %104, %cst_33 {dimension_numbers = #tpu.dot_dimension_numbers<[1], [0], [0], [1], [0, 0, 1, 1], [], []>} : vector<8x8xbf16>, vector<8x8xbf16>, vector<8x8xf32> -> vector<8x8xf32>
    %c0_34 = arith.constant 0 : index
    %c16 = arith.constant 16 : index
    %106 = vector.load %arg21[%c0_34, %c16] : memref<16x32xf32, #tpu.memory_space<vmem>>, vector<8x8xf32>
    tpu.vector_store %arg21[%c0_34, %c16], %105 {strides = array<i32>} : memref<16x32xf32, #tpu.memory_space<vmem>>, vector<8x8xf32>,
    %107 = vector.extract_strided_slice %37 {offsets = [0, 24], sizes = [8, 8], strides = [1, 1]} : vector<16x32xf32> to vector<8x8xf32>
    %108 = vector.extract_strided_slice %38 {offsets = [0, 24], sizes = [8, 8], strides = [1, 1]} : vector<16x32xf32> to vector<8x8xf32>
    %109 = arith.truncf %107 : vector<8x8xf32> to vector<8x8xbf16>
    %110 = arith.truncf %108 : vector<8x8xf32> to vector<8x8xbf16>
    %cst_35 = arith.constant dense<0.000000e+00> : vector<8x8xf32>
    %111 = tpu.matmul %109, %110, %cst_35 {dimension_numbers = #tpu.dot_dimension_numbers<[1], [1], [0], [0], [0, 0, 1, 0], [], []>} : vector<8x8xbf16>, vector<8x8xbf16>, vector<8x8xf32> -> vector<8x8xf32>
    %112 = vector.broadcast %40 : vector<1x8xf32> to vector<8x8xf32>
    %113 = arith.addf %111, %112 : vector<8x8xf32>
    %cst_36 = arith.constant dense<0xFF800000> : vector<8xf32>
    %114 = vector.multi_reduction <maximumf>, %113, %cst_36 [1] : vector<8x8xf32> to vector<8xf32>
    %115 = vector.shape_cast %114 : vector<8xf32> to vector<8x1xf32>
    %116 = vector.broadcast %115 : vector<8x1xf32> to vector<8x8xf32>
    %117 = arith.subf %113, %116 : vector<8x8xf32>
    %118 = math.exp %117 : vector<8x8xf32>
    %cst_37 = arith.constant dense<0.000000e+00> : vector<8xf32>
    %119 = vector.multi_reduction <add>, %118, %cst_37 [1] : vector<8x8xf32> to vector<8xf32>
    %120 = vector.shape_cast %119 : vector<8xf32> to vector<8x1xf32>
    %121 = tpu.reciprocal %120 {approx = true} : vector<8x1xf32> -> vector<8x1xf32>
    %122 = vector.broadcast %121 : vector<8x1xf32> to vector<8x8xf32>
    %123 = arith.mulf %118, %122 : vector<8x8xf32>
    %124 = vector.extract_strided_slice %39 {offsets = [0, 24], sizes = [8, 8], strides = [1, 1]} : vector<16x32xf32> to vector<8x8xf32>
    %125 = arith.truncf %123 : vector<8x8xf32> to vector<8x8xbf16>
    %126 = arith.truncf %124 : vector<8x8xf32> to vector<8x8xbf16>
    %cst_38 = arith.constant dense<0.000000e+00> : vector<8x8xf32>
    %127 = tpu.matmul %125, %126, %cst_38 {dimension_numbers = #tpu.dot_dimension_numbers<[1], [0], [0], [1], [0, 0, 1, 1], [], []>} : vector<8x8xbf16>, vector<8x8xbf16>, vector<8x8xf32> -> vector<8x8xf32>
    %c0_39 = arith.constant 0 : index
    %c24 = arith.constant 24 : index
    %128 = vector.load %arg21[%c0_39, %c24] : memref<16x32xf32, #tpu.memory_space<vmem>>, vector<8x8xf32>
    tpu.vector_store %arg21[%c0_39, %c24], %127 {strides = array<i32>} : memref<16x32xf32, #tpu.memory_space<vmem>>, vector<8x8xf32>,
    %129 = vector.extract_strided_slice %0 {offsets = [1, 0], sizes = [1, 8], strides = [1, 1]} : vector<2x8xf32> to vector<1x8xf32>
    %130 = vector.extract_strided_slice %37 {offsets = [8, 0], sizes = [8, 8], strides = [1, 1]} : vector<16x32xf32> to vector<8x8xf32>
    %131 = vector.extract_strided_slice %38 {offsets = [8, 0], sizes = [8, 8], strides = [1, 1]} : vector<16x32xf32> to vector<8x8xf32>
    %132 = arith.truncf %130 : vector<8x8xf32> to vector<8x8xbf16>
    %133 = arith.truncf %131 : vector<8x8xf32> to vector<8x8xbf16>
    %cst_40 = arith.constant dense<0.000000e+00> : vector<8x8xf32>
    %134 = tpu.matmul %132, %133, %cst_40 {dimension_numbers = #tpu.dot_dimension_numbers<[1], [1], [0], [0], [0, 0, 1, 0], [], []>} : vector<8x8xbf16>, vector<8x8xbf16>, vector<8x8xf32> -> vector<8x8xf32>
    %135 = vector.broadcast %129 : vector<1x8xf32> to vector<8x8xf32>
    %136 = arith.addf %134, %135 : vector<8x8xf32>
    %cst_41 = arith.constant dense<0xFF800000> : vector<8xf32>
    %137 = vector.multi_reduction <maximumf>, %136, %cst_41 [1] : vector<8x8xf32> to vector<8xf32>
    %138 = vector.shape_cast %137 : vector<8xf32> to vector<8x1xf32>
    %139 = vector.broadcast %138 : vector<8x1xf32> to vector<8x8xf32>
    %140 = arith.subf %136, %139 : vector<8x8xf32>
    %141 = math.exp %140 : vector<8x8xf32>
    %cst_42 = arith.constant dense<0.000000e+00> : vector<8xf32>
    %142 = vector.multi_reduction <add>, %141, %cst_42 [1] : vector<8x8xf32> to vector<8xf32>
    %143 = vector.shape_cast %142 : vector<8xf32> to vector<8x1xf32>
    %144 = tpu.reciprocal %143 {approx = true} : vector<8x1xf32> -> vector<8x1xf32>
    %145 = vector.broadcast %144 : vector<8x1xf32> to vector<8x8xf32>
    %146 = arith.mulf %141, %145 : vector<8x8xf32>
    %147 = vector.extract_strided_slice %39 {offsets = [8, 0], sizes = [8, 8], strides = [1, 1]} : vector<16x32xf32> to vector<8x8xf32>
    %148 = arith.truncf %146 : vector<8x8xf32> to vector<8x8xbf16>
    %149 = arith.truncf %147 : vector<8x8xf32> to vector<8x8xbf16>
    %cst_43 = arith.constant dense<0.000000e+00> : vector<8x8xf32>
    %150 = tpu.matmul %148, %149, %cst_43 {dimension_numbers = #tpu.dot_dimension_numbers<[1], [0], [0], [1], [0, 0, 1, 1], [], []>} : vector<8x8xbf16>, vector<8x8xbf16>, vector<8x8xf32> -> vector<8x8xf32>
    %c8_44 = arith.constant 8 : index
    %c0_45 = arith.constant 0 : index
    %151 = vector.load %arg21[%c8_44, %c0_45] : memref<16x32xf32, #tpu.memory_space<vmem>>, vector<8x8xf32>
    tpu.vector_store %arg21[%c8_44, %c0_45], %150 {strides = array<i32>} : memref<16x32xf32, #tpu.memory_space<vmem>>, vector<8x8xf32>,
    %152 = vector.extract_strided_slice %37 {offsets = [8, 8], sizes = [8, 8], strides = [1, 1]} : vector<16x32xf32> to vector<8x8xf32>
    %153 = vector.extract_strided_slice %38 {offsets = [8, 8], sizes = [8, 8], strides = [1, 1]} : vector<16x32xf32> to vector<8x8xf32>
    %154 = arith.truncf %152 : vector<8x8xf32> to vector<8x8xbf16>
    %155 = arith.truncf %153 : vector<8x8xf32> to vector<8x8xbf16>
    %cst_46 = arith.constant dense<0.000000e+00> : vector<8x8xf32>
    %156 = tpu.matmul %154, %155, %cst_46 {dimension_numbers = #tpu.dot_dimension_numbers<[1], [1], [0], [0], [0, 0, 1, 0], [], []>} : vector<8x8xbf16>, vector<8x8xbf16>, vector<8x8xf32> -> vector<8x8xf32>
    %157 = vector.broadcast %129 : vector<1x8xf32> to vector<8x8xf32>
    %158 = arith.addf %156, %157 : vector<8x8xf32>
    %cst_47 = arith.constant dense<0xFF800000> : vector<8xf32>
    %159 = vector.multi_reduction <maximumf>, %158, %cst_47 [1] : vector<8x8xf32> to vector<8xf32>
    %160 = vector.shape_cast %159 : vector<8xf32> to vector<8x1xf32>
    %161 = vector.broadcast %160 : vector<8x1xf32> to vector<8x8xf32>
    %162 = arith.subf %158, %161 : vector<8x8xf32>
    %163 = math.exp %162 : vector<8x8xf32>
    %cst_48 = arith.constant dense<0.000000e+00> : vector<8xf32>
    %164 = vector.multi_reduction <add>, %163, %cst_48 [1] : vector<8x8xf32> to vector<8xf32>
    %165 = vector.shape_cast %164 : vector<8xf32> to vector<8x1xf32>
    %166 = tpu.reciprocal %165 {approx = true} : vector<8x1xf32> -> vector<8x1xf32>
    %167 = vector.broadcast %166 : vector<8x1xf32> to vector<8x8xf32>
    %168 = arith.mulf %163, %167 : vector<8x8xf32>
    %169 = vector.extract_strided_slice %39 {offsets = [8, 8], sizes = [8, 8], strides = [1, 1]} : vector<16x32xf32> to vector<8x8xf32>
    %170 = arith.truncf %168 : vector<8x8xf32> to vector<8x8xbf16>
    %171 = arith.truncf %169 : vector<8x8xf32> to vector<8x8xbf16>
    %cst_49 = arith.constant dense<0.000000e+00> : vector<8x8xf32>
    %172 = tpu.matmul %170, %171, %cst_49 {dimension_numbers = #tpu.dot_dimension_numbers<[1], [0], [0], [1], [0, 0, 1, 1], [], []>} : vector<8x8xbf16>, vector<8x8xbf16>, vector<8x8xf32> -> vector<8x8xf32>
    %c8_50 = arith.constant 8 : index
    %c8_51 = arith.constant 8 : index
    %173 = vector.load %arg21[%c8_50, %c8_51] : memref<16x32xf32, #tpu.memory_space<vmem>>, vector<8x8xf32>
    tpu.vector_store %arg21[%c8_50, %c8_51], %172 {strides = array<i32>} : memref<16x32xf32, #tpu.memory_space<vmem>>, vector<8x8xf32>,
    %174 = vector.extract_strided_slice %37 {offsets = [8, 16], sizes = [8, 8], strides = [1, 1]} : vector<16x32xf32> to vector<8x8xf32>
    %175 = vector.extract_strided_slice %38 {offsets = [8, 16], sizes = [8, 8], strides = [1, 1]} : vector<16x32xf32> to vector<8x8xf32>
    %176 = arith.truncf %174 : vector<8x8xf32> to vector<8x8xbf16>
    %177 = arith.truncf %175 : vector<8x8xf32> to vector<8x8xbf16>
    %cst_52 = arith.constant dense<0.000000e+00> : vector<8x8xf32>
    %178 = tpu.matmul %176, %177, %cst_52 {dimension_numbers = #tpu.dot_dimension_numbers<[1], [1], [0], [0], [0, 0, 1, 0], [], []>} : vector<8x8xbf16>, vector<8x8xbf16>, vector<8x8xf32> -> vector<8x8xf32>
    %179 = vector.broadcast %129 : vector<1x8xf32> to vector<8x8xf32>
    %180 = arith.addf %178, %179 : vector<8x8xf32>
    %cst_53 = arith.constant dense<0xFF800000> : vector<8xf32>
    %181 = vector.multi_reduction <maximumf>, %180, %cst_53 [1] : vector<8x8xf32> to vector<8xf32>
    %182 = vector.shape_cast %181 : vector<8xf32> to vector<8x1xf32>
    %183 = vector.broadcast %182 : vector<8x1xf32> to vector<8x8xf32>
    %184 = arith.subf %180, %183 : vector<8x8xf32>
    %185 = math.exp %184 : vector<8x8xf32>
    %cst_54 = arith.constant dense<0.000000e+00> : vector<8xf32>
    %186 = vector.multi_reduction <add>, %185, %cst_54 [1] : vector<8x8xf32> to vector<8xf32>
    %187 = vector.shape_cast %186 : vector<8xf32> to vector<8x1xf32>
    %188 = tpu.reciprocal %187 {approx = true} : vector<8x1xf32> -> vector<8x1xf32>
    %189 = vector.broadcast %188 : vector<8x1xf32> to vector<8x8xf32>
    %190 = arith.mulf %185, %189 : vector<8x8xf32>
    %191 = vector.extract_strided_slice %39 {offsets = [8, 16], sizes = [8, 8], strides = [1, 1]} : vector<16x32xf32> to vector<8x8xf32>
    %192 = arith.truncf %190 : vector<8x8xf32> to vector<8x8xbf16>
    %193 = arith.truncf %191 : vector<8x8xf32> to vector<8x8xbf16>
    %cst_55 = arith.constant dense<0.000000e+00> : vector<8x8xf32>
    %194 = tpu.matmul %192, %193, %cst_55 {dimension_numbers = #tpu.dot_dimension_numbers<[1], [0], [0], [1], [0, 0, 1, 1], [], []>} : vector<8x8xbf16>, vector<8x8xbf16>, vector<8x8xf32> -> vector<8x8xf32>
    %c8_56 = arith.constant 8 : index
    %c16_57 = arith.constant 16 : index
    %195 = vector.load %arg21[%c8_56, %c16_57] : memref<16x32xf32, #tpu.memory_space<vmem>>, vector<8x8xf32>
    tpu.vector_store %arg21[%c8_56, %c16_57], %194 {strides = array<i32>} : memref<16x32xf32, #tpu.memory_space<vmem>>, vector<8x8xf32>,
    %196 = vector.extract_strided_slice %37 {offsets = [8, 24], sizes = [8, 8], strides = [1, 1]} : vector<16x32xf32> to vector<8x8xf32>
    %197 = vector.extract_strided_slice %38 {offsets = [8, 24], sizes = [8, 8], strides = [1, 1]} : vector<16x32xf32> to vector<8x8xf32>
    %198 = arith.truncf %196 : vector<8x8xf32> to vector<8x8xbf16>
    %199 = arith.truncf %197 : vector<8x8xf32> to vector<8x8xbf16>
    %cst_58 = arith.constant dense<0.000000e+00> : vector<8x8xf32>
    %200 = tpu.matmul %198, %199, %cst_58 {dimension_numbers = #tpu.dot_dimension_numbers<[1], [1], [0], [0], [0, 0, 1, 0], [], []>} : vector<8x8xbf16>, vector<8x8xbf16>, vector<8x8xf32> -> vector<8x8xf32>
    %201 = vector.broadcast %129 : vector<1x8xf32> to vector<8x8xf32>
    %202 = arith.addf %200, %201 : vector<8x8xf32>
    %cst_59 = arith.constant dense<0xFF800000> : vector<8xf32>
    %203 = vector.multi_reduction <maximumf>, %202, %cst_59 [1] : vector<8x8xf32> to vector<8xf32>
    %204 = vector.shape_cast %203 : vector<8xf32> to vector<8x1xf32>
    %205 = vector.broadcast %204 : vector<8x1xf32> to vector<8x8xf32>
    %206 = arith.subf %202, %205 : vector<8x8xf32>
    %207 = math.exp %206 : vector<8x8xf32>
    %cst_60 = arith.constant dense<0.000000e+00> : vector<8xf32>
    %208 = vector.multi_reduction <add>, %207, %cst_60 [1] : vector<8x8xf32> to vector<8xf32>
    %209 = vector.shape_cast %208 : vector<8xf32> to vector<8x1xf32>
    %210 = tpu.reciprocal %209 {approx = true} : vector<8x1xf32> -> vector<8x1xf32>
    %211 = vector.broadcast %210 : vector<8x1xf32> to vector<8x8xf32>
    %212 = arith.mulf %207, %211 : vector<8x8xf32>
    %213 = vector.extract_strided_slice %39 {offsets = [8, 24], sizes = [8, 8], strides = [1, 1]} : vector<16x32xf32> to vector<8x8xf32>
    %214 = arith.truncf %212 : vector<8x8xf32> to vector<8x8xbf16>
    %215 = arith.truncf %213 : vector<8x8xf32> to vector<8x8xbf16>
    %cst_61 = arith.constant dense<0.000000e+00> : vector<8x8xf32>
    %216 = tpu.matmul %214, %215, %cst_61 {dimension_numbers = #tpu.dot_dimension_numbers<[1], [0], [0], [1], [0, 0, 1, 1], [], []>} : vector<8x8xbf16>, vector<8x8xbf16>, vector<8x8xf32> -> vector<8x8xf32>
    %c8_62 = arith.constant 8 : index
    %c24_63 = arith.constant 24 : index
    %217 = vector.load %arg21[%c8_62, %c24_63] : memref<16x32xf32, #tpu.memory_space<vmem>>, vector<8x8xf32>
    tpu.vector_store %arg21[%c8_62, %c24_63], %216 {strides = array<i32>} : memref<16x32xf32, #tpu.memory_space<vmem>>, vector<8x8xf32>,
    %c0_64 = arith.constant 0 : index
    %c0_65 = arith.constant 0 : index
    %218 = vector.load %arg21[%c0_64, %c0_65] : memref<16x32xf32, #tpu.memory_space<vmem>>, vector<16x32xf32>
    %c0_66 = arith.constant 0 : index
    %c0_67 = arith.constant 0 : index
    %c0_68 = arith.constant 0 : index
    %219 = vector.load %arg6[%c0_66, %c0_67, %c0_68] : memref<2x32x32xf32, #tpu.memory_space<vmem>>, vector<1x32x32xf32>
    %220 = vector.shape_cast %219 : vector<1x32x32xf32> to vector<32x32xf32>
    %221 = arith.truncf %218 : vector<16x32xf32> to vector<16x32xbf16>
    %222 = arith.truncf %220 : vector<32x32xf32> to vector<32x32xbf16>
    %cst_69 = arith.constant dense<0.000000e+00> : vector<16x32xf32>
    %223 = tpu.matmul %221, %222, %cst_69 {dimension_numbers = #tpu.dot_dimension_numbers<[1], [0], [0], [1], [0, 0, 1, 1], [], []>} : vector<16x32xbf16>, vector<32x32xbf16>, vector<16x32xf32> -> vector<16x32xf32>
    %c0_70 = arith.constant 0 : index
    %c0_71 = arith.constant 0 : index
    %c0_72 = arith.constant 0 : index
    %224 = vector.load %arg7[%c0_70, %c0_71, %c0_72] : memref<2x1x32xf32, #tpu.memory_space<vmem>>, vector<1x1x32xf32>
    %225 = vector.shape_cast %224 : vector<1x1x32xf32> to vector<1x32xf32>
    %226 = vector.broadcast %225 : vector<1x32xf32> to vector<16x32xf32>
    %227 = arith.addf %223, %226 : vector<16x32xf32>
    %228 = arith.addf %25, %227 : vector<16x32xf32>
    %c0_73 = arith.constant 0 : index
    %c0_74 = arith.constant 0 : index
    %c0_75 = arith.constant 0 : index
    %229 = vector.load %arg8[%c0_73, %c0_74, %c0_75] : memref<2x1x32xf32, #tpu.memory_space<vmem>>, vector<1x1x32xf32>
    %230 = vector.shape_cast %229 : vector<1x1x32xf32> to vector<1x32xf32>
    %c0_76 = arith.constant 0 : index
    %c0_77 = arith.constant 0 : index
    %c0_78 = arith.constant 0 : index
    %231 = vector.load %arg9[%c0_76, %c0_77, %c0_78] : memref<2x1x32xf32, #tpu.memory_space<vmem>>, vector<1x1x32xf32>
    %232 = vector.shape_cast %231 : vector<1x1x32xf32> to vector<1x32xf32>
    %cst_79 = arith.constant dense<0.000000e+00> : vector<16xf32>
    %233 = vector.multi_reduction <add>, %228, %cst_79 [1] : vector<16x32xf32> to vector<16xf32>
    %234 = vector.shape_cast %233 : vector<16xf32> to vector<16x1xf32>
    %cst_80 = arith.constant 3.200000e+01 : f32
    %235 = vector.broadcast %cst_80 : f32 to vector<16x1xf32>
    %236 = arith.divf %234, %235 : vector<16x1xf32>
    %237 = vector.broadcast %236 : vector<16x1xf32> to vector<16x32xf32>
    %238 = arith.subf %228, %237 : vector<16x32xf32>
    %239 = arith.mulf %238, %238 : vector<16x32xf32>
    %cst_81 = arith.constant dense<0.000000e+00> : vector<16xf32>
    %240 = vector.multi_reduction <add>, %239, %cst_81 [1] : vector<16x32xf32> to vector<16xf32>
    %241 = vector.shape_cast %240 : vector<16xf32> to vector<16x1xf32>
    %cst_82 = arith.constant 3.200000e+01 : f32
    %242 = vector.broadcast %cst_82 : f32 to vector<16x1xf32>
    %243 = arith.divf %241, %242 : vector<16x1xf32>
    %244 = vector.broadcast %236 : vector<16x1xf32> to vector<16x32xf32>
    %245 = arith.subf %228, %244 : vector<16x32xf32>
    %cst_83 = arith.constant 9.99999996E-13 : f32
    %246 = vector.broadcast %cst_83 : f32 to vector<16x1xf32>
    %247 = arith.addf %243, %246 : vector<16x1xf32>
    %248 = math.rsqrt %247 : vector<16x1xf32>
    %249 = vector.broadcast %248 : vector<16x1xf32> to vector<16x32xf32>
    %250 = arith.mulf %245, %249 : vector<16x32xf32>
    %251 = vector.broadcast %230 : vector<1x32xf32> to vector<16x32xf32>
    %252 = arith.mulf %250, %251 : vector<16x32xf32>
    %253 = vector.broadcast %232 : vector<1x32xf32> to vector<16x32xf32>
    %254 = arith.addf %252, %253 : vector<16x32xf32>
    %c0_84 = arith.constant 0 : index
    %c0_85 = arith.constant 0 : index
    %c0_86 = arith.constant 0 : index
    %255 = vector.load %arg10[%c0_84, %c0_85, %c0_86] : memref<2x32x64xf32, #tpu.memory_space<vmem>>, vector<1x32x64xf32>
    %256 = vector.shape_cast %255 : vector<1x32x64xf32> to vector<32x64xf32>
    %257 = arith.truncf %254 : vector<16x32xf32> to vector<16x32xbf16>
    %258 = arith.truncf %256 : vector<32x64xf32> to vector<32x64xbf16>
    %cst_87 = arith.constant dense<0.000000e+00> : vector<16x64xf32>
    %259 = tpu.matmul %257, %258, %cst_87 {dimension_numbers = #tpu.dot_dimension_numbers<[1], [0], [0], [1], [0, 0, 1, 1], [], []>} : vector<16x32xbf16>, vector<32x64xbf16>, vector<16x64xf32> -> vector<16x64xf32>
    %c0_88 = arith.constant 0 : index
    %c0_89 = arith.constant 0 : index
    %c0_90 = arith.constant 0 : index
    %260 = vector.load %arg11[%c0_88, %c0_89, %c0_90] : memref<2x1x64xf32, #tpu.memory_space<vmem>>, vector<1x1x64xf32>
    %261 = vector.shape_cast %260 : vector<1x1x64xf32> to vector<1x64xf32>
    %262 = vector.broadcast %261 : vector<1x64xf32> to vector<16x64xf32>
    %263 = arith.addf %259, %262 : vector<16x64xf32>
    %cst_91 = arith.constant 5.000000e-01 : f32
    %264 = vector.broadcast %cst_91 : f32 to vector<16x64xf32>
    %265 = arith.mulf %264, %263 : vector<16x64xf32>
    %cst_92 = arith.constant 0.707106769 : f32
    %266 = vector.broadcast %cst_92 : f32 to vector<16x64xf32>
    %267 = arith.mulf %263, %266 : vector<16x64xf32>
    %268 = math.erf %267 : vector<16x64xf32>
    %cst_93 = arith.constant 1.000000e+00 : f32
    %269 = vector.broadcast %cst_93 : f32 to vector<16x64xf32>
    %270 = arith.addf %269, %268 : vector<16x64xf32>
    %271 = arith.mulf %265, %270 : vector<16x64xf32>
    %c0_94 = arith.constant 0 : index
    %c0_95 = arith.constant 0 : index
    %c0_96 = arith.constant 0 : index
    %272 = vector.load %arg12[%c0_94, %c0_95, %c0_96] : memref<2x64x32xf32, #tpu.memory_space<vmem>>, vector<1x64x32xf32>
    %273 = vector.shape_cast %272 : vector<1x64x32xf32> to vector<64x32xf32>
    %274 = arith.truncf %271 : vector<16x64xf32> to vector<16x64xbf16>
    %275 = arith.truncf %273 : vector<64x32xf32> to vector<64x32xbf16>
    %cst_97 = arith.constant dense<0.000000e+00> : vector<16x32xf32>
    %276 = tpu.matmul %274, %275, %cst_97 {dimension_numbers = #tpu.dot_dimension_numbers<[1], [0], [0], [1], [0, 0, 1, 1], [], []>} : vector<16x64xbf16>, vector<64x32xbf16>, vector<16x32xf32> -> vector<16x32xf32>
    %c0_98 = arith.constant 0 : index
    %c0_99 = arith.constant 0 : index
    %c0_100 = arith.constant 0 : index
    %277 = vector.load %arg13[%c0_98, %c0_99, %c0_100] : memref<2x1x32xf32, #tpu.memory_space<vmem>>, vector<1x1x32xf32>
    %278 = vector.shape_cast %277 : vector<1x1x32xf32> to vector<1x32xf32>
    %279 = vector.broadcast %278 : vector<1x32xf32> to vector<16x32xf32>
    %280 = arith.addf %276, %279 : vector<16x32xf32>
    %281 = arith.addf %254, %280 : vector<16x32xf32>
    %c0_101 = arith.constant 0 : index
    %c0_102 = arith.constant 0 : index
    %c0_103 = arith.constant 0 : index
    %282 = vector.load %arg14[%c0_101, %c0_102, %c0_103] : memref<2x1x32xf32, #tpu.memory_space<vmem>>, vector<1x1x32xf32>
    %283 = vector.shape_cast %282 : vector<1x1x32xf32> to vector<1x32xf32>
    %c0_104 = arith.constant 0 : index
    %c0_105 = arith.constant 0 : index
    %c0_106 = arith.constant 0 : index
    %284 = vector.load %arg15[%c0_104, %c0_105, %c0_106] : memref<2x1x32xf32, #tpu.memory_space<vmem>>, vector<1x1x32xf32>
    %285 = vector.shape_cast %284 : vector<1x1x32xf32> to vector<1x32xf32>
    %cst_107 = arith.constant dense<0.000000e+00> : vector<16xf32>
    %286 = vector.multi_reduction <add>, %281, %cst_107 [1] : vector<16x32xf32> to vector<16xf32>
    %287 = vector.shape_cast %286 : vector<16xf32> to vector<16x1xf32>
    %cst_108 = arith.constant 3.200000e+01 : f32
    %288 = vector.broadcast %cst_108 : f32 to vector<16x1xf32>
    %289 = arith.divf %287, %288 : vector<16x1xf32>
    %290 = vector.broadcast %289 : vector<16x1xf32> to vector<16x32xf32>
    %291 = arith.subf %281, %290 : vector<16x32xf32>
    %292 = arith.mulf %291, %291 : vector<16x32xf32>
    %cst_109 = arith.constant dense<0.000000e+00> : vector<16xf32>
    %293 = vector.multi_reduction <add>, %292, %cst_109 [1] : vector<16x32xf32> to vector<16xf32>
    %294 = vector.shape_cast %293 : vector<16xf32> to vector<16x1xf32>
    %cst_110 = arith.constant 3.200000e+01 : f32
    %295 = vector.broadcast %cst_110 : f32 to vector<16x1xf32>
    %296 = arith.divf %294, %295 : vector<16x1xf32>
    %297 = vector.broadcast %289 : vector<16x1xf32> to vector<16x32xf32>
    %298 = arith.subf %281, %297 : vector<16x32xf32>
    %cst_111 = arith.constant 9.99999996E-13 : f32
    %299 = vector.broadcast %cst_111 : f32 to vector<16x1xf32>
    %300 = arith.addf %296, %299 : vector<16x1xf32>
    %301 = math.rsqrt %300 : vector<16x1xf32>
    %302 = vector.broadcast %301 : vector<16x1xf32> to vector<16x32xf32>
    %303 = arith.mulf %298, %302 : vector<16x32xf32>
    %304 = vector.broadcast %283 : vector<1x32xf32> to vector<16x32xf32>
    %305 = arith.mulf %303, %304 : vector<16x32xf32>
    %306 = vector.broadcast %285 : vector<1x32xf32> to vector<16x32xf32>
    %307 = arith.addf %305, %306 : vector<16x32xf32>
    %c1 = arith.constant 1 : index
    %c0_112 = arith.constant 0 : index
    %c0_113 = arith.constant 0 : index
    %308 = vector.load %arg4[%c1, %c0_112, %c0_113] : memref<2x32x96xf32, #tpu.memory_space<vmem>>, vector<1x32x96xf32>
    %309 = vector.shape_cast %308 : vector<1x32x96xf32> to vector<32x96xf32>
    %310 = arith.truncf %307 : vector<16x32xf32> to vector<16x32xbf16>
    %311 = arith.truncf %309 : vector<32x96xf32> to vector<32x96xbf16>
    %cst_114 = arith.constant dense<0.000000e+00> : vector<16x96xf32>
    %312 = tpu.matmul %310, %311, %cst_114 {dimension_numbers = #tpu.dot_dimension_numbers<[1], [0], [0], [1], [0, 0, 1, 1], [], []>} : vector<16x32xbf16>, vector<32x96xbf16>, vector<16x96xf32> -> vector<16x96xf32>
    %c1_115 = arith.constant 1 : index
    %c0_116 = arith.constant 0 : index
    %c0_117 = arith.constant 0 : index
    %313 = vector.load %arg5[%c1_115, %c0_116, %c0_117] : memref<2x1x96xf32, #tpu.memory_space<vmem>>, vector<1x1x96xf32>
    %314 = vector.shape_cast %313 : vector<1x1x96xf32> to vector<1x96xf32>
    %315 = vector.broadcast %314 : vector<1x96xf32> to vector<16x96xf32>
    %316 = arith.addf %312, %315 : vector<16x96xf32>
    %317 = vector.extract_strided_slice %316 {offsets = [0, 0], sizes = [16, 32], strides = [1, 1]} : vector<16x96xf32> to vector<16x32xf32>
    %cst_118 = arith.constant 0.353553385 : f32
    %318 = vector.broadcast %cst_118 : f32 to vector<16x32xf32>
    %319 = arith.mulf %317, %318 : vector<16x32xf32>
    %320 = vector.extract_strided_slice %316 {offsets = [0, 32], sizes = [16, 32], strides = [1, 1]} : vector<16x96xf32> to vector<16x32xf32>
    %321 = vector.extract_strided_slice %316 {offsets = [0, 64], sizes = [16, 32], strides = [1, 1]} : vector<16x96xf32> to vector<16x32xf32>
    %322 = vector.extract_strided_slice %0 {offsets = [0, 0], sizes = [1, 8], strides = [1, 1]} : vector<2x8xf32> to vector<1x8xf32>
    %323 = vector.extract_strided_slice %319 {offsets = [0, 0], sizes = [8, 8], strides = [1, 1]} : vector<16x32xf32> to vector<8x8xf32>
    %324 = vector.extract_strided_slice %320 {offsets = [0, 0], sizes = [8, 8], strides = [1, 1]} : vector<16x32xf32> to vector<8x8xf32>
    %325 = arith.truncf %323 : vector<8x8xf32> to vector<8x8xbf16>
    %326 = arith.truncf %324 : vector<8x8xf32> to vector<8x8xbf16>
    %cst_119 = arith.constant dense<0.000000e+00> : vector<8x8xf32>
    %327 = tpu.matmul %325, %326, %cst_119 {dimension_numbers = #tpu.dot_dimension_numbers<[1], [1], [0], [0], [0, 0, 1, 0], [], []>} : vector<8x8xbf16>, vector<8x8xbf16>, vector<8x8xf32> -> vector<8x8xf32>
    %328 = vector.broadcast %322 : vector<1x8xf32> to vector<8x8xf32>
    %329 = arith.addf %327, %328 : vector<8x8xf32>
    %cst_120 = arith.constant dense<0xFF800000> : vector<8xf32>
    %330 = vector.multi_reduction <maximumf>, %329, %cst_120 [1] : vector<8x8xf32> to vector<8xf32>
    %331 = vector.shape_cast %330 : vector<8xf32> to vector<8x1xf32>
    %332 = vector.broadcast %331 : vector<8x1xf32> to vector<8x8xf32>
    %333 = arith.subf %329, %332 : vector<8x8xf32>
    %334 = math.exp %333 : vector<8x8xf32>
    %cst_121 = arith.constant dense<0.000000e+00> : vector<8xf32>
    %335 = vector.multi_reduction <add>, %334, %cst_121 [1] : vector<8x8xf32> to vector<8xf32>
    %336 = vector.shape_cast %335 : vector<8xf32> to vector<8x1xf32>
    %337 = tpu.reciprocal %336 {approx = true} : vector<8x1xf32> -> vector<8x1xf32>
    %338 = vector.broadcast %337 : vector<8x1xf32> to vector<8x8xf32>
    %339 = arith.mulf %334, %338 : vector<8x8xf32>
    %340 = vector.extract_strided_slice %321 {offsets = [0, 0], sizes = [8, 8], strides = [1, 1]} : vector<16x32xf32> to vector<8x8xf32>
    %341 = arith.truncf %339 : vector<8x8xf32> to vector<8x8xbf16>
    %342 = arith.truncf %340 : vector<8x8xf32> to vector<8x8xbf16>
    %cst_122 = arith.constant dense<0.000000e+00> : vector<8x8xf32>
    %343 = tpu.matmul %341, %342, %cst_122 {dimension_numbers = #tpu.dot_dimension_numbers<[1], [0], [0], [1], [0, 0, 1, 1], [], []>} : vector<8x8xbf16>, vector<8x8xbf16>, vector<8x8xf32> -> vector<8x8xf32>
    %c0_123 = arith.constant 0 : index
    %c0_124 = arith.constant 0 : index
    %344 = vector.load %arg21[%c0_123, %c0_124] : memref<16x32xf32, #tpu.memory_space<vmem>>, vector<8x8xf32>
    tpu.vector_store %arg21[%c0_123, %c0_124], %343 {strides = array<i32>} : memref<16x32xf32, #tpu.memory_space<vmem>>, vector<8x8xf32>,
    %345 = vector.extract_strided_slice %319 {offsets = [0, 8], sizes = [8, 8], strides = [1, 1]} : vector<16x32xf32> to vector<8x8xf32>
    %346 = vector.extract_strided_slice %320 {offsets = [0, 8], sizes = [8, 8], strides = [1, 1]} : vector<16x32xf32> to vector<8x8xf32>
    %347 = arith.truncf %345 : vector<8x8xf32> to vector<8x8xbf16>
    %348 = arith.truncf %346 : vector<8x8xf32> to vector<8x8xbf16>
    %cst_125 = arith.constant dense<0.000000e+00> : vector<8x8xf32>
    %349 = tpu.matmul %347, %348, %cst_125 {dimension_numbers = #tpu.dot_dimension_numbers<[1], [1], [0], [0], [0, 0, 1, 0], [], []>} : vector<8x8xbf16>, vector<8x8xbf16>, vector<8x8xf32> -> vector<8x8xf32>
    %350 = vector.broadcast %322 : vector<1x8xf32> to vector<8x8xf32>
    %351 = arith.addf %349, %350 : vector<8x8xf32>
    %cst_126 = arith.constant dense<0xFF800000> : vector<8xf32>
    %352 = vector.multi_reduction <maximumf>, %351, %cst_126 [1] : vector<8x8xf32> to vector<8xf32>
    %353 = vector.shape_cast %352 : vector<8xf32> to vector<8x1xf32>
    %354 = vector.broadcast %353 : vector<8x1xf32> to vector<8x8xf32>
    %355 = arith.subf %351, %354 : vector<8x8xf32>
    %356 = math.exp %355 : vector<8x8xf32>
    %cst_127 = arith.constant dense<0.000000e+00> : vector<8xf32>
    %357 = vector.multi_reduction <add>, %356, %cst_127 [1] : vector<8x8xf32> to vector<8xf32>
    %358 = vector.shape_cast %357 : vector<8xf32> to vector<8x1xf32>
    %359 = tpu.reciprocal %358 {approx = true} : vector<8x1xf32> -> vector<8x1xf32>
    %360 = vector.broadcast %359 : vector<8x1xf32> to vector<8x8xf32>
    %361 = arith.mulf %356, %360 : vector<8x8xf32>
    %362 = vector.extract_strided_slice %321 {offsets = [0, 8], sizes = [8, 8], strides = [1, 1]} : vector<16x32xf32> to vector<8x8xf32>
    %363 = arith.truncf %361 : vector<8x8xf32> to vector<8x8xbf16>
    %364 = arith.truncf %362 : vector<8x8xf32> to vector<8x8xbf16>
    %cst_128 = arith.constant dense<0.000000e+00> : vector<8x8xf32>
    %365 = tpu.matmul %363, %364, %cst_128 {dimension_numbers = #tpu.dot_dimension_numbers<[1], [0], [0], [1], [0, 0, 1, 1], [], []>} : vector<8x8xbf16>, vector<8x8xbf16>, vector<8x8xf32> -> vector<8x8xf32>
    %c0_129 = arith.constant 0 : index
    %c8_130 = arith.constant 8 : index
    %366 = vector.load %arg21[%c0_129, %c8_130] : memref<16x32xf32, #tpu.memory_space<vmem>>, vector<8x8xf32>
    tpu.vector_store %arg21[%c0_129, %c8_130], %365 {strides = array<i32>} : memref<16x32xf32, #tpu.memory_space<vmem>>, vector<8x8xf32>,
    %367 = vector.extract_strided_slice %319 {offsets = [0, 16], sizes = [8, 8], strides = [1, 1]} : vector<16x32xf32> to vector<8x8xf32>
    %368 = vector.extract_strided_slice %320 {offsets = [0, 16], sizes = [8, 8], strides = [1, 1]} : vector<16x32xf32> to vector<8x8xf32>
    %369 = arith.truncf %367 : vector<8x8xf32> to vector<8x8xbf16>
    %370 = arith.truncf %368 : vector<8x8xf32> to vector<8x8xbf16>
    %cst_131 = arith.constant dense<0.000000e+00> : vector<8x8xf32>
    %371 = tpu.matmul %369, %370, %cst_131 {dimension_numbers = #tpu.dot_dimension_numbers<[1], [1], [0], [0], [0, 0, 1, 0], [], []>} : vector<8x8xbf16>, vector<8x8xbf16>, vector<8x8xf32> -> vector<8x8xf32>
    %372 = vector.broadcast %322 : vector<1x8xf32> to vector<8x8xf32>
    %373 = arith.addf %371, %372 : vector<8x8xf32>
    %cst_132 = arith.constant dense<0xFF800000> : vector<8xf32>
    %374 = vector.multi_reduction <maximumf>, %373, %cst_132 [1] : vector<8x8xf32> to vector<8xf32>
    %375 = vector.shape_cast %374 : vector<8xf32> to vector<8x1xf32>
    %376 = vector.broadcast %375 : vector<8x1xf32> to vector<8x8xf32>
    %377 = arith.subf %373, %376 : vector<8x8xf32>
    %378 = math.exp %377 : vector<8x8xf32>
    %cst_133 = arith.constant dense<0.000000e+00> : vector<8xf32>
    %379 = vector.multi_reduction <add>, %378, %cst_133 [1] : vector<8x8xf32> to vector<8xf32>
    %380 = vector.shape_cast %379 : vector<8xf32> to vector<8x1xf32>
    %381 = tpu.reciprocal %380 {approx = true} : vector<8x1xf32> -> vector<8x1xf32>
    %382 = vector.broadcast %381 : vector<8x1xf32> to vector<8x8xf32>
    %383 = arith.mulf %378, %382 : vector<8x8xf32>
    %384 = vector.extract_strided_slice %321 {offsets = [0, 16], sizes = [8, 8], strides = [1, 1]} : vector<16x32xf32> to vector<8x8xf32>
    %385 = arith.truncf %383 : vector<8x8xf32> to vector<8x8xbf16>
    %386 = arith.truncf %384 : vector<8x8xf32> to vector<8x8xbf16>
    %cst_134 = arith.constant dense<0.000000e+00> : vector<8x8xf32>
    %387 = tpu.matmul %385, %386, %cst_134 {dimension_numbers = #tpu.dot_dimension_numbers<[1], [0], [0], [1], [0, 0, 1, 1], [], []>} : vector<8x8xbf16>, vector<8x8xbf16>, vector<8x8xf32> -> vector<8x8xf32>
    %c0_135 = arith.constant 0 : index
    %c16_136 = arith.constant 16 : index
    %388 = vector.load %arg21[%c0_135, %c16_136] : memref<16x32xf32, #tpu.memory_space<vmem>>, vector<8x8xf32>
    tpu.vector_store %arg21[%c0_135, %c16_136], %387 {strides = array<i32>} : memref<16x32xf32, #tpu.memory_space<vmem>>, vector<8x8xf32>,
    %389 = vector.extract_strided_slice %319 {offsets = [0, 24], sizes = [8, 8], strides = [1, 1]} : vector<16x32xf32> to vector<8x8xf32>
    %390 = vector.extract_strided_slice %320 {offsets = [0, 24], sizes = [8, 8], strides = [1, 1]} : vector<16x32xf32> to vector<8x8xf32>
    %391 = arith.truncf %389 : vector<8x8xf32> to vector<8x8xbf16>
    %392 = arith.truncf %390 : vector<8x8xf32> to vector<8x8xbf16>
    %cst_137 = arith.constant dense<0.000000e+00> : vector<8x8xf32>
    %393 = tpu.matmul %391, %392, %cst_137 {dimension_numbers = #tpu.dot_dimension_numbers<[1], [1], [0], [0], [0, 0, 1, 0], [], []>} : vector<8x8xbf16>, vector<8x8xbf16>, vector<8x8xf32> -> vector<8x8xf32>
    %394 = vector.broadcast %322 : vector<1x8xf32> to vector<8x8xf32>
    %395 = arith.addf %393, %394 : vector<8x8xf32>
    %cst_138 = arith.constant dense<0xFF800000> : vector<8xf32>
    %396 = vector.multi_reduction <maximumf>, %395, %cst_138 [1] : vector<8x8xf32> to vector<8xf32>
    %397 = vector.shape_cast %396 : vector<8xf32> to vector<8x1xf32>
    %398 = vector.broadcast %397 : vector<8x1xf32> to vector<8x8xf32>
    %399 = arith.subf %395, %398 : vector<8x8xf32>
    %400 = math.exp %399 : vector<8x8xf32>
    %cst_139 = arith.constant dense<0.000000e+00> : vector<8xf32>
    %401 = vector.multi_reduction <add>, %400, %cst_139 [1] : vector<8x8xf32> to vector<8xf32>
    %402 = vector.shape_cast %401 : vector<8xf32> to vector<8x1xf32>
    %403 = tpu.reciprocal %402 {approx = true} : vector<8x1xf32> -> vector<8x1xf32>
    %404 = vector.broadcast %403 : vector<8x1xf32> to vector<8x8xf32>
    %405 = arith.mulf %400, %404 : vector<8x8xf32>
    %406 = vector.extract_strided_slice %321 {offsets = [0, 24], sizes = [8, 8], strides = [1, 1]} : vector<16x32xf32> to vector<8x8xf32>
    %407 = arith.truncf %405 : vector<8x8xf32> to vector<8x8xbf16>
    %408 = arith.truncf %406 : vector<8x8xf32> to vector<8x8xbf16>
    %cst_140 = arith.constant dense<0.000000e+00> : vector<8x8xf32>
    %409 = tpu.matmul %407, %408, %cst_140 {dimension_numbers = #tpu.dot_dimension_numbers<[1], [0], [0], [1], [0, 0, 1, 1], [], []>} : vector<8x8xbf16>, vector<8x8xbf16>, vector<8x8xf32> -> vector<8x8xf32>
    %c0_141 = arith.constant 0 : index
    %c24_142 = arith.constant 24 : index
    %410 = vector.load %arg21[%c0_141, %c24_142] : memref<16x32xf32, #tpu.memory_space<vmem>>, vector<8x8xf32>
    tpu.vector_store %arg21[%c0_141, %c24_142], %409 {strides = array<i32>} : memref<16x32xf32, #tpu.memory_space<vmem>>, vector<8x8xf32>,
    %411 = vector.extract_strided_slice %0 {offsets = [1, 0], sizes = [1, 8], strides = [1, 1]} : vector<2x8xf32> to vector<1x8xf32>
    %412 = vector.extract_strided_slice %319 {offsets = [8, 0], sizes = [8, 8], strides = [1, 1]} : vector<16x32xf32> to vector<8x8xf32>
    %413 = vector.extract_strided_slice %320 {offsets = [8, 0], sizes = [8, 8], strides = [1, 1]} : vector<16x32xf32> to vector<8x8xf32>
    %414 = arith.truncf %412 : vector<8x8xf32> to vector<8x8xbf16>
    %415 = arith.truncf %413 : vector<8x8xf32> to vector<8x8xbf16>
    %cst_143 = arith.constant dense<0.000000e+00> : vector<8x8xf32>
    %416 = tpu.matmul %414, %415, %cst_143 {dimension_numbers = #tpu.dot_dimension_numbers<[1], [1], [0], [0], [0, 0, 1, 0], [], []>} : vector<8x8xbf16>, vector<8x8xbf16>, vector<8x8xf32> -> vector<8x8xf32>
    %417 = vector.broadcast %411 : vector<1x8xf32> to vector<8x8xf32>
    %418 = arith.addf %416, %417 : vector<8x8xf32>
    %cst_144 = arith.constant dense<0xFF800000> : vector<8xf32>
    %419 = vector.multi_reduction <maximumf>, %418, %cst_144 [1] : vector<8x8xf32> to vector<8xf32>
    %420 = vector.shape_cast %419 : vector<8xf32> to vector<8x1xf32>
    %421 = vector.broadcast %420 : vector<8x1xf32> to vector<8x8xf32>
    %422 = arith.subf %418, %421 : vector<8x8xf32>
    %423 = math.exp %422 : vector<8x8xf32>
    %cst_145 = arith.constant dense<0.000000e+00> : vector<8xf32>
    %424 = vector.multi_reduction <add>, %423, %cst_145 [1] : vector<8x8xf32> to vector<8xf32>
    %425 = vector.shape_cast %424 : vector<8xf32> to vector<8x1xf32>
    %426 = tpu.reciprocal %425 {approx = true} : vector<8x1xf32> -> vector<8x1xf32>
    %427 = vector.broadcast %426 : vector<8x1xf32> to vector<8x8xf32>
    %428 = arith.mulf %423, %427 : vector<8x8xf32>
    %429 = vector.extract_strided_slice %321 {offsets = [8, 0], sizes = [8, 8], strides = [1, 1]} : vector<16x32xf32> to vector<8x8xf32>
    %430 = arith.truncf %428 : vector<8x8xf32> to vector<8x8xbf16>
    %431 = arith.truncf %429 : vector<8x8xf32> to vector<8x8xbf16>
    %cst_146 = arith.constant dense<0.000000e+00> : vector<8x8xf32>
    %432 = tpu.matmul %430, %431, %cst_146 {dimension_numbers = #tpu.dot_dimension_numbers<[1], [0], [0], [1], [0, 0, 1, 1], [], []>} : vector<8x8xbf16>, vector<8x8xbf16>, vector<8x8xf32> -> vector<8x8xf32>
    %c8_147 = arith.constant 8 : index
    %c0_148 = arith.constant 0 : index
    %433 = vector.load %arg21[%c8_147, %c0_148] : memref<16x32xf32, #tpu.memory_space<vmem>>, vector<8x8xf32>
    tpu.vector_store %arg21[%c8_147, %c0_148], %432 {strides = array<i32>} : memref<16x32xf32, #tpu.memory_space<vmem>>, vector<8x8xf32>,
    %434 = vector.extract_strided_slice %319 {offsets = [8, 8], sizes = [8, 8], strides = [1, 1]} : vector<16x32xf32> to vector<8x8xf32>
    %435 = vector.extract_strided_slice %320 {offsets = [8, 8], sizes = [8, 8], strides = [1, 1]} : vector<16x32xf32> to vector<8x8xf32>
    %436 = arith.truncf %434 : vector<8x8xf32> to vector<8x8xbf16>
    %437 = arith.truncf %435 : vector<8x8xf32> to vector<8x8xbf16>
    %cst_149 = arith.constant dense<0.000000e+00> : vector<8x8xf32>
    %438 = tpu.matmul %436, %437, %cst_149 {dimension_numbers = #tpu.dot_dimension_numbers<[1], [1], [0], [0], [0, 0, 1, 0], [], []>} : vector<8x8xbf16>, vector<8x8xbf16>, vector<8x8xf32> -> vector<8x8xf32>
    %439 = vector.broadcast %411 : vector<1x8xf32> to vector<8x8xf32>
    %440 = arith.addf %438, %439 : vector<8x8xf32>
    %cst_150 = arith.constant dense<0xFF800000> : vector<8xf32>
    %441 = vector.multi_reduction <maximumf>, %440, %cst_150 [1] : vector<8x8xf32> to vector<8xf32>
    %442 = vector.shape_cast %441 : vector<8xf32> to vector<8x1xf32>
    %443 = vector.broadcast %442 : vector<8x1xf32> to vector<8x8xf32>
    %444 = arith.subf %440, %443 : vector<8x8xf32>
    %445 = math.exp %444 : vector<8x8xf32>
    %cst_151 = arith.constant dense<0.000000e+00> : vector<8xf32>
    %446 = vector.multi_reduction <add>, %445, %cst_151 [1] : vector<8x8xf32> to vector<8xf32>
    %447 = vector.shape_cast %446 : vector<8xf32> to vector<8x1xf32>
    %448 = tpu.reciprocal %447 {approx = true} : vector<8x1xf32> -> vector<8x1xf32>
    %449 = vector.broadcast %448 : vector<8x1xf32> to vector<8x8xf32>
    %450 = arith.mulf %445, %449 : vector<8x8xf32>
    %451 = vector.extract_strided_slice %321 {offsets = [8, 8], sizes = [8, 8], strides = [1, 1]} : vector<16x32xf32> to vector<8x8xf32>
    %452 = arith.truncf %450 : vector<8x8xf32> to vector<8x8xbf16>
    %453 = arith.truncf %451 : vector<8x8xf32> to vector<8x8xbf16>
    %cst_152 = arith.constant dense<0.000000e+00> : vector<8x8xf32>
    %454 = tpu.matmul %452, %453, %cst_152 {dimension_numbers = #tpu.dot_dimension_numbers<[1], [0], [0], [1], [0, 0, 1, 1], [], []>} : vector<8x8xbf16>, vector<8x8xbf16>, vector<8x8xf32> -> vector<8x8xf32>
    %c8_153 = arith.constant 8 : index
    %c8_154 = arith.constant 8 : index
    %455 = vector.load %arg21[%c8_153, %c8_154] : memref<16x32xf32, #tpu.memory_space<vmem>>, vector<8x8xf32>
    tpu.vector_store %arg21[%c8_153, %c8_154], %454 {strides = array<i32>} : memref<16x32xf32, #tpu.memory_space<vmem>>, vector<8x8xf32>,
    %456 = vector.extract_strided_slice %319 {offsets = [8, 16], sizes = [8, 8], strides = [1, 1]} : vector<16x32xf32> to vector<8x8xf32>
    %457 = vector.extract_strided_slice %320 {offsets = [8, 16], sizes = [8, 8], strides = [1, 1]} : vector<16x32xf32> to vector<8x8xf32>
    %458 = arith.truncf %456 : vector<8x8xf32> to vector<8x8xbf16>
    %459 = arith.truncf %457 : vector<8x8xf32> to vector<8x8xbf16>
    %cst_155 = arith.constant dense<0.000000e+00> : vector<8x8xf32>
    %460 = tpu.matmul %458, %459, %cst_155 {dimension_numbers = #tpu.dot_dimension_numbers<[1], [1], [0], [0], [0, 0, 1, 0], [], []>} : vector<8x8xbf16>, vector<8x8xbf16>, vector<8x8xf32> -> vector<8x8xf32>
    %461 = vector.broadcast %411 : vector<1x8xf32> to vector<8x8xf32>
    %462 = arith.addf %460, %461 : vector<8x8xf32>
    %cst_156 = arith.constant dense<0xFF800000> : vector<8xf32>
    %463 = vector.multi_reduction <maximumf>, %462, %cst_156 [1] : vector<8x8xf32> to vector<8xf32>
    %464 = vector.shape_cast %463 : vector<8xf32> to vector<8x1xf32>
    %465 = vector.broadcast %464 : vector<8x1xf32> to vector<8x8xf32>
    %466 = arith.subf %462, %465 : vector<8x8xf32>
    %467 = math.exp %466 : vector<8x8xf32>
    %cst_157 = arith.constant dense<0.000000e+00> : vector<8xf32>
    %468 = vector.multi_reduction <add>, %467, %cst_157 [1] : vector<8x8xf32> to vector<8xf32>
    %469 = vector.shape_cast %468 : vector<8xf32> to vector<8x1xf32>
    %470 = tpu.reciprocal %469 {approx = true} : vector<8x1xf32> -> vector<8x1xf32>
    %471 = vector.broadcast %470 : vector<8x1xf32> to vector<8x8xf32>
    %472 = arith.mulf %467, %471 : vector<8x8xf32>
    %473 = vector.extract_strided_slice %321 {offsets = [8, 16], sizes = [8, 8], strides = [1, 1]} : vector<16x32xf32> to vector<8x8xf32>
    %474 = arith.truncf %472 : vector<8x8xf32> to vector<8x8xbf16>
    %475 = arith.truncf %473 : vector<8x8xf32> to vector<8x8xbf16>
    %cst_158 = arith.constant dense<0.000000e+00> : vector<8x8xf32>
    %476 = tpu.matmul %474, %475, %cst_158 {dimension_numbers = #tpu.dot_dimension_numbers<[1], [0], [0], [1], [0, 0, 1, 1], [], []>} : vector<8x8xbf16>, vector<8x8xbf16>, vector<8x8xf32> -> vector<8x8xf32>
    %c8_159 = arith.constant 8 : index
    %c16_160 = arith.constant 16 : index
    %477 = vector.load %arg21[%c8_159, %c16_160] : memref<16x32xf32, #tpu.memory_space<vmem>>, vector<8x8xf32>
    tpu.vector_store %arg21[%c8_159, %c16_160], %476 {strides = array<i32>} : memref<16x32xf32, #tpu.memory_space<vmem>>, vector<8x8xf32>,
    %478 = vector.extract_strided_slice %319 {offsets = [8, 24], sizes = [8, 8], strides = [1, 1]} : vector<16x32xf32> to vector<8x8xf32>
    %479 = vector.extract_strided_slice %320 {offsets = [8, 24], sizes = [8, 8], strides = [1, 1]} : vector<16x32xf32> to vector<8x8xf32>
    %480 = arith.truncf %478 : vector<8x8xf32> to vector<8x8xbf16>
    %481 = arith.truncf %479 : vector<8x8xf32> to vector<8x8xbf16>
    %cst_161 = arith.constant dense<0.000000e+00> : vector<8x8xf32>
    %482 = tpu.matmul %480, %481, %cst_161 {dimension_numbers = #tpu.dot_dimension_numbers<[1], [1], [0], [0], [0, 0, 1, 0], [], []>} : vector<8x8xbf16>, vector<8x8xbf16>, vector<8x8xf32> -> vector<8x8xf32>
    %483 = vector.broadcast %411 : vector<1x8xf32> to vector<8x8xf32>
    %484 = arith.addf %482, %483 : vector<8x8xf32>
    %cst_162 = arith.constant dense<0xFF800000> : vector<8xf32>
    %485 = vector.multi_reduction <maximumf>, %484, %cst_162 [1] : vector<8x8xf32> to vector<8xf32>
    %486 = vector.shape_cast %485 : vector<8xf32> to vector<8x1xf32>
    %487 = vector.broadcast %486 : vector<8x1xf32> to vector<8x8xf32>
    %488 = arith.subf %484, %487 : vector<8x8xf32>
    %489 = math.exp %488 : vector<8x8xf32>
    %cst_163 = arith.constant dense<0.000000e+00> : vector<8xf32>
    %490 = vector.multi_reduction <add>, %489, %cst_163 [1] : vector<8x8xf32> to vector<8xf32>
    %491 = vector.shape_cast %490 : vector<8xf32> to vector<8x1xf32>
    %492 = tpu.reciprocal %491 {approx = true} : vector<8x1xf32> -> vector<8x1xf32>
    %493 = vector.broadcast %492 : vector<8x1xf32> to vector<8x8xf32>
    %494 = arith.mulf %489, %493 : vector<8x8xf32>
    %495 = vector.extract_strided_slice %321 {offsets = [8, 24], sizes = [8, 8], strides = [1, 1]} : vector<16x32xf32> to vector<8x8xf32>
    %496 = arith.truncf %494 : vector<8x8xf32> to vector<8x8xbf16>
    %497 = arith.truncf %495 : vector<8x8xf32> to vector<8x8xbf16>
    %cst_164 = arith.constant dense<0.000000e+00> : vector<8x8xf32>
    %498 = tpu.matmul %496, %497, %cst_164 {dimension_numbers = #tpu.dot_dimension_numbers<[1], [0], [0], [1], [0, 0, 1, 1], [], []>} : vector<8x8xbf16>, vector<8x8xbf16>, vector<8x8xf32> -> vector<8x8xf32>
    %c8_165 = arith.constant 8 : index
    %c24_166 = arith.constant 24 : index
    %499 = vector.load %arg21[%c8_165, %c24_166] : memref<16x32xf32, #tpu.memory_space<vmem>>, vector<8x8xf32>
    tpu.vector_store %arg21[%c8_165, %c24_166], %498 {strides = array<i32>} : memref<16x32xf32, #tpu.memory_space<vmem>>, vector<8x8xf32>,
    %c0_167 = arith.constant 0 : index
    %c0_168 = arith.constant 0 : index
    %500 = vector.load %arg21[%c0_167, %c0_168] : memref<16x32xf32, #tpu.memory_space<vmem>>, vector<16x32xf32>
    %c1_169 = arith.constant 1 : index
    %c0_170 = arith.constant 0 : index
    %c0_171 = arith.constant 0 : index
    %501 = vector.load %arg6[%c1_169, %c0_170, %c0_171] : memref<2x32x32xf32, #tpu.memory_space<vmem>>, vector<1x32x32xf32>
    %502 = vector.shape_cast %501 : vector<1x32x32xf32> to vector<32x32xf32>
    %503 = arith.truncf %500 : vector<16x32xf32> to vector<16x32xbf16>
    %504 = arith.truncf %502 : vector<32x32xf32> to vector<32x32xbf16>
    %cst_172 = arith.constant dense<0.000000e+00> : vector<16x32xf32>
    %505 = tpu.matmul %503, %504, %cst_172 {dimension_numbers = #tpu.dot_dimension_numbers<[1], [0], [0], [1], [0, 0, 1, 1], [], []>} : vector<16x32xbf16>, vector<32x32xbf16>, vector<16x32xf32> -> vector<16x32xf32>
    %c1_173 = arith.constant 1 : index
    %c0_174 = arith.constant 0 : index
    %c0_175 = arith.constant 0 : index
    %506 = vector.load %arg7[%c1_173, %c0_174, %c0_175] : memref<2x1x32xf32, #tpu.memory_space<vmem>>, vector<1x1x32xf32>
    %507 = vector.shape_cast %506 : vector<1x1x32xf32> to vector<1x32xf32>
    %508 = vector.broadcast %507 : vector<1x32xf32> to vector<16x32xf32>
    %509 = arith.addf %505, %508 : vector<16x32xf32>
    %510 = arith.addf %307, %509 : vector<16x32xf32>
    %c1_176 = arith.constant 1 : index
    %c0_177 = arith.constant 0 : index
    %c0_178 = arith.constant 0 : index
    %511 = vector.load %arg8[%c1_176, %c0_177, %c0_178] : memref<2x1x32xf32, #tpu.memory_space<vmem>>, vector<1x1x32xf32>
    %512 = vector.shape_cast %511 : vector<1x1x32xf32> to vector<1x32xf32>
    %c1_179 = arith.constant 1 : index
    %c0_180 = arith.constant 0 : index
    %c0_181 = arith.constant 0 : index
    %513 = vector.load %arg9[%c1_179, %c0_180, %c0_181] : memref<2x1x32xf32, #tpu.memory_space<vmem>>, vector<1x1x32xf32>
    %514 = vector.shape_cast %513 : vector<1x1x32xf32> to vector<1x32xf32>
    %cst_182 = arith.constant dense<0.000000e+00> : vector<16xf32>
    %515 = vector.multi_reduction <add>, %510, %cst_182 [1] : vector<16x32xf32> to vector<16xf32>
    %516 = vector.shape_cast %515 : vector<16xf32> to vector<16x1xf32>
    %cst_183 = arith.constant 3.200000e+01 : f32
    %517 = vector.broadcast %cst_183 : f32 to vector<16x1xf32>
    %518 = arith.divf %516, %517 : vector<16x1xf32>
    %519 = vector.broadcast %518 : vector<16x1xf32> to vector<16x32xf32>
    %520 = arith.subf %510, %519 : vector<16x32xf32>
    %521 = arith.mulf %520, %520 : vector<16x32xf32>
    %cst_184 = arith.constant dense<0.000000e+00> : vector<16xf32>
    %522 = vector.multi_reduction <add>, %521, %cst_184 [1] : vector<16x32xf32> to vector<16xf32>
    %523 = vector.shape_cast %522 : vector<16xf32> to vector<16x1xf32>
    %cst_185 = arith.constant 3.200000e+01 : f32
    %524 = vector.broadcast %cst_185 : f32 to vector<16x1xf32>
    %525 = arith.divf %523, %524 : vector<16x1xf32>
    %526 = vector.broadcast %518 : vector<16x1xf32> to vector<16x32xf32>
    %527 = arith.subf %510, %526 : vector<16x32xf32>
    %cst_186 = arith.constant 9.99999996E-13 : f32
    %528 = vector.broadcast %cst_186 : f32 to vector<16x1xf32>
    %529 = arith.addf %525, %528 : vector<16x1xf32>
    %530 = math.rsqrt %529 : vector<16x1xf32>
    %531 = vector.broadcast %530 : vector<16x1xf32> to vector<16x32xf32>
    %532 = arith.mulf %527, %531 : vector<16x32xf32>
    %533 = vector.broadcast %512 : vector<1x32xf32> to vector<16x32xf32>
    %534 = arith.mulf %532, %533 : vector<16x32xf32>
    %535 = vector.broadcast %514 : vector<1x32xf32> to vector<16x32xf32>
    %536 = arith.addf %534, %535 : vector<16x32xf32>
    %c1_187 = arith.constant 1 : index
    %c0_188 = arith.constant 0 : index
    %c0_189 = arith.constant 0 : index
    %537 = vector.load %arg10[%c1_187, %c0_188, %c0_189] : memref<2x32x64xf32, #tpu.memory_space<vmem>>, vector<1x32x64xf32>
    %538 = vector.shape_cast %537 : vector<1x32x64xf32> to vector<32x64xf32>
    %539 = arith.truncf %536 : vector<16x32xf32> to vector<16x32xbf16>
    %540 = arith.truncf %538 : vector<32x64xf32> to vector<32x64xbf16>
    %cst_190 = arith.constant dense<0.000000e+00> : vector<16x64xf32>
    %541 = tpu.matmul %539, %540, %cst_190 {dimension_numbers = #tpu.dot_dimension_numbers<[1], [0], [0], [1], [0, 0, 1, 1], [], []>} : vector<16x32xbf16>, vector<32x64xbf16>, vector<16x64xf32> -> vector<16x64xf32>
    %c1_191 = arith.constant 1 : index
    %c0_192 = arith.constant 0 : index
    %c0_193 = arith.constant 0 : index
    %542 = vector.load %arg11[%c1_191, %c0_192, %c0_193] : memref<2x1x64xf32, #tpu.memory_space<vmem>>, vector<1x1x64xf32>
    %543 = vector.shape_cast %542 : vector<1x1x64xf32> to vector<1x64xf32>
    %544 = vector.broadcast %543 : vector<1x64xf32> to vector<16x64xf32>
    %545 = arith.addf %541, %544 : vector<16x64xf32>
    %cst_194 = arith.constant 5.000000e-01 : f32
    %546 = vector.broadcast %cst_194 : f32 to vector<16x64xf32>
    %547 = arith.mulf %546, %545 : vector<16x64xf32>
    %cst_195 = arith.constant 0.707106769 : f32
    %548 = vector.broadcast %cst_195 : f32 to vector<16x64xf32>
    %549 = arith.mulf %545, %548 : vector<16x64xf32>
    %550 = math.erf %549 : vector<16x64xf32>
    %cst_196 = arith.constant 1.000000e+00 : f32
    %551 = vector.broadcast %cst_196 : f32 to vector<16x64xf32>
    %552 = arith.addf %551, %550 : vector<16x64xf32>
    %553 = arith.mulf %547, %552 : vector<16x64xf32>
    %c1_197 = arith.constant 1 : index
    %c0_198 = arith.constant 0 : index
    %c0_199 = arith.constant 0 : index
    %554 = vector.load %arg12[%c1_197, %c0_198, %c0_199] : memref<2x64x32xf32, #tpu.memory_space<vmem>>, vector<1x64x32xf32>
    %555 = vector.shape_cast %554 : vector<1x64x32xf32> to vector<64x32xf32>
    %556 = arith.truncf %553 : vector<16x64xf32> to vector<16x64xbf16>
    %557 = arith.truncf %555 : vector<64x32xf32> to vector<64x32xbf16>
    %cst_200 = arith.constant dense<0.000000e+00> : vector<16x32xf32>
    %558 = tpu.matmul %556, %557, %cst_200 {dimension_numbers = #tpu.dot_dimension_numbers<[1], [0], [0], [1], [0, 0, 1, 1], [], []>} : vector<16x64xbf16>, vector<64x32xbf16>, vector<16x32xf32> -> vector<16x32xf32>
    %c1_201 = arith.constant 1 : index
    %c0_202 = arith.constant 0 : index
    %c0_203 = arith.constant 0 : index
    %559 = vector.load %arg13[%c1_201, %c0_202, %c0_203] : memref<2x1x32xf32, #tpu.memory_space<vmem>>, vector<1x1x32xf32>
    %560 = vector.shape_cast %559 : vector<1x1x32xf32> to vector<1x32xf32>
    %561 = vector.broadcast %560 : vector<1x32xf32> to vector<16x32xf32>
    %562 = arith.addf %558, %561 : vector<16x32xf32>
    %563 = arith.addf %536, %562 : vector<16x32xf32>
    %c1_204 = arith.constant 1 : index
    %c0_205 = arith.constant 0 : index
    %c0_206 = arith.constant 0 : index
    %564 = vector.load %arg14[%c1_204, %c0_205, %c0_206] : memref<2x1x32xf32, #tpu.memory_space<vmem>>, vector<1x1x32xf32>
    %565 = vector.shape_cast %564 : vector<1x1x32xf32> to vector<1x32xf32>
    %c1_207 = arith.constant 1 : index
    %c0_208 = arith.constant 0 : index
    %c0_209 = arith.constant 0 : index
    %566 = vector.load %arg15[%c1_207, %c0_208, %c0_209] : memref<2x1x32xf32, #tpu.memory_space<vmem>>, vector<1x1x32xf32>
    %567 = vector.shape_cast %566 : vector<1x1x32xf32> to vector<1x32xf32>
    %cst_210 = arith.constant dense<0.000000e+00> : vector<16xf32>
    %568 = vector.multi_reduction <add>, %563, %cst_210 [1] : vector<16x32xf32> to vector<16xf32>
    %569 = vector.shape_cast %568 : vector<16xf32> to vector<16x1xf32>
    %cst_211 = arith.constant 3.200000e+01 : f32
    %570 = vector.broadcast %cst_211 : f32 to vector<16x1xf32>
    %571 = arith.divf %569, %570 : vector<16x1xf32>
    %572 = vector.broadcast %571 : vector<16x1xf32> to vector<16x32xf32>
    %573 = arith.subf %563, %572 : vector<16x32xf32>
    %574 = arith.mulf %573, %573 : vector<16x32xf32>
    %cst_212 = arith.constant dense<0.000000e+00> : vector<16xf32>
    %575 = vector.multi_reduction <add>, %574, %cst_212 [1] : vector<16x32xf32> to vector<16xf32>
    %576 = vector.shape_cast %575 : vector<16xf32> to vector<16x1xf32>
    %cst_213 = arith.constant 3.200000e+01 : f32
    %577 = vector.broadcast %cst_213 : f32 to vector<16x1xf32>
    %578 = arith.divf %576, %577 : vector<16x1xf32>
    %579 = vector.broadcast %571 : vector<16x1xf32> to vector<16x32xf32>
    %580 = arith.subf %563, %579 : vector<16x32xf32>
    %cst_214 = arith.constant 9.99999996E-13 : f32
    %581 = vector.broadcast %cst_214 : f32 to vector<16x1xf32>
    %582 = arith.addf %578, %581 : vector<16x1xf32>
    %583 = math.rsqrt %582 : vector<16x1xf32>
    %584 = vector.broadcast %583 : vector<16x1xf32> to vector<16x32xf32>
    %585 = arith.mulf %580, %584 : vector<16x32xf32>
    %586 = vector.broadcast %565 : vector<1x32xf32> to vector<16x32xf32>
    %587 = arith.mulf %585, %586 : vector<16x32xf32>
    %588 = vector.broadcast %567 : vector<1x32xf32> to vector<16x32xf32>
    %589 = arith.addf %587, %588 : vector<16x32xf32>
    %590 = vector.extract_strided_slice %589 {offsets = [0, 0], sizes = [1, 32], strides = [1, 1]} : vector<16x32xf32> to vector<1x32xf32>
    %c0_215 = arith.constant 0 : index
    %c0_216 = arith.constant 0 : index
    %591 = vector.load %arg22[%c0_215, %c0_216] : memref<2x32xf32, #tpu.memory_space<vmem>>, vector<1x32xf32>
    tpu.vector_store %arg22[%c0_215, %c0_216], %590 {strides = array<i32>} : memref<2x32xf32, #tpu.memory_space<vmem>>, vector<1x32xf32>,
    %592 = vector.extract_strided_slice %589 {offsets = [8, 0], sizes = [1, 32], strides = [1, 1]} : vector<16x32xf32> to vector<1x32xf32>
    %c1_217 = arith.constant 1 : index
    %c0_218 = arith.constant 0 : index
    %593 = vector.load %arg22[%c1_217, %c0_218] : memref<2x32xf32, #tpu.memory_space<vmem>>, vector<1x32xf32>
    tpu.vector_store %arg22[%c1_217, %c0_218], %592 {strides = array<i32>} : memref<2x32xf32, #tpu.memory_space<vmem>>, vector<1x32xf32>,
    %c0_219 = arith.constant 0 : index
    %c0_220 = arith.constant 0 : index
    %594 = vector.load %arg22[%c0_219, %c0_220] : memref<2x32xf32, #tpu.memory_space<vmem>>, vector<2x32xf32>
    %c0_221 = arith.constant 0 : index
    %c0_222 = arith.constant 0 : index
    %595 = vector.load %arg16[%c0_221, %c0_222] : memref<32x32xf32, #tpu.memory_space<vmem>>, vector<32x32xf32>
    %596 = arith.truncf %594 : vector<2x32xf32> to vector<2x32xbf16>
    %597 = arith.truncf %595 : vector<32x32xf32> to vector<32x32xbf16>
    %cst_223 = arith.constant dense<0.000000e+00> : vector<2x32xf32>
    %598 = tpu.matmul %596, %597, %cst_223 {dimension_numbers = #tpu.dot_dimension_numbers<[1], [0], [0], [1], [0, 0, 1, 1], [], []>} : vector<2x32xbf16>, vector<32x32xbf16>, vector<2x32xf32> -> vector<2x32xf32>
    %c0_224 = arith.constant 0 : index
    %c0_225 = arith.constant 0 : index
    %599 = vector.load %arg17[%c0_224, %c0_225] : memref<1x32xf32, #tpu.memory_space<vmem>>, vector<1x32xf32>
    %600 = vector.broadcast %599 : vector<1x32xf32> to vector<2x32xf32>
    %601 = arith.addf %598, %600 : vector<2x32xf32>
    %602 = math.tanh %601 : vector<2x32xf32>
    %c0_226 = arith.constant 0 : index
    %c0_227 = arith.constant 0 : index
    %603 = vector.load %arg18[%c0_226, %c0_227] : memref<32x3xf32, #tpu.memory_space<vmem>>, vector<32x3xf32>
    %604 = arith.truncf %602 : vector<2x32xf32> to vector<2x32xbf16>
    %605 = arith.truncf %603 : vector<32x3xf32> to vector<32x3xbf16>
    %cst_228 = arith.constant dense<0.000000e+00> : vector<2x3xf32>
    %606 = tpu.matmul %604, %605, %cst_228 {dimension_numbers = #tpu.dot_dimension_numbers<[1], [0], [0], [1], [0, 0, 1, 1], [], []>} : vector<2x32xbf16>, vector<32x3xbf16>, vector<2x3xf32> -> vector<2x3xf32>
    %c0_229 = arith.constant 0 : index
    %c0_230 = arith.constant 0 : index
    %607 = vector.load %arg19[%c0_229, %c0_230] : memref<1x3xf32, #tpu.memory_space<vmem>>, vector<1x3xf32>
    %608 = vector.broadcast %607 : vector<1x3xf32> to vector<2x3xf32>
    %609 = arith.addf %606, %608 : vector<2x3xf32>
    %c0_231 = arith.constant 0 : index
    %c0_232 = arith.constant 0 : index
    %610 = vector.load %arg20[%c0_231, %c0_232] : memref<2x3xf32, #tpu.memory_space<vmem>>, vector<2x3xf32>
    tpu.vector_store %arg20[%c0_231, %c0_232], %609 {strides = array<i32>} : memref<2x3xf32, #tpu.memory_space<vmem>>, vector<2x3xf32>,
    return
  }
}

</mosaic_0001>

<bundles_post_ra>
// kernel: bert_class_forward.1
= control target key start
LH: loop header
LB: loop body
LE: loop exit
PB: predicated region body
PF: predicated region fallthrough
CT: control target
= control target key end

     0   :  { %s2848_s0 = inlined_call_operand.vmem [shape: f32[16,32], index: 0, kind: input, shape index: {}]   ;;  %s2849_s1 = inlined_call_operand.vmem [shape: f32[2,8], index: 1, kind: input, shape index: {}]   ;;  %s2850_s2 = inlined_call_operand.vmem [shape: f32[1,32], index: 2, kind: input, shape index: {}]   ;;  %s2851_s3 = inlined_call_operand.vmem [shape: f32[1,32], index: 3, kind: input, shape index: {}]   ;;  %s2852_s4 = inlined_call_operand.vmem [shape: f32[2,32,96], index: 4, kind: input, shape index: {}]   ;;  %s2853_s5 = inlined_call_operand.vmem [shape: f32[2,1,96], index: 5, kind: input, shape index: {}]   ;;  %s2854_s6 = inlined_call_operand.vmem [shape: f32[2,32,32], index: 6, kind: input, shape index: {}]   ;;  %s2855_s7 = inlined_call_operand.vmem [shape: f32[2,1,32], index: 7, kind: input, shape index: {}]   ;;  %s2856_s8 = inlined_call_operand.vmem [shape: f32[2,1,32], index: 8, kind: input, shape index: {}]   ;;  %s2857_s9 = inlined_call_operand.vmem [shape: f32[2,1,32], index: 9, kind: input, shape index: {}]   ;;  %s2858_s10 = inlined_call_operand.vmem [shape: f32[2,32,64], index: 10, kind: input, shape index: {}]   ;;  %s2859_s11 = inlined_call_operand.vmem [shape: f32[2,1,64], index: 11, kind: input, shape index: {}]   ;;  %s2860_s12 = inlined_call_operand.vmem [shape: f32[2,64,32], index: 12, kind: input, shape index: {}]   ;;  %s2861_s13 = inlined_call_operand.vmem [shape: f32[2,1,32], index: 13, kind: input, shape index: {}]   ;;  %s2862_s14 = inlined_call_operand.vmem [shape: f32[2,1,32], index: 14, kind: input, shape index: {}]   ;;  %s2863_s15 = inlined_call_operand.vmem [shape: f32[2,1,32], index: 15, kind: input, shape index: {}]   ;;  %s2864_s16 = inlined_call_operand.vmem [shape: f32[32,32], index: 16, kind: input, shape index: {}]   ;;  %s2865_s17 = inlined_call_operand.vmem [shape: f32[1,32], index: 17, kind: input, shape index: {}]   ;;  %s2866_s18 = inlined_call_operand.vmem [shape: f32[32,3], index: 18, kind: input, shape index: {}]   ;;  %s2867_s19 = inlined_call_operand.vmem [shape: f32[1,3], index: 19, kind: input, shape index: {}]   ;;  %s2868_s20 = inlined_call_operand.hbm [shape: f32[2,3], index: 20, kind: output, shape index: {}]  }
   0x1   :  { %2887 = sst [smem:[#allocation7_spill]] %s2848_s0 }
   0x2   :  { %2888 = sst [smem:[#allocation8_spill]] %s2849_s1 }
   0x3   :  { %2889 = sst [smem:[#allocation9_spill]] %s2850_s2 }
   0x4   :  { %2890 = sst [smem:[#allocation10_spill]] %s2851_s3 }
   0x5   :  { %2891 = sst [smem:[#allocation11_spill]] %s2852_s4 }
   0x6   :  { %s2892_s23 = sld [smem:[#allocation7_spill]]  ;;  %vm72_vm0 = vcmask 261120  }
   0xc   :  { %v68_v0 = vld [vmem:[%s2892_s23] sm:$0xff]  ;;  %v69_v1 = vld [vmem:[%s2892_s23 + $0x8] sm:$0xff] }
   0xd   :  { %v73_v2 = vsel %vm72_vm0, %v68_v0, 0.0  ;;  %v76_v3 = vsel %vm72_vm0, %v69_v1, 0.0 }
   0xe   :  { %74 = vadd.xlane.f32.xlu0 %v73_v2 }
   0xf   :  { %25 = vsyncpa [#allocation5], 0  ;;  %v2083_v4 = vmov 32.0   ;;  %s2893_s26 = sld [smem:[#allocation11_spill]]  ;;  %v1943_v56 = vld [vmem:[%s2853_s5] ss:$0 sm:$0xff] }
  0x10   :  { %1961 = vrcp.f32 %v2083_v4  ;;  %s2894_s22 = sld [smem:[#allocation9_spill]]  ;;  %s2084_s27 = smov 72   ;;  %vm170_vm8 = vcmask 64512   ;;  %vm207_vm9 = vcmask 1043456   ;;  %vm286_vm10 = vcmask 130112  }
  0x11   :  { %s2895_s2 = sld [smem:[#allocation10_spill]]  ;;  %s2085_s28 = smov 96   ;;  %vm348_vm11 = vcmask 195712   ;;  %vm410_vm12 = vcmask 261312  }
  0x12   :  { %s2086_s4 = smov 120   ;;  %s2087_s29 = smov 88  }
  0x13   :  { %s2885_s30 = smov 112   ;;  %s2089_s0 = smov 80  }
  0x14   :  { %s2090_s21 = smov 104   ;;  %s2896_s23 = sld [smem:[#allocation8_spill]] }
  0x15   :  { %v136_v21 = vld [vmem:[%s2893_s26 + $0x10] sm:$0xff]  ;;  %v137_v22 = vld [vmem:[%s2893_s26 + $0x18] sm:$0xff]  ;;  %v134_v24 = vld [vmem:[%s2893_s26] sm:$0xff]  ;;  %s2881_s24 = smov 64   ;;  %s2879_s25 = smov 48  }
  0x16   :  { %77 = vadd.xlane.f32.xlu0 %v76_v3  ;;  %v1962_v5 = vpop.eup %1961  ;;  %v140_v23 = vpack.c.bf16 %v137_v22, %v136_v21  ;;  %v135_v25 = vld [vmem:[%s2893_s26 + $0x8] sm:$0xff]  ;;  %v1941_v46 = vld [vmem:[%s2894_s22] ss:$0 sm:$0xff]  ;;  %s2877_s3 = smov 40   ;;  %s2871_s1 = smov 16  }
  0x17   :  { %v80_v6 = vmul.f32 32.0, %v1962_v5  ;;  %vm84_vm1 = vweird.f32 %v1962_v5  ;;  %v139_v27 = vpack.c.bf16 %v135_v25, %v134_v24  ;;  %v1942_v51 = vld [vmem:[%s2895_s2] ss:$0 sm:$0xff]  ;;  %s2883_s2 = smov 56   ;;  %s2873_s22 = smov 8  }
  0x18   :  { %154 = vmatpush.bf16.msra.mxu0 %v140_v23 }
  0x19   :  { %v81_v7 = vsub.f32 1.0, %v80_v6 }
  0x1b   :  { %v82_v8 = vmul.f32 %v1962_v5, %v81_v7 }
  0x1c   :  { %155 = vmatpush.bf16.msra.mxu0 %v139_v27 }
  0x1d   :  { %v83_v9 = vadd.f32 %v1962_v5, %v82_v8 }
  0x1f   :  { %v2212_v10 = vsel %vm84_vm1, %v1962_v5, %v83_v9 }
  0x81   :  { %v75_v11 = vpop.xlane.xlu0 %74 }
  0x82   :  { %v86_v12 = vmul.f32 %v2212_v10, %v75_v11 }
  0x84   :  { %v88_v13 = vsub.f32 %v68_v0, %v86_v12 }
  0x86   :  { %v90_v14 = vmul.f32 %v88_v13, %v88_v13 }
  0x88   :  { %v92_v15 = vsel %vm72_vm0, %v90_v14, 0.0 }
  0x89   :  { %93 = vadd.xlane.f32.xlu1 %v92_v15  ;;  %v78_v16 = vpop.xlane.xlu0 %77 }
  0x8a   :  { %v87_v17 = vmul.f32 %v2212_v10, %v78_v16 }
  0x8c   :  { %v89_v18 = vsub.f32 %v69_v1, %v87_v17 }
  0x8e   :  { %v91_v19 = vmul.f32 %v89_v18, %v89_v18 }
  0x90   :  { %v95_v20 = vsel %vm72_vm0, %v91_v19, 0.0 }
  0x91   :  { %96 = vadd.xlane.f32.xlu1 %v95_v20 }
  0xfc   :  { %v94_v26 = vpop.xlane.xlu1 %93 }
  0xfd   :  { %v98_v28 = vmul.f32 %v94_v26, %v2212_v10  ;;  %v67_v26 = vld [vmem:[%s2896_s23] sm:$0x3]  ;;  %s2875_s23 = smov 24  }
  0xfe   :  { %v2293_v27 = vperm.slane %v67_v26, 0 }
  0xff   :  { %v100_v29 = vadd.f32 1e-12, %v98_v28 }
 0x101   :  { %1963 = vrsqrt.f32 %v100_v29  ;;  %vm108_vm3 = vweird.f32 %v100_v29 }
 0x104   :  { %v97_v30 = vpop.xlane.xlu1 %96 }
 0x105   :  { %v99_v31 = vmul.f32 %v97_v30, %v2212_v10 }
 0x107   :  { %v1964_v32 = vpop.eup %1963  ;;  %v101_v33 = vadd.f32 1e-12, %v99_v31 }
 0x108   :  { %v103_v34 = vmul.f32 %v1964_v32, %v100_v29  ;;  %vm109_vm2 = vweird.f32 %v1964_v32 }
 0x109   :  { %1965 = vrsqrt.f32 %v101_v33  ;;  %vm110_vm4 = vmor %vm108_vm3, %vm109_vm2  ;;  %vm118_vm6 = vweird.f32 %v101_v33 }
 0x10a   :  { %v104_v35 = vmul.f32 %v1964_v32, %v103_v34 }
 0x10c   :  { %v105_v36 = vmul.f32 0.5, %v104_v35 }
 0x10e   :  { %v106_v37 = vsub.f32 1.5, %v105_v36 }
 0x10f   :  { %v1966_v38 = vpop.eup %1965 }
 0x110   :  { %v107_v39 = vmul.f32 %v1964_v32, %v106_v37  ;;  %v113_v40 = vmul.f32 %v1966_v38, %v101_v33  ;;  %vm119_vm5 = vweird.f32 %v1966_v38 }
 0x111   :  { %vm120_vm7 = vmor %vm118_vm6, %vm119_vm5 }
 0x112   :  { %v114_v41 = vmul.f32 %v1966_v38, %v113_v40  ;;  %v111_v42 = vsel %vm110_vm4, %v1964_v32, %v107_v39 }
 0x113   :  { %v122_v45 = vmul.f32 %v111_v42, %v88_v13 }
 0x114   :  { %v115_v43 = vmul.f32 0.5, %v114_v41 }
 0x115   :  { %v127_v50 = vmul.f32 %v1941_v46, %v122_v45 }
 0x116   :  { %v116_v44 = vsub.f32 1.5, %v115_v43 }
 0x117   :  { %v2238_v53 = vadd.f32 %v1942_v51, %v127_v50 }
 0x118   :  { %v117_v47 = vmul.f32 %v1966_v38, %v116_v44 }
 0x11a   :  { %v121_v48 = vsel %vm120_vm7, %v1966_v38, %v117_v47  ;;  %v2310_v47 = vperm.slane %v67_v26, 1 }
 0x11b   :  { %v123_v49 = vmul.f32 %v121_v48, %v89_v18 }
 0x11d   :  { %v128_v52 = vmul.f32 %v1941_v46, %v123_v49 }
 0x11f   :  { %v2240_v54 = vadd.f32 %v1942_v51, %v128_v52 }
 0x121   :  { %v138_v55 = vpack.c.bf16 %v2240_v54, %v2238_v53 }
 0x123   :  { %1851 = vmatmul.msk.bf16.vlgmr.msra.gmra.mxu0 %vm72_vm0, %v138_v55 }
 0x1a0   :  { %v157_v57 = vpop.f32.mrf.mxu0 }
 0x1a1   :  { %v158_v58 = vadd.f32 %v1943_v56, %v157_v57 }
 0x1a3   :  { %v162_v59 = vmul.f32 0.35355338, %v158_v58  ;;  %v2248_v60 = vpack.c.bf16 %v158_v58, %v158_v58 }
 0x1a5   :  { %v164_v61 = vpack.c.bf16 %v162_v59, %v162_v59  ;;  %352 = vrot.lane.b32.xlu1 %v2248_v60, %s2084_s27  ;;  %168 = vrot.lane.b32.xlu2 %v2248_v60, %s2085_s28 }
 0x1a7   :  { %226 = vrot.lane.b32.xlu0 %v164_v61, %s2086_s4 }
 0x1a8   :  { %v159_v62 = vpop.f32.mrf.mxu0 }
 0x1a9   :  { %v160_v63 = vadd.f32 %v1943_v56, %v159_v62 }
 0x1ab   :  { %v2255_v0 = vpack.c.bf16 %v160_v63, %v160_v63  ;;  %v163_v1 = vmul.f32 0.35355338, %v160_v63 }
 0x1ad   :  { %416 = vrot.lane.b32.xlu1 %v2255_v0, %s2085_s28  ;;  %228 = vrot.lane.b32.xlu2 %v2248_v60, %s2087_s29  ;;  %v412_v2 = vpack.c.bf16 %v163_v1, %v163_v1 }
 0x1af   :  { %288 = vrot.lane.b32.xlu0 %v164_v61, %s2885_s30 }
 0x1b5   :  { %535 = vrot.lane.b32.xlu1 %v2255_v0, %s2089_s0  ;;  %290 = vrot.lane.b32.xlu2 %v2248_v60, %s2089_s0 }
 0x1b7   :  { %596 = vrot.lane.b32.xlu0 %v2255_v0, %s2084_s27 }
 0x1bd   :  { %350 = vrot.lane.b32.xlu2 %v164_v61, %s2090_s21 }
 0x1bf   :  { %533 = vrot.lane.b32.xlu0 %v412_v2, %s2885_s30 }
 0x1c5   :  { %474 = vrot.lane.b32.xlu2 %v2255_v0, %s2087_s29 }
 0x1cd   :  { %472 = vrot.lane.b32.xlu2 %v412_v2, %s2086_s4 }
 0x1d5   :  { %594 = vrot.lane.b32.xlu2 %v412_v2, %s2090_s21 }
 0x1ff   :  { %v169_v3 = vpop.permute.xlu2 %168 }
 0x200   :  { %v175_v4 = vsel %vm170_vm8, %v169_v3, 0 }
 0x201   :  { %184 = vmatpush.bf16.xpose.msra.mxu1 %v175_v4 }
 0x207   :  { %v229_v5 = vpop.permute.xlu2 %228 }
 0x208   :  { %1852 = vmatmul.msk.bf16.vlgmr.msra.gmra.mxu1 %vm170_vm8, %v164_v61  ;;  %v234_v6 = vsel %vm170_vm8, %v229_v5, 0 }
 0x209   :  { %243 = vmatpush.bf16.xpose.msra.mxu3 %v234_v6 }
 0x20f   :  { %v291_v7 = vpop.permute.xlu2 %290 }
 0x210   :  { %v296_v8 = vsel %vm170_vm8, %v291_v7, 0 }
 0x211   :  { %305 = vmatpush.bf16.xpose.msrb.mxu0 %v296_v8 }
 0x217   :  { %v353_v9 = vpop.permute.xlu1 %352  ;;  %v351_v11 = vpop.permute.xlu2 %350 }
 0x218   :  { %v358_v12 = vsel %vm170_vm8, %v353_v9, 0 }
 0x219   :  { %367 = vmatpush.bf16.xpose.msrb.mxu3 %v358_v12  ;;  %v227_v13 = vpop.permute.xlu0 %226 }
 0x21a   :  { %1854 = vmatmul.msk.bf16.vlgmr.msra.gmra.mxu3 %vm170_vm8, %v227_v13 }
 0x21f   :  { %v417_v14 = vpop.permute.xlu1 %416  ;;  %v475_v15 = vpop.permute.xlu2 %474 }
 0x220   :  { %v422_v16 = vsel %vm170_vm8, %v417_v14, 0  ;;  %v480_v17 = vsel %vm170_vm8, %v475_v15, 0 }
 0x221   :  { %431 = vmatpush.bf16.xpose.msra.mxu0 %v422_v16  ;;  %489 = vmatpush.bf16.xpose.msra.mxu3 %v480_v17  ;;  %v289_v18 = vpop.permute.xlu0 %288 }
 0x222   :  { %1856 = vmatmul.msk.bf16.vlgmr.msrb.gmra.mxu0 %vm170_vm8, %v289_v18 }
 0x227   :  { %v536_v19 = vpop.permute.xlu1 %535  ;;  %v473_v23 = vpop.permute.xlu2 %472 }
 0x228   :  { %v541_v20 = vsel %vm170_vm8, %v536_v19, 0 }
 0x229   :  { %550 = vmatpush.bf16.xpose.msrb.mxu0 %v541_v20  ;;  %v597_v21 = vpop.permute.xlu0 %596 }
 0x22a   :  { %v602_v22 = vsel %vm170_vm8, %v597_v21, 0  ;;  %1858 = vmatmul.msk.bf16.vlgmr.msrb.gmra.mxu3 %vm170_vm8, %v351_v11 }
 0x22b   :  { %611 = vmatpush.bf16.xpose.msrb.mxu3 %v602_v22 }
 0x22f   :  { %v595_v25 = vpop.permute.xlu2 %594 }
 0x231   :  { %v534_v24 = vpop.permute.xlu0 %533 }
 0x232   :  { %1860 = vmatmul.msk.bf16.vlgmr.msra.gmra.mxu0 %vm170_vm8, %v412_v2 }
 0x23a   :  { %1862 = vmatmul.msk.bf16.vlgmr.msra.gmra.mxu3 %vm170_vm8, %v473_v23 }
 0x242   :  { %1864 = vmatmul.msk.bf16.vlgmr.msrb.gmra.mxu0 %vm170_vm8, %v534_v24 }
 0x24a   :  { %1866 = vmatmul.msk.bf16.vlgmr.msrb.gmra.mxu3 %vm170_vm8, %v595_v25 }
 0x285   :  { %v186_v28 = vpop.f32.mrf.mxu1 }
 0x286   :  { %v187_v29 = vadd.f32 %v186_v28, %v2293_v27 }
 0x288   :  { %v190_v30 = vsel %vm170_vm8, %v187_v29, -inf }
 0x289   :  { %191 = vmax.xlane.f32.xlu2 %v190_v30 }
 0x28d   :  { %v188_v31 = vpop.f32.mrf.mxu1 }
 0x29d   :  { %v245_v32 = vpop.f32.mrf.mxu3 }
 0x29e   :  { %v246_v33 = vadd.f32 %v245_v32, %v2293_v27 }
 0x29f   :  { %v307_v34 = vpop.f32.mrf.mxu0 }
 0x2a0   :  { %v308_v35 = vadd.f32 %v307_v34, %v2293_v27  ;;  %v249_v36 = vsel %vm170_vm8, %v246_v33, -inf }
 0x2a1   :  { %250 = vmax.xlane.f32.xlu1 %v249_v36 }
 0x2a2   :  { %v311_v37 = vsel %vm170_vm8, %v308_v35, -inf }
 0x2a3   :  { %312 = vmax.xlane.f32.xlu2 %v311_v37 }
 0x2a5   :  { %v247_v38 = vpop.f32.mrf.mxu3 }
 0x2a7   :  { %v309_v39 = vpop.f32.mrf.mxu0 }
 0x2ad   :  { %v369_v40 = vpop.f32.mrf.mxu3 }
 0x2ae   :  { %v2302_v41 = vadd.f32 %v369_v40, %v2293_v27 }
 0x2af   :  { %v433_v42 = vpop.f32.mrf.mxu0 }
 0x2b0   :  { %v373_v43 = vsel %vm170_vm8, %v2302_v41, -inf  ;;  %v434_v59 = vadd.f32 %v433_v42, %v2310_v47 }
 0x2b1   :  { %374 = vmax.xlane.f32.xlu0 %v373_v43 }
 0x2b2   :  { %v437_v63 = vsel %vm170_vm8, %v434_v59, -inf }
 0x2b5   :  { %v371_v44 = vpop.f32.mrf.mxu3 }
 0x2b7   :  { %v435_v45 = vpop.f32.mrf.mxu0 }
 0x2ba   :  { %202 = vrot.lane.b32.xlu1 %v2248_v60, %s2881_s24 }
 0x2bb   :  { %261 = vrot.lane.b32.xlu2 %v2248_v60, %s2883_s2 }
 0x2bd   :  { %v491_v46 = vpop.f32.mrf.mxu3 }
 0x2be   :  { %v492_v61 = vadd.f32 %v491_v46, %v2310_v47 }
 0x2bf   :  { %v552_v48 = vpop.f32.mrf.mxu0 }
 0x2c0   :  { %v553_v49 = vadd.f32 %v552_v48, %v2310_v47  ;;  %v495_v62 = vsel %vm170_vm8, %v492_v61, -inf }
 0x2c2   :  { %v556_v50 = vsel %vm170_vm8, %v553_v49, -inf }
 0x2c3   :  { %557 = vmax.xlane.f32.xlu0 %v556_v50 }
 0x2c5   :  { %v493_v51 = vpop.f32.mrf.mxu3 }
 0x2c7   :  { %v554_v52 = vpop.f32.mrf.mxu0 }
 0x2cd   :  { %v613_v55 = vpop.f32.mrf.mxu3 }
 0x2ce   :  { %v2315_v56 = vadd.f32 %v613_v55, %v2310_v47 }
 0x2d0   :  { %v617_v57 = vsel %vm170_vm8, %v2315_v56, -inf }
 0x2d1   :  { %618 = vmax.xlane.f32.xlu0 %v617_v57 }
 0x2d5   :  { %v615_v58 = vpop.f32.mrf.mxu3 }
 0x2e4   :  { %496 = vmax.xlane.f32.xlu1 %v495_v62  ;;  %438 = vmax.xlane.f32.xlu2 %v437_v63 }
 0x2fc   :  { %323 = vrot.lane.b32.xlu2 %v2248_v60, %s2879_s25  ;;  %v192_v1 = vpop.xlane.xlu2 %191 }
 0x2fd   :  { %v193_v2 = vsub.f32 %v187_v29, %v192_v1 }
 0x2ff   :  { %v194_v3 = vmul.f32 1.442695, %v193_v2 }
 0x301   :  { %1967 = vpow2.f32 %v194_v3 }
 0x307   :  { %v2325_v4 = vpop.eup %1967 }
 0x308   :  { %v196_v5 = vsel %vm170_vm8, %v2325_v4, 0.0 }
 0x309   :  { %197 = vadd.xlane.f32.xlu0 %v196_v5 }
 0x314   :  { %v251_v6 = vpop.xlane.xlu1 %250 }
 0x315   :  { %v252_v7 = vsub.f32 %v246_v33, %v251_v6 }
 0x316   :  { %v313_v8 = vpop.xlane.xlu2 %312 }
 0x317   :  { %v253_v9 = vmul.f32 1.442695, %v252_v7  ;;  %v314_v11 = vsub.f32 %v308_v35, %v313_v8 }
 0x319   :  { %v315_v12 = vmul.f32 1.442695, %v314_v11  ;;  %1969 = vpow2.f32 %v253_v9 }
 0x31b   :  { %1971 = vpow2.f32 %v315_v12 }
 0x31d   :  { %385 = vrot.lane.b32.xlu0 %v2248_v60, %s2877_s3 }
 0x31e   :  { %v262_v17 = vpop.permute.xlu2 %261 }
 0x31f   :  { %v2331_v13 = vpop.eup %1969  ;;  %v267_v60 = vsel %vm207_vm9, %v262_v17, 0 }
 0x320   :  { %v255_v16 = vsel %vm170_vm8, %v2331_v13, 0.0 }
 0x321   :  { %v2333_v14 = vpop.eup %1971 }
 0x322   :  { %v317_v15 = vsel %vm170_vm8, %v2333_v14, 0.0 }
 0x323   :  { %318 = vadd.xlane.f32.xlu1 %v317_v15 }
 0x324   :  { %v375_v20 = vpop.xlane.xlu0 %374 }
 0x325   :  { %256 = vadd.xlane.f32.xlu2 %v255_v16  ;;  %v376_v31 = vsub.f32 %v2302_v41, %v375_v20 }
 0x327   :  { %v377_v32 = vmul.f32 1.442695, %v376_v31 }
 0x32c   :  { %v203_v18 = vpop.permute.xlu1 %202 }
 0x32d   :  { %v209_v19 = vsel %vm207_vm9, %v203_v18, 0 }
 0x32e   :  { %218 = vmatpush.bf16.msra.mxu2 %v209_v19 }
 0x332   :  { %276 = vmatpush.bf16.msrb.mxu2 %v267_v60 }
 0x336   :  { %v558_v21 = vpop.xlane.xlu0 %557 }
 0x337   :  { %v559_v22 = vsub.f32 %v553_v49, %v558_v21 }
 0x339   :  { %v560_v23 = vmul.f32 1.442695, %v559_v22 }
 0x33b   :  { %1973 = vpow2.f32 %v560_v23 }
 0x33c   :  { %507 = vrot.lane.b32.xlu1 %v2255_v0, %s2883_s2 }
 0x33d   :  { %449 = vrot.lane.b32.xlu2 %v2255_v0, %s2881_s24 }
 0x341   :  { %v2347_v36 = vpop.eup %1973 }
 0x342   :  { %v562_v42 = vsel %vm170_vm8, %v2347_v36, 0.0 }
 0x344   :  { %v619_v34 = vpop.xlane.xlu0 %618 }
 0x345   :  { %v620_v39 = vsub.f32 %v2315_v56, %v619_v34 }
 0x347   :  { %v621_v43 = vmul.f32 1.442695, %v620_v39 }
 0x357   :  { %v497_v24 = vpop.xlane.xlu1 %496  ;;  %v439_v25 = vpop.xlane.xlu2 %438 }
 0x358   :  { %v498_v26 = vsub.f32 %v492_v61, %v497_v24  ;;  %v440_v28 = vsub.f32 %v434_v59, %v439_v25 }
 0x35a   :  { %v499_v29 = vmul.f32 1.442695, %v498_v26  ;;  %v441_v30 = vmul.f32 1.442695, %v440_v28 }
 0x35c   :  { %1975 = vpow2.f32 %v499_v29 }
 0x35d   :  { %1977 = vpow2.f32 %v441_v30 }
 0x35e   :  { %1979 = vpow2.f32 %v377_v32 }
 0x35f   :  { %v324_v33 = vpop.permute.xlu2 %323  ;;  %1981 = vpow2.f32 %v621_v43 }
 0x360   :  { %v329_v35 = vsel %vm207_vm9, %v324_v33, 0 }
 0x361   :  { %338 = vmatpush.bf16.msrb.mxu1 %v329_v35 }
 0x362   :  { %v2349_v37 = vpop.eup %1975 }
 0x363   :  { %v1978_v38 = vpop.eup %1977  ;;  %v501_v41 = vsel %vm170_vm8, %v2349_v37, 0.0 }
 0x364   :  { %v443_v40 = vsel %vm170_vm8, %v1978_v38, 0.0  ;;  %v1980_v44 = vpop.eup %1979 }
 0x365   :  { %444 = vadd.xlane.f32.xlu0 %v443_v40  ;;  %v379_v45 = vsel %vm170_vm8, %v1980_v44, 0.0  ;;  %v2358_v46 = vpop.eup %1981 }
 0x366   :  { %502 = vadd.xlane.f32.xlu2 %v501_v41  ;;  %563 = vadd.xlane.f32.xlu1 %v562_v42  ;;  %v623_v48 = vsel %vm170_vm8, %v2358_v46, 0.0 }
 0x36d   :  { %380 = vadd.xlane.f32.xlu0 %v379_v45 }
 0x375   :  { %624 = vadd.xlane.f32.xlu0 %v623_v48 }
 0x37c   :  { %v198_v49 = vpop.xlane.xlu0 %197 }
 0x37d   :  { %1983 = vrcp.f32 %v198_v49 }
 0x37e   :  { %568 = vrot.lane.b32.xlu2 %v2255_v0, %s2879_s25 }
 0x383   :  { %v1984_v50 = vpop.eup %1983 }
 0x384   :  { %v200_v51 = vmul.f32 %v1984_v50, %v2325_v4 }
 0x386   :  { %v201_v52 = vpack.c.bf16 %v200_v51, %v200_v51 }
 0x388   :  { %1853 = vmatmul.msk.bf16.vlgmr.msra.gmra.mxu2 %vm170_vm8, %v201_v52 }
 0x389   :  { %629 = vrot.lane.b32.xlu0 %v2255_v0, %s2877_s3 }
 0x38f   :  { %v386_v55 = vpop.permute.xlu0 %385 }
 0x390   :  { %v391_v56 = vsel %vm207_vm9, %v386_v55, 0  ;;  %v659_v55 = vld [vmem:[%s2854_s6 + $0x10] sm:$0xff] }
 0x391   :  { %400 = vmatpush.bf16.msra.mxu2 %v391_v56  ;;  %v660_v56 = vld [vmem:[%s2854_s6 + $0x18] sm:$0xff] }
 0x396   :  { %v319_v57 = vpop.xlane.xlu1 %318 }
 0x397   :  { %1985 = vrcp.f32 %v319_v57  ;;  %v657_v57 = vld [vmem:[%s2854_s6] sm:$0xff] }
 0x398   :  { %v257_v58 = vpop.xlane.xlu2 %256 }
 0x399   :  { %1987 = vrcp.f32 %v257_v58  ;;  %v663_v58 = vpack.c.bf16 %v660_v56, %v659_v55 }
 0x39b   :  { %677 = vmatpush.bf16.msra.mxu0 %v663_v58  ;;  %v1947_v58 = vld [vmem:[%s2859_s11] ss:$0 sm:$0xff] }
 0x39d   :  { %v1986_v59 = vpop.eup %1985 }
 0x39e   :  { %v321_v61 = vmul.f32 %v1986_v59, %v2333_v14  ;;  %v658_v59 = vld [vmem:[%s2854_s6 + $0x8] sm:$0xff] }
 0x39f   :  { %v1988_v62 = vpop.eup %1987 }
 0x3a0   :  { %v259_v63 = vmul.f32 %v1988_v62, %v2331_v13  ;;  %v450_v1 = vpop.permute.xlu2 %449  ;;  %v322_v2 = vpack.c.bf16 %v321_v61, %v321_v61  ;;  %v662_v61 = vpack.c.bf16 %v658_v59, %v657_v57 }
 0x3a1   :  { %v455_v3 = vsel %vm207_vm9, %v450_v1, 0 }
 0x3a2   :  { %1857 = vmatmul.msk.bf16.vlgmr.msrb.gmra.mxu1 %vm170_vm8, %v322_v2  ;;  %v260_v0 = vpack.c.bf16 %v259_v63, %v259_v63  ;;  %678 = vmatpush.bf16.msra.mxu0 %v662_v61 }
 0x3a3   :  { %464 = vmatpush.bf16.msra.mxu1 %v455_v3  ;;  %v1944_v3 = vld [vmem:[%s2855_s7] ss:$0 sm:$0xff] }
 0x3a4   :  { %1855 = vmatmul.msk.bf16.vlgmr.msrb.gmra.mxu2 %vm170_vm8, %v260_v0 }
 0x3ae   :  { %v508_v4 = vpop.permute.xlu1 %507 }
 0x3af   :  { %v513_v5 = vsel %vm207_vm9, %v508_v4, 0 }
 0x3b0   :  { %522 = vmatpush.bf16.msrb.mxu2 %v513_v5 }
 0x3d8   :  { %v445_v6 = vpop.xlane.xlu0 %444 }
 0x3d9   :  { %1989 = vrcp.f32 %v445_v6  ;;  %v503_v7 = vpop.xlane.xlu2 %502  ;;  %v564_v14 = vpop.xlane.xlu1 %563 }
 0x3df   :  { %v1990_v8 = vpop.eup %1989 }
 0x3e0   :  { %v447_v9 = vmul.f32 %v1990_v8, %v1978_v38  ;;  %v381_v11 = vpop.xlane.xlu0 %380 }
 0x3e1   :  { %1991 = vrcp.f32 %v381_v11  ;;  %v569_v12 = vpop.permute.xlu2 %568 }
 0x3e2   :  { %v448_v13 = vpack.c.bf16 %v447_v9, %v447_v9  ;;  %v574_v15 = vsel %vm207_vm9, %v569_v12, 0  ;;  %1993 = vrcp.f32 %v564_v14 }
 0x3e3   :  { %583 = vmatpush.bf16.msrb.mxu1 %v574_v15  ;;  %1995 = vrcp.f32 %v503_v7 }
 0x3e4   :  { %1861 = vmatmul.msk.bf16.vlgmr.msra.gmra.mxu1 %vm170_vm8, %v448_v13 }
 0x3e7   :  { %v1992_v16 = vpop.eup %1991 }
 0x3e8   :  { %v383_v17 = vmul.f32 %v1992_v16, %v1980_v44  ;;  %v1994_v19 = vpop.eup %1993  ;;  %v625_v22 = vpop.xlane.xlu0 %624 }
 0x3e9   :  { %v566_v60 = vmul.f32 %v1994_v19, %v2347_v36  ;;  %v1996_v21 = vpop.eup %1995  ;;  %1997 = vrcp.f32 %v625_v22 }
 0x3ea   :  { %v384_v18 = vpack.c.bf16 %v383_v17, %v383_v17  ;;  %v505_v23 = vmul.f32 %v1996_v21, %v2349_v37 }
 0x3eb   :  { %v567_v20 = vpack.c.bf16 %v566_v60, %v566_v60 }
 0x3ec   :  { %1859 = vmatmul.msk.bf16.vlgmr.msra.gmra.mxu2 %vm170_vm8, %v384_v18  ;;  %v506_v24 = vpack.c.bf16 %v505_v23, %v505_v23 }
 0x3ef   :  { %v1998_v28 = vpop.eup %1997 }
 0x3f0   :  { %v627_v29 = vmul.f32 %v1998_v28, %v2358_v46 }
 0x3f2   :  { %v628_v30 = vpack.c.bf16 %v627_v29, %v627_v29 }
 0x3f4   :  { %1865 = vmatmul.msk.bf16.vlgmr.msrb.gmra.mxu1 %vm170_vm8, %v567_v20  ;;  %v746_v20 = vld [vmem:[%s2858_s10 + $0x18] sm:$0xff] }
 0x3fb   :  { %v630_v25 = vpop.permute.xlu0 %629 }
 0x3fc   :  { %v635_v26 = vsel %vm207_vm9, %v630_v25, 0  ;;  %1863 = vmatmul.msk.bf16.vlgmr.msrb.gmra.mxu2 %vm170_vm8, %v506_v24  ;;  %v743_v24 = vld [vmem:[%s2858_s10] sm:$0xff]  ;;  %v744_v25 = vld [vmem:[%s2858_s10 + $0x8] sm:$0xff] }
 0x3fd   :  { %644 = vmatpush.bf16.msra.mxu2 %v635_v26  ;;  %v748_v28 = vpack.c.bf16 %v744_v25, %v743_v24 }
 0x40b   :  { %v220_v31 = vpop.f32.mrf.mxu2 }
 0x40c   :  { %224 = vst.msk [vmem:[#allocation2] sm:$0xff] %vm170_vm8, %v220_v31  ;;  %1867 = vmatmul.msk.bf16.vlgmr.msra.gmra.mxu2 %vm170_vm8, %v628_v30 }
 0x413   :  { %v222_v32 = vpop.f32.mrf.mxu2 }
 0x41f   :  { %v340_v33 = vpop.f32.mrf.mxu1 }
 0x420   :  { %345 = vrot.lane.b32.xlu0 %v340_v33, %s2871_s1 }
 0x427   :  { %v278_v34 = vpop.f32.mrf.mxu2  ;;  %v342_v35 = vpop.f32.mrf.mxu1 }
 0x428   :  { %283 = vrot.lane.b32.xlu0 %v278_v34, %s2873_s22 }
 0x42f   :  { %v280_v36 = vpop.f32.mrf.mxu2 }
 0x461   :  { %v466_v37 = vpop.f32.mrf.mxu1 }
 0x462   :  { %470 = vst.msk [vmem:[#allocation2 + $0x8] sm:$0xff] %vm170_vm8, %v466_v37 }
 0x469   :  { %v468_v38 = vpop.f32.mrf.mxu1 }
 0x46f   :  { %v402_v39 = vpop.f32.mrf.mxu2 }
 0x470   :  { %407 = vrot.lane.b32.xlu0 %v402_v39, %s2875_s23 }
 0x471   :  { %v585_v40 = vpop.f32.mrf.mxu1 }
 0x477   :  { %v404_v41 = vpop.f32.mrf.mxu2 }
 0x479   :  { %v587_v42 = vpop.f32.mrf.mxu1 }
 0x47f   :  { %v524_v43 = vpop.f32.mrf.mxu2 }
 0x480   :  { %529 = vrot.lane.b32.xlu2 %v524_v43, %s2873_s22 }
 0x487   :  { %v526_v44 = vpop.f32.mrf.mxu2 }
 0x488   :  { %590 = vrot.lane.b32.xlu2 %v585_v40, %s2871_s1  ;;  %v1945_v44 = vld [vmem:[%s2856_s8] ss:$0 sm:$0xff] }
 0x48f   :  { %v646_v45 = vpop.f32.mrf.mxu2 }
 0x490   :  { %651 = vrot.lane.b32.xlu1 %v646_v45, %s2875_s23  ;;  %s2898_s23 = smov 56  }
 0x492   :  { %v346_v46 = vpop.permute.xlu0 %345 }
 0x497   :  { %v648_v48 = vpop.f32.mrf.mxu2 }
 0x49a   :  { %v284_v49 = vpop.permute.xlu0 %283 }
 0x49b   :  { %287 = vst.msk [vmem:[#allocation2] sm:$0xff] %vm286_vm10, %v284_v49  ;;  %v1946_v49 = vld [vmem:[%s2857_s9] ss:$0 sm:$0xff] }
 0x49c   :  { %349 = vst.msk [vmem:[#allocation2] sm:$0xff] %vm348_vm11, %v346_v46 }
 0x4da   :  { %v530_v50 = vpop.permute.xlu2 %529 }
 0x4db   :  { %532 = vst.msk [vmem:[#allocation2 + $0x8] sm:$0xff] %vm286_vm10, %v530_v50 }
 0x4e2   :  { %v408_v51 = vpop.permute.xlu0 %407  ;;  %v591_v52 = vpop.permute.xlu2 %590 }
 0x4e3   :  { %411 = vst.msk [vmem:[#allocation2] sm:$0xff] %vm410_vm12, %v408_v51 }
 0x4e4   :  { %593 = vst.msk [vmem:[#allocation2 + $0x8] sm:$0xff] %vm348_vm11, %v591_v52 }
 0x4ea   :  { %v655_v63 = vld [vmem:[#allocation2] sm:$0xff] }
 0x502   :  { %v652_v62 = vpop.permute.xlu1 %651 }
 0x503   :  { %654 = vst.msk [vmem:[#allocation2 + $0x8] sm:$0xff] %vm410_vm12, %v652_v62 }
 0x50a   :  { %v656_v1 = vld [vmem:[#allocation2 + $0x8] sm:$0xff] }
 0x50b   :  { %v661_v2 = vpack.c.bf16 %v656_v1, %v655_v63 }
 0x50d   :  { %1868 = vmatmul.msk.bf16.vlgmr.msra.gmra.mxu0 %vm72_vm0, %v661_v2 }
 0x58a   :  { %v680_v0 = vpop.f32.mrf.mxu0 }
 0x58b   :  { %v681_v4 = vadd.f32 %v1944_v3, %v680_v0 }
 0x58d   :  { %v685_v5 = vadd.f32 %v681_v4, %v2238_v53 }
 0x58f   :  { %v689_v6 = vsel %vm72_vm0, %v685_v5, 0.0 }
 0x590   :  { %690 = vadd.xlane.f32.xlu2 %v689_v6 }
 0x592   :  { %v682_v7 = vpop.f32.mrf.mxu0 }
 0x593   :  { %v683_v8 = vadd.f32 %v1944_v3, %v682_v7 }
 0x595   :  { %v686_v9 = vadd.f32 %v683_v8, %v2240_v54  ;;  %v745_v54 = vld [vmem:[%s2858_s10 + $0x10] sm:$0xff] }
 0x596   :  { %v749_v21 = vpack.c.bf16 %v746_v20, %v745_v54 }
 0x597   :  { %v692_v11 = vsel %vm72_vm0, %v686_v9, 0.0 }
 0x598   :  { %693 = vadd.xlane.f32.xlu0 %v692_v11  ;;  %763 = vmatpush.bf16.msra.mxu1 %v749_v21  ;;  %v863_v21 = vld [vmem:[%s2860_s12 + $0x20] sm:$0xff] }
 0x59c   :  { %764 = vmatpush.bf16.msra.mxu1 %v748_v28 }
 0x603   :  { %v691_v12 = vpop.xlane.xlu2 %690 }
 0x604   :  { %v695_v13 = vmul.f32 %v691_v12, %v2212_v10 }
 0x606   :  { %v697_v14 = vsub.f32 %v685_v5, %v695_v13 }
 0x608   :  { %v699_v15 = vmul.f32 %v697_v14, %v697_v14 }
 0x60a   :  { %v701_v16 = vsel %vm72_vm0, %v699_v15, 0.0  ;;  %v866_v15 = vld [vmem:[%s2860_s12 + $0x38] sm:$0xff] }
 0x60b   :  { %v694_v17 = vpop.xlane.xlu0 %693  ;;  %702 = vadd.xlane.f32.xlu1 %v701_v16 }
 0x60c   :  { %v696_v53 = vmul.f32 %v694_v17, %v2212_v10 }
 0x60e   :  { %v698_v18 = vsub.f32 %v686_v9, %v696_v53 }
 0x610   :  { %v700_v19 = vmul.f32 %v698_v18, %v698_v18 }
 0x612   :  { %v704_v60 = vsel %vm72_vm0, %v700_v19, 0.0 }
 0x613   :  { %705 = vadd.xlane.f32.xlu2 %v704_v60 }
 0x67e   :  { %v703_v22 = vpop.xlane.xlu1 %702 }
 0x67f   :  { %v707_v23 = vmul.f32 %v703_v22, %v2212_v10  ;;  %v864_v22 = vld [vmem:[%s2860_s12 + $0x28] sm:$0xff] }
 0x680   :  { %v870_v24 = vpack.c.bf16 %v864_v22, %v863_v21 }
 0x681   :  { %v709_v26 = vadd.f32 1e-12, %v707_v23 }
 0x683   :  { %1999 = vrsqrt.f32 %v709_v26  ;;  %vm717_vm14 = vweird.f32 %v709_v26 }
 0x686   :  { %v706_v29 = vpop.xlane.xlu2 %705 }
 0x687   :  { %v708_v30 = vmul.f32 %v706_v29, %v2212_v10 }
 0x689   :  { %v2000_v31 = vpop.eup %1999  ;;  %v710_v32 = vadd.f32 1e-12, %v708_v30 }
 0x68a   :  { %v712_v33 = vmul.f32 %v2000_v31, %v709_v26  ;;  %vm718_vm13 = vweird.f32 %v2000_v31 }
 0x68b   :  { %2001 = vrsqrt.f32 %v710_v32  ;;  %vm719_vm15 = vmor %vm717_vm14, %vm718_vm13  ;;  %vm727_vm2 = vweird.f32 %v710_v32 }
 0x68c   :  { %v713_v34 = vmul.f32 %v2000_v31, %v712_v33  ;;  %v862_v33 = vld [vmem:[%s2860_s12 + $0x18] sm:$0xff] }
 0x68e   :  { %v714_v35 = vmul.f32 0.5, %v713_v34 }
 0x690   :  { %v715_v36 = vsub.f32 1.5, %v714_v35 }
 0x691   :  { %v2002_v37 = vpop.eup %2001 }
 0x692   :  { %v716_v38 = vmul.f32 %v2000_v31, %v715_v36  ;;  %v722_v39 = vmul.f32 %v2002_v37, %v710_v32  ;;  %vm728_vm1 = vweird.f32 %v2002_v37  ;;  %v861_v32 = vld [vmem:[%s2860_s12 + $0x10] sm:$0xff] }
 0x693   :  { %vm729_vm3 = vmor %vm727_vm2, %vm728_vm1  ;;  %v869_v35 = vpack.c.bf16 %v862_v33, %v861_v32  ;;  %vm876_vm2 = vcmask 523264  }
 0x694   :  { %v723_v40 = vmul.f32 %v2002_v37, %v722_v39  ;;  %v720_v41 = vsel %vm719_vm15, %v2000_v31, %v716_v38 }
 0x695   :  { %v731_v45 = vmul.f32 %v720_v41, %v697_v14  ;;  %v865_v14 = vld [vmem:[%s2860_s12 + $0x30] sm:$0xff]  ;;  %v859_v41 = vld [vmem:[%s2860_s12] sm:$0xff] }
 0x696   :  { %v724_v42 = vmul.f32 0.5, %v723_v40  ;;  %v871_v17 = vpack.c.bf16 %v866_v15, %v865_v14 }
 0x697   :  { %v736_v50 = vmul.f32 %v1945_v44, %v731_v45 }
 0x698   :  { %v725_v43 = vsub.f32 1.5, %v724_v42  ;;  %884 = vmatpush.bf16.msra.mxu3 %v871_v17  ;;  %v860_v42 = vld [vmem:[%s2860_s12 + $0x8] sm:$0xff] }
 0x699   :  { %v2443_v55 = vadd.f32 %v1946_v49, %v736_v50 }
 0x69a   :  { %v726_v46 = vmul.f32 %v2002_v37, %v725_v43 }
 0x69c   :  { %v730_v48 = vsel %vm729_vm3, %v2002_v37, %v726_v46  ;;  %885 = vmatpush.bf16.msra.mxu3 %v870_v24 }
 0x69d   :  { %v732_v51 = vmul.f32 %v730_v48, %v698_v18 }
 0x69f   :  { %v737_v52 = vmul.f32 %v1945_v44, %v732_v51  ;;  %v868_v44 = vpack.c.bf16 %v860_v42, %v859_v41 }
 0x6a0   :  { %886 = vmatpush.bf16.msra.mxu3 %v869_v35 }
 0x6a1   :  { %v2445_v56 = vadd.f32 %v1946_v49, %v737_v52 }
 0x6a3   :  { %v747_v57 = vpack.c.bf16 %v2445_v56, %v2443_v55 }
 0x6a4   :  { %887 = vmatpush.bf16.msra.mxu3 %v868_v44 }
 0x6a5   :  { %1869 = vmatmul.msk.bf16.vlgmr.msra.gmra.mxu1 %vm72_vm0, %v747_v57 }
 0x722   :  { %v766_v59 = vpop.f32.mrf.mxu1 }
 0x723   :  { %v2453_v61 = vadd.f32 %v1947_v58, %v766_v59 }
 0x725   :  { %v2456_v62 = vmul.f32 0.70710677, %v2453_v61 }
 0x727   :  { %v775_v63 = vmul.f32 %v2456_v62, %v2456_v62 }
 0x729   :  { %v776_v1 = vmin.f32 %v775_v63, 16.0 }
 0x72a   :  { %v768_v2 = vpop.f32.mrf.mxu1 }
 0x72b   :  { %v777_v3 = vmul.f32 2.1237322e-06, %v776_v1  ;;  %v788_v0 = vmul.f32 3.8918573e-05, %v776_v1  ;;  %v2460_v4 = vadd.f32 %v1947_v58, %v768_v2 }
 0x72d   :  { %v778_v5 = vadd.f32 0.00028619796, %v777_v3  ;;  %v789_v6 = vadd.f32 0.001143296, %v788_v0  ;;  %v2463_v7 = vmul.f32 0.70710677, %v2460_v4 }
 0x72f   :  { %v790_v8 = vmul.f32 %v789_v6, %v776_v1  ;;  %v815_v9 = vmul.f32 %v2463_v7, %v2463_v7  ;;  %v779_v11 = vmul.f32 %v778_v5, %v776_v1 }
 0x731   :  { %v791_v12 = vadd.f32 0.014752088, %v790_v8  ;;  %v2467_v13 = vmin.f32 %v815_v9, 16.0  ;;  %v780_v19 = vadd.f32 0.0036580483, %v779_v11 }
 0x733   :  { %v792_v16 = vmul.f32 %v791_v12, %v776_v1  ;;  %v817_v53 = vmul.f32 2.1237322e-06, %v2467_v13  ;;  %v828_v18 = vmul.f32 3.8918573e-05, %v2467_v13  ;;  %v781_v28 = vmul.f32 %v780_v19, %v776_v1 }
 0x735   :  { %v793_v60 = vadd.f32 0.112945676, %v792_v16  ;;  %v818_v54 = vadd.f32 0.00028619796, %v817_v53  ;;  %v829_v20 = vadd.f32 0.001143296, %v828_v18 }
 0x736   :  { %v782_v37 = vadd.f32 0.05243302, %v781_v28  ;;  %v771_v28 = vmul.f32 0.5, %v2453_v61 }
 0x737   :  { %v794_v23 = vmul.f32 %v793_v60, %v776_v1  ;;  %v819_v25 = vmul.f32 %v818_v54, %v2467_v13  ;;  %v830_v26 = vmul.f32 %v829_v20, %v2467_v13 }
 0x738   :  { %v783_v45 = vmul.f32 %v782_v37, %v776_v1 }
 0x739   :  { %v795_v29 = vadd.f32 0.4994258, %v794_v23  ;;  %v820_v30 = vadd.f32 0.0036580483, %v819_v25  ;;  %v831_v31 = vadd.f32 0.014752088, %v830_v26 }
 0x73a   :  { %v784_v51 = vadd.f32 0.18741608, %v783_v45 }
 0x73b   :  { %v796_v34 = vmul.f32 %v795_v29, %v776_v1  ;;  %v832_v36 = vmul.f32 %v831_v31, %v2467_v13  ;;  %v821_v39 = vmul.f32 %v820_v30, %v2467_v13  ;;  %v772_v29 = vmul.f32 0.5, %v2460_v4 }
 0x73c   :  { %v785_v63 = vmul.f32 %v784_v51, %v776_v1 }
 0x73d   :  { %v797_v38 = vadd.f32 1.0, %v796_v34  ;;  %v833_v40 = vadd.f32 0.112945676, %v832_v36  ;;  %v822_v46 = vadd.f32 0.05243302, %v821_v39 }
 0x73e   :  { %v786_v8 = vadd.f32 1.1283791, %v785_v63 }
 0x73f   :  { %2003 = vrcp.f32 %v797_v38  ;;  %v834_v43 = vmul.f32 %v833_v40, %v2467_v13  ;;  %v823_v57 = vmul.f32 %v822_v46, %v2467_v13  ;;  %v809_v3 = vand.u32 2147483648, %v797_v38 }
 0x740   :  { %v807_v5 = vand.u32 2147483647, %v797_v38  ;;  %vm803_vm5 = vweird.f32 %v797_v38  ;;  %v787_v17 = vmul.f32 %v786_v8, %v2456_v62 }
 0x741   :  { %v835_v48 = vadd.f32 0.4994258, %v834_v43  ;;  %v824_v0 = vadd.f32 0.18741608, %v823_v57  ;;  %v810_v12 = vor.u32 1.1754944e-38, %v809_v3 }
 0x742   :  { %vm808_vm7 = vcmp.eq.f32.partialorder %v807_v5, 8.507059e+37 }
 0x743   :  { %v836_v49 = vmul.f32 %v835_v48, %v2467_v13  ;;  %v825_v14 = vmul.f32 %v824_v0, %v2467_v13 }
 0x745   :  { %v2004_v50 = vpop.eup %2003  ;;  %v837_v58 = vadd.f32 1.0, %v836_v49  ;;  %v826_v53 = vadd.f32 1.1283791, %v825_v14 }
 0x746   :  { %v799_v52 = vmul.f32 %v2004_v50, %v797_v38  ;;  %vm804_vm4 = vweird.f32 %v2004_v50 }
 0x747   :  { %2005 = vrcp.f32 %v837_v58  ;;  %vm805_vm6 = vmor %vm803_vm5, %vm804_vm4  ;;  %v849_v18 = vand.u32 2147483648, %v837_v58  ;;  %v847_v54 = vand.u32 2147483647, %v837_v58  ;;  %vm843_vm14 = vweird.f32 %v837_v58 }
 0x748   :  { %v800_v59 = vsub.f32 1.0, %v799_v52  ;;  %v827_v23 = vmul.f32 %v826_v53, %v2463_v7  ;;  %v1948_v7 = vld [vmem:[%s2861_s13] ss:$0 sm:$0xff] }
 0x749   :  { %v850_v21 = vor.u32 1.1754944e-38, %v849_v18  ;;  %vm848_vm1 = vcmp.eq.f32.partialorder %v847_v54, 8.507059e+37 }
 0x74a   :  { %v801_v2 = vmul.f32 %v2004_v50, %v800_v59  ;;  %v1874_v59 = vld [vmem:[%s2893_s26 + $0x28] sm:$0xff] }
 0x74c   :  { %v802_v6 = vadd.f32 %v2004_v50, %v801_v2 }
 0x74d   :  { %v2006_v9 = vpop.eup %2005 }
 0x74e   :  { %v806_v11 = vsel %vm805_vm6, %v2004_v50, %v802_v6  ;;  %v839_v15 = vmul.f32 %v2006_v9, %v837_v58  ;;  %vm844_vm13 = vweird.f32 %v2006_v9  ;;  %v1876_v50 = vld [vmem:[%s2893_s26 + $0x38] sm:$0xff]  ;;  %v1873_v58 = vld [vmem:[%s2893_s26 + $0x20] sm:$0xff] }
 0x74f   :  { %v811_v16 = vsel %vm808_vm7, %v810_v12, %v806_v11  ;;  %vm845_vm15 = vmor %vm843_vm14, %vm844_vm13  ;;  %v958_v2 = vpack.c.bf16 %v1874_v59, %v1873_v58 }
 0x750   :  { %v840_v1 = vsub.f32 1.0, %v839_v15  ;;  %v812_v19 = vmul.f32 %v811_v16, %v787_v17 }
 0x752   :  { %v841_v60 = vmul.f32 %v2006_v9, %v840_v1  ;;  %v1870_v22 = vclamps-f32 %v812_v19, 1.0  ;;  %v1949_v19 = vld [vmem:[%s2862_s14] ss:$0 sm:$0xff] }
 0x754   :  { %v842_v20 = vadd.f32 %v2006_v9, %v841_v60  ;;  %v855_v26 = vadd.f32 1.0, %v1870_v22 }
 0x756   :  { %v846_v13 = vsel %vm845_vm15, %v2006_v9, %v842_v20  ;;  %v857_v31 = vmul.f32 %v855_v26, %v771_v28 }
 0x757   :  { %v851_v24 = vsel %vm848_vm1, %v850_v21, %v846_v13  ;;  %v1950_v21 = vld [vmem:[%s2863_s15] ss:$0 sm:$0xff] }
 0x758   :  { %v852_v25 = vmul.f32 %v851_v24, %v827_v23 }
 0x75a   :  { %v1871_v62 = vclamps-f32 %v852_v25, 1.0 }
 0x75c   :  { %v856_v30 = vadd.f32 1.0, %v1871_v62  ;;  %v1951_v62 = vld [vmem:[%s2853_s5 + $0x1] ss:$0 sm:$0xff]  ;;  %s2897_s5 = smov 112  }
 0x75e   :  { %v858_v32 = vmul.f32 %v856_v30, %v772_v29 }
 0x760   :  { %v867_v33 = vpack.c.bf16 %v858_v32, %v857_v31 }
 0x762   :  { %1872 = vmatmul.msk.bf16.vlgmr.msra.gmra.mxu3 %vm876_vm2, %v867_v33 }
 0x7e5   :  { %v889_v34 = vpop.f32.mrf.mxu3 }
 0x7e6   :  { %v890_v35 = vadd.f32 %v1948_v7, %v889_v34 }
 0x7e8   :  { %v894_v36 = vadd.f32 %v890_v35, %v2443_v55 }
 0x7ea   :  { %v898_v37 = vsel %vm72_vm0, %v894_v36, 0.0 }
 0x7eb   :  { %899 = vadd.xlane.f32.xlu0 %v898_v37 }
 0x7ed   :  { %v891_v61 = vpop.f32.mrf.mxu3 }
 0x7ee   :  { %v892_v4 = vadd.f32 %v1948_v7, %v891_v61 }
 0x7f0   :  { %v895_v38 = vadd.f32 %v892_v4, %v2445_v56  ;;  %v1875_v56 = vld [vmem:[%s2893_s26 + $0x30] sm:$0xff] }
 0x7f1   :  { %v959_v51 = vpack.c.bf16 %v1876_v50, %v1875_v56 }
 0x7f2   :  { %v901_v39 = vsel %vm72_vm0, %v895_v38, 0.0 }
 0x7f3   :  { %902 = vadd.xlane.f32.xlu2 %v901_v39  ;;  %974 = vmatpush.bf16.msrb.mxu2 %v959_v51 }
 0x7f7   :  { %975 = vmatpush.bf16.msrb.mxu2 %v958_v2 }
 0x85e   :  { %v900_v40 = vpop.xlane.xlu0 %899 }
 0x85f   :  { %v904_v41 = vmul.f32 %v900_v40, %v2212_v10 }
 0x861   :  { %v906_v42 = vsub.f32 %v894_v36, %v904_v41 }
 0x863   :  { %v908_v43 = vmul.f32 %v906_v42, %v906_v42 }
 0x865   :  { %v910_v44 = vsel %vm72_vm0, %v908_v43, 0.0 }
 0x866   :  { %v903_v45 = vpop.xlane.xlu2 %902  ;;  %911 = vadd.xlane.f32.xlu0 %v910_v44 }
 0x867   :  { %v905_v55 = vmul.f32 %v903_v45, %v2212_v10 }
 0x869   :  { %v907_v46 = vsub.f32 %v895_v38, %v905_v55 }
 0x86b   :  { %v909_v48 = vmul.f32 %v907_v46, %v907_v46 }
 0x86d   :  { %v913_v49 = vsel %vm72_vm0, %v909_v48, 0.0 }
 0x86e   :  { %914 = vadd.xlane.f32.xlu2 %v913_v49 }
 0x8d9   :  { %v912_v52 = vpop.xlane.xlu0 %911 }
 0x8da   :  { %v916_v57 = vmul.f32 %v912_v52, %v2212_v10 }
 0x8dc   :  { %v918_v63 = vadd.f32 1e-12, %v916_v57 }
 0x8de   :  { %2007 = vrsqrt.f32 %v918_v63  ;;  %vm926_vm4 = vweird.f32 %v918_v63 }
 0x8e1   :  { %v915_v3 = vpop.xlane.xlu2 %914 }
 0x8e2   :  { %v917_v0 = vmul.f32 %v915_v3, %v2212_v10 }
 0x8e4   :  { %v2008_v5 = vpop.eup %2007  ;;  %v919_v6 = vadd.f32 1e-12, %v917_v0 }
 0x8e5   :  { %v921_v8 = vmul.f32 %v2008_v5, %v918_v63  ;;  %vm927_vm3 = vweird.f32 %v2008_v5 }
 0x8e6   :  { %2009 = vrsqrt.f32 %v919_v6  ;;  %vm928_vm5 = vmor %vm926_vm4, %vm927_vm3  ;;  %vm936_vm7 = vweird.f32 %v919_v6 }
 0x8e7   :  { %v922_v9 = vmul.f32 %v2008_v5, %v921_v8 }
 0x8e9   :  { %v923_v11 = vmul.f32 0.5, %v922_v9 }
 0x8eb   :  { %v924_v12 = vsub.f32 1.5, %v923_v11 }
 0x8ec   :  { %v2010_v14 = vpop.eup %2009 }
 0x8ed   :  { %v925_v15 = vmul.f32 %v2008_v5, %v924_v12  ;;  %v931_v16 = vmul.f32 %v2010_v14, %v919_v6  ;;  %vm937_vm6 = vweird.f32 %v2010_v14 }
 0x8ee   :  { %vm938_vm13 = vmor %vm936_vm7, %vm937_vm6 }
 0x8ef   :  { %v932_v17 = vmul.f32 %v2010_v14, %v931_v16  ;;  %v929_v1 = vsel %vm928_vm5, %v2008_v5, %v925_v15 }
 0x8f0   :  { %v940_v60 = vmul.f32 %v929_v1, %v906_v42 }
 0x8f1   :  { %v933_v53 = vmul.f32 0.5, %v932_v17 }
 0x8f2   :  { %v945_v22 = vmul.f32 %v1949_v19, %v940_v60 }
 0x8f3   :  { %v934_v18 = vsub.f32 1.5, %v933_v53 }
 0x8f4   :  { %v2539_v24 = vadd.f32 %v1950_v21, %v945_v22 }
 0x8f5   :  { %v935_v54 = vmul.f32 %v2010_v14, %v934_v18 }
 0x8f7   :  { %v939_v20 = vsel %vm938_vm13, %v2010_v14, %v935_v54 }
 0x8f8   :  { %v941_v23 = vmul.f32 %v939_v20, %v907_v46 }
 0x8fa   :  { %v946_v13 = vmul.f32 %v1949_v19, %v941_v23 }
 0x8fc   :  { %v2541_v25 = vadd.f32 %v1950_v21, %v946_v13 }
 0x8fe   :  { %v957_v26 = vpack.c.bf16 %v2541_v25, %v2539_v24 }
 0x900   :  { %1878 = vmatmul.msk.bf16.vlgmr.msrb.gmra.mxu2 %vm72_vm0, %v957_v26 }
 0x983   :  { %v977_v28 = vpop.f32.mrf.mxu2 }
 0x984   :  { %v978_v29 = vadd.f32 %v1951_v62, %v977_v28 }
 0x986   :  { %v982_v30 = vmul.f32 0.35355338, %v978_v29  ;;  %v2549_v31 = vpack.c.bf16 %v978_v29, %v978_v29 }
 0x988   :  { %v984_v32 = vpack.c.bf16 %v982_v30, %v982_v30  ;;  %987 = vrot.lane.b32.xlu1 %v2549_v31, %s2085_s28  ;;  %1045 = vrot.lane.b32.xlu0 %v2549_v31, %s2087_s29 }
 0x98a   :  { %1043 = vrot.lane.b32.xlu2 %v984_v32, %s2086_s4 }
 0x98b   :  { %v979_v33 = vpop.f32.mrf.mxu2 }
 0x98c   :  { %v980_v7 = vadd.f32 %v1951_v62, %v979_v33 }
 0x98e   :  { %v983_v34 = vmul.f32 0.35355338, %v980_v7  ;;  %v2561_v36 = vpack.c.bf16 %v980_v7, %v980_v7 }
 0x990   :  { %1106 = vrot.lane.b32.xlu1 %v2549_v31, %s2089_s0  ;;  %1167 = vrot.lane.b32.xlu0 %v2549_v31, %s2084_s27  ;;  %v1226_v35 = vpack.c.bf16 %v983_v34, %v983_v34 }
 0x992   :  { %1165 = vrot.lane.b32.xlu2 %v984_v32, %s2090_s21 }
 0x998   :  { %1285 = vrot.lane.b32.xlu1 %v1226_v35, %s2086_s4  ;;  %1287 = vrot.lane.b32.xlu0 %v2561_v36, %s2087_s29  ;;  %s2901_s4 = smov 40   ;;  %s2902_s29 = smov 8  }
 0x99a   :  { %1104 = vrot.lane.b32.xlu2 %v984_v32, %s2897_s5 }
 0x9a0   :  { %1407 = vrot.lane.b32.xlu1 %v1226_v35, %s2090_s21  ;;  %1229 = vrot.lane.b32.xlu0 %v2561_v36, %s2085_s28  ;;  %s2900_s28 = smov 48   ;;  %s2904_s21 = smov 24  }
 0x9a2   :  { %1409 = vrot.lane.b32.xlu2 %v2561_v36, %s2084_s27  ;;  %s2899_s27 = smov 64  }
 0x9a8   :  { %1348 = vrot.lane.b32.xlu0 %v2561_v36, %s2089_s0  ;;  %s2903_s0 = smov 16  }
 0x9aa   :  { %1346 = vrot.lane.b32.xlu2 %v1226_v35, %s2897_s5 }
 0x9b0   :  { %1078 = vrot.lane.b32.xlu0 %v2549_v31, %s2898_s23 }
 0x9e4   :  { %v1044_v37 = vpop.permute.xlu2 %1043 }
 0x9ec   :  { %v1166_v40 = vpop.permute.xlu2 %1165 }
 0x9f4   :  { %v1105_v45 = vpop.permute.xlu2 %1104 }
 0x9fa   :  { %v988_v61 = vpop.permute.xlu1 %987  ;;  %v1046_v4 = vpop.permute.xlu0 %1045 }
 0x9fb   :  { %v993_v38 = vsel %vm170_vm8, %v988_v61, 0  ;;  %v1051_v39 = vsel %vm170_vm8, %v1046_v4, 0 }
 0x9fc   :  { %1002 = vmatpush.bf16.xpose.msrb.mxu0 %v993_v38  ;;  %1060 = vmatpush.bf16.xpose.msrb.mxu3 %v1051_v39  ;;  %v1410_v48 = vpop.permute.xlu2 %1409 }
 0x9fd   :  { %v1415_v56 = vsel %vm170_vm8, %v1410_v48, 0 }
 0xa02   :  { %v1107_v41 = vpop.permute.xlu1 %1106  ;;  %v1168_v42 = vpop.permute.xlu0 %1167 }
 0xa03   :  { %v1112_v43 = vsel %vm170_vm8, %v1107_v41, 0  ;;  %v1173_v44 = vsel %vm170_vm8, %v1168_v42, 0  ;;  %1879 = vmatmul.msk.bf16.vlgmr.msrb.gmra.mxu0 %vm170_vm8, %v984_v32  ;;  %1881 = vmatmul.msk.bf16.vlgmr.msrb.gmra.mxu3 %vm170_vm8, %v1044_v37 }
 0xa04   :  { %1121 = vmatpush.bf16.xpose.msra.mxu0 %v1112_v43  ;;  %1182 = vmatpush.bf16.xpose.msra.mxu3 %v1173_v44  ;;  %v1347_v63 = vpop.permute.xlu2 %1346 }
 0xa0a   :  { %v1288_v55 = vpop.permute.xlu0 %1287  ;;  %v1286_v57 = vpop.permute.xlu1 %1285 }
 0xa0b   :  { %v1293_v46 = vsel %vm170_vm8, %v1288_v55, 0 }
 0xa0c   :  { %1302 = vmatpush.bf16.xpose.msrb.mxu3 %v1293_v46 }
 0xa12   :  { %v1230_v49 = vpop.permute.xlu0 %1229  ;;  %v1408_v2 = vpop.permute.xlu1 %1407 }
 0xa13   :  { %v1235_v50 = vsel %vm170_vm8, %v1230_v49, 0  ;;  %1883 = vmatmul.msk.bf16.vlgmr.msra.gmra.mxu0 %vm170_vm8, %v1105_v45  ;;  %1885 = vmatmul.msk.bf16.vlgmr.msra.gmra.mxu3 %vm170_vm8, %v1166_v40 }
 0xa14   :  { %1424 = vmatpush.bf16.xpose.msra.mxu3 %v1415_v56  ;;  %1244 = vmatpush.bf16.xpose.msrb.mxu0 %v1235_v50 }
 0xa1a   :  { %v1349_v51 = vpop.permute.xlu0 %1348 }
 0xa1b   :  { %v1354_v52 = vsel %vm170_vm8, %v1349_v51, 0 }
 0xa1c   :  { %1363 = vmatpush.bf16.xpose.msra.mxu0 %v1354_v52 }
 0xa22   :  { %v1079_v58 = vpop.permute.xlu0 %1078 }
 0xa23   :  { %v1084_v59 = vsel %vm207_vm9, %v1079_v58, 0  ;;  %1887 = vmatmul.msk.bf16.vlgmr.msrb.gmra.mxu0 %vm170_vm8, %v1226_v35  ;;  %1889 = vmatmul.msk.bf16.vlgmr.msrb.gmra.mxu3 %vm170_vm8, %v1286_v57 }
 0xa24   :  { %1093 = vmatpush.bf16.msra.mxu2 %v1084_v59 }
 0xa33   :  { %1891 = vmatmul.msk.bf16.vlgmr.msra.gmra.mxu0 %vm170_vm8, %v1347_v63  ;;  %1893 = vmatmul.msk.bf16.vlgmr.msra.gmra.mxu3 %vm170_vm8, %v1408_v2 }
 0xa80   :  { %v1004_v3 = vpop.f32.mrf.mxu0 }
 0xa81   :  { %v1005_v0 = vadd.f32 %v1004_v3, %v2293_v27 }
 0xa83   :  { %v1008_v5 = vsel %vm170_vm8, %v1005_v0, -inf }
 0xa84   :  { %1009 = vmax.xlane.f32.xlu0 %v1008_v5 }
 0xa86   :  { %v1062_v6 = vpop.f32.mrf.mxu3 }
 0xa87   :  { %v1063_v8 = vadd.f32 %v1062_v6, %v2293_v27 }
 0xa88   :  { %v1006_v9 = vpop.f32.mrf.mxu0 }
 0xa89   :  { %v1066_v11 = vsel %vm170_vm8, %v1063_v8, -inf }
 0xa8a   :  { %1067 = vmax.xlane.f32.xlu1 %v1066_v11 }
 0xa8e   :  { %v1064_v12 = vpop.f32.mrf.mxu3 }
 0xa90   :  { %v1123_v14 = vpop.f32.mrf.mxu0 }
 0xa91   :  { %v2599_v15 = vadd.f32 %v1123_v14, %v2293_v27 }
 0xa93   :  { %v1127_v16 = vsel %vm170_vm8, %v2599_v15, -inf }
 0xa94   :  { %1128 = vmax.xlane.f32.xlu1 %v1127_v16 }
 0xa96   :  { %v1184_v17 = vpop.f32.mrf.mxu3 }
 0xa97   :  { %v2604_v1 = vadd.f32 %v1184_v17, %v2293_v27 }
 0xa98   :  { %v1125_v53 = vpop.f32.mrf.mxu0 }
 0xa99   :  { %v1188_v18 = vsel %vm170_vm8, %v2604_v1, -inf }
 0xa9a   :  { %1189 = vmax.xlane.f32.xlu2 %v1188_v18 }
 0xa9e   :  { %v1186_v19 = vpop.f32.mrf.mxu3 }
 0xaa0   :  { %v1246_v60 = vpop.f32.mrf.mxu0 }
 0xaa1   :  { %v1247_v54 = vadd.f32 %v1246_v60, %v2310_v47 }
 0xaa3   :  { %v1250_v20 = vsel %vm170_vm8, %v1247_v54, -inf }
 0xaa4   :  { %1251 = vmax.xlane.f32.xlu2 %v1250_v20 }
 0xaa6   :  { %v1304_v21 = vpop.f32.mrf.mxu3 }
 0xaa7   :  { %v1305_v22 = vadd.f32 %v1304_v21, %v2310_v47 }
 0xaa8   :  { %v1248_v23 = vpop.f32.mrf.mxu0 }
 0xaa9   :  { %v1308_v13 = vsel %vm170_vm8, %v1305_v22, -inf }
 0xaaa   :  { %1309 = vmax.xlane.f32.xlu0 %v1308_v13 }
 0xaae   :  { %v1306_v27 = vpop.f32.mrf.mxu3 }
 0xab0   :  { %v1365_v26 = vpop.f32.mrf.mxu0 }
 0xab1   :  { %v1366_v62 = vadd.f32 %v1365_v26, %v2310_v47 }
 0xab3   :  { %v1369_v28 = vsel %vm170_vm8, %v1366_v62, -inf }
 0xab4   :  { %1370 = vmax.xlane.f32.xlu2 %v1369_v28 }
 0xab6   :  { %v1426_v29 = vpop.f32.mrf.mxu3 }
 0xab7   :  { %v2615_v30 = vadd.f32 %v1426_v29, %v2310_v47 }
 0xab8   :  { %v1367_v32 = vpop.f32.mrf.mxu0 }
 0xab9   :  { %v1430_v33 = vsel %vm170_vm8, %v2615_v30, -inf }
 0xaba   :  { %1431 = vmax.xlane.f32.xlu1 %v1430_v33 }
 0xabe   :  { %v1428_v7 = vpop.f32.mrf.mxu3 }
 0xacc   :  { %1020 = vrot.lane.b32.xlu2 %v2549_v31, %s2899_s27 }
 0xaf7   :  { %v1010_v34 = vpop.xlane.xlu0 %1009 }
 0xaf8   :  { %v1011_v35 = vsub.f32 %v1005_v0, %v1010_v34 }
 0xafa   :  { %v1012_v37 = vmul.f32 1.442695, %v1011_v35 }
 0xafc   :  { %2011 = vpow2.f32 %v1012_v37 }
 0xafd   :  { %v1068_v61 = vpop.xlane.xlu1 %1067 }
 0xafe   :  { %v1069_v4 = vsub.f32 %v1063_v8, %v1068_v61 }
 0xb00   :  { %v1070_v38 = vmul.f32 1.442695, %v1069_v4 }
 0xb02   :  { %v2012_v39 = vpop.eup %2011  ;;  %2013 = vpow2.f32 %v1070_v38 }
 0xb03   :  { %v1014_v47 = vsel %vm170_vm8, %v2012_v39, 0.0 }
 0xb04   :  { %1015 = vadd.xlane.f32.xlu1 %v1014_v47 }
 0xb07   :  { %v1129_v59 = vpop.xlane.xlu1 %1128 }
 0xb08   :  { %v2014_v40 = vpop.eup %2013  ;;  %v1130_v2 = vsub.f32 %v2599_v15, %v1129_v59 }
 0xb09   :  { %v1072_v41 = vsel %vm170_vm8, %v2014_v40, 0.0 }
 0xb0a   :  { %1073 = vadd.xlane.f32.xlu0 %v1072_v41  ;;  %v1131_v3 = vmul.f32 1.442695, %v1130_v2 }
 0xb0d   :  { %v1190_v42 = vpop.xlane.xlu2 %1189 }
 0xb0e   :  { %v1191_v5 = vsub.f32 %v2604_v1, %v1190_v42 }
 0xb10   :  { %v1192_v8 = vmul.f32 1.442695, %v1191_v5 }
 0xb17   :  { %v1252_v43 = vpop.xlane.xlu2 %1251 }
 0xb18   :  { %v1253_v44 = vsub.f32 %v1247_v54, %v1252_v43 }
 0xb1a   :  { %v1254_v45 = vmul.f32 1.442695, %v1253_v44 }
 0xb1c   :  { %2015 = vpow2.f32 %v1254_v45 }
 0xb1d   :  { %1139 = vrot.lane.b32.xlu1 %v2549_v31, %s2900_s28 }
 0xb1e   :  { %1200 = vrot.lane.b32.xlu0 %v2549_v31, %s2901_s4  ;;  %v1310_v31 = vpop.xlane.xlu0 %1309 }
 0xb1f   :  { %v1311_v58 = vsub.f32 %v1305_v22, %v1310_v31 }
 0xb21   :  { %v1312_v63 = vmul.f32 1.442695, %v1311_v58 }
 0xb22   :  { %v2627_v55 = vpop.eup %2015 }
 0xb23   :  { %v1256_v46 = vsel %vm170_vm8, %v2627_v55, 0.0 }
 0xb24   :  { %1257 = vadd.xlane.f32.xlu2 %v1256_v46 }
 0xb25   :  { %1320 = vrot.lane.b32.xlu1 %v2561_v36, %s2898_s23 }
 0xb27   :  { %v1371_v48 = vpop.xlane.xlu2 %1370 }
 0xb28   :  { %v1372_v49 = vsub.f32 %v1366_v62, %v1371_v48 }
 0xb2a   :  { %v1373_v56 = vmul.f32 1.442695, %v1372_v49 }
 0xb2c   :  { %2017 = vpow2.f32 %v1373_v56 }
 0xb2d   :  { %2019 = vpow2.f32 %v1312_v63  ;;  %v1432_v15 = vpop.xlane.xlu1 %1431 }
 0xb2e   :  { %2021 = vpow2.f32 %v1131_v3  ;;  %v1433_v20 = vsub.f32 %v2615_v30, %v1432_v15 }
 0xb2f   :  { %v1021_v50 = vpop.permute.xlu2 %1020  ;;  %2023 = vpow2.f32 %v1192_v8 }
 0xb30   :  { %v1026_v51 = vsel %vm207_vm9, %v1021_v50, 0  ;;  %v1434_v21 = vmul.f32 1.442695, %v1433_v20  ;;  %v1895_v20 = vld [vmem:[%s2854_s6 + $0x20] sm:$0xff] }
 0xb31   :  { %1035 = vmatpush.bf16.msrb.mxu1 %v1026_v51 }
 0xb32   :  { %v2634_v52 = vpop.eup %2017 }
 0xb33   :  { %v1375_v57 = vsel %vm170_vm8, %v2634_v52, 0.0  ;;  %v2639_v0 = vpop.eup %2019 }
 0xb34   :  { %1376 = vadd.xlane.f32.xlu2 %v1375_v57  ;;  %v1314_v6 = vsel %vm170_vm8, %v2639_v0, 0.0  ;;  %v2022_v9 = vpop.eup %2021 }
 0xb35   :  { %v1133_v11 = vsel %vm170_vm8, %v2022_v9, 0.0  ;;  %v2024_v12 = vpop.eup %2023 }
 0xb36   :  { %v1194_v14 = vsel %vm170_vm8, %v2024_v12, 0.0 }
 0xb48   :  { %1315 = vadd.xlane.f32.xlu0 %v1314_v6 }
 0xb4c   :  { %1381 = vrot.lane.b32.xlu2 %v2561_v36, %s2900_s28 }
 0xb4f   :  { %1134 = vadd.xlane.f32.xlu1 %v1133_v11 }
 0xb57   :  { %1195 = vadd.xlane.f32.xlu1 %v1194_v14 }
 0xb5c   :  { %1442 = vrot.lane.b32.xlu0 %v2561_v36, %s2901_s4 }
 0xb70   :  { %1262 = vrot.lane.b32.xlu1 %v2561_v36, %s2899_s27 }
 0xb77   :  { %v1016_v16 = vpop.xlane.xlu1 %1015 }
 0xb78   :  { %2025 = vrcp.f32 %v1016_v16 }
 0xb7d   :  { %v1074_v17 = vpop.xlane.xlu0 %1073 }
 0xb7e   :  { %v2026_v1 = vpop.eup %2025  ;;  %2027 = vrcp.f32 %v1074_v17 }
 0xb7f   :  { %v1018_v53 = vmul.f32 %v2026_v1, %v2012_v39  ;;  %2029 = vpow2.f32 %v1434_v21 }
 0xb81   :  { %v1019_v18 = vpack.c.bf16 %v1018_v53, %v1018_v53 }
 0xb83   :  { %1880 = vmatmul.msk.bf16.vlgmr.msrb.gmra.mxu1 %vm170_vm8, %v1019_v18 }
 0xb84   :  { %v2028_v19 = vpop.eup %2027 }
 0xb85   :  { %v1076_v60 = vmul.f32 %v2028_v19, %v2014_v40  ;;  %v2030_v27 = vpop.eup %2029 }
 0xb86   :  { %v1436_v28 = vsel %vm170_vm8, %v2030_v27, 0.0 }
 0xb87   :  { %v1077_v54 = vpack.c.bf16 %v1076_v60, %v1076_v60  ;;  %v1897_v60 = vld [vmem:[%s2854_s6 + $0x30] sm:$0xff] }
 0xb89   :  { %1882 = vmatmul.msk.bf16.vlgmr.msra.gmra.mxu2 %vm170_vm8, %v1077_v54  ;;  %v1898_v54 = vld [vmem:[%s2854_s6 + $0x38] sm:$0xff] }
 0xb8a   :  { %v1477_v21 = vpack.c.bf16 %v1898_v54, %v1897_v60 }
 0xb8c   :  { %1492 = vmatpush.bf16.msrb.mxu0 %v1477_v21  ;;  %v1955_v21 = vld [vmem:[%s2859_s11 + $0x1] ss:$0 sm:$0xff] }
 0xb8f   :  { %v1140_v22 = vpop.permute.xlu1 %1139 }
 0xb90   :  { %v1145_v36 = vsel %vm207_vm9, %v1140_v22, 0  ;;  %v1201_v23 = vpop.permute.xlu0 %1200  ;;  %v1896_v22 = vld [vmem:[%s2854_s6 + $0x28] sm:$0xff] }
 0xb91   :  { %v1206_v13 = vsel %vm207_vm9, %v1201_v23, 0  ;;  %1154 = vmatpush.bf16.msra.mxu1 %v1145_v36  ;;  %v1476_v36 = vpack.c.bf16 %v1896_v22, %v1895_v20 }
 0xb92   :  { %1215 = vmatpush.bf16.msrb.mxu2 %v1206_v13 }
 0xb93   :  { %1493 = vmatpush.bf16.msrb.mxu0 %v1476_v36 }
 0xb97   :  { %v1321_v26 = vpop.permute.xlu1 %1320  ;;  %v1258_v35 = vpop.xlane.xlu2 %1257 }
 0xb98   :  { %v1326_v62 = vsel %vm207_vm9, %v1321_v26, 0 }
 0xb99   :  { %1335 = vmatpush.bf16.msra.mxu2 %v1326_v62 }
 0xb9a   :  { %1437 = vadd.xlane.f32.xlu1 %v1436_v28 }
 0xba7   :  { %v1377_v47 = vpop.xlane.xlu2 %1376 }
 0xbaf   :  { %v1382_v44 = vpop.permute.xlu2 %1381 }
 0xbb0   :  { %v1387_v48 = vsel %vm207_vm9, %v1382_v44, 0 }
 0xbbb   :  { %v1316_v7 = vpop.xlane.xlu0 %1315 }
 0xbc2   :  { %v1135_v29 = vpop.xlane.xlu1 %1134 }
 0xbc3   :  { %2031 = vrcp.f32 %v1135_v29  ;;  %v1952_v29 = vld [vmem:[%s2855_s7 + $0x1] ss:$0 sm:$0xff] }
 0xbc9   :  { %v2032_v30 = vpop.eup %2031 }
 0xbca   :  { %v1137_v32 = vmul.f32 %v2032_v30, %v2022_v9  ;;  %v1196_v33 = vpop.xlane.xlu1 %1195 }
 0xbcb   :  { %2033 = vrcp.f32 %v1196_v33 }
 0xbcc   :  { %v1138_v34 = vpack.c.bf16 %v1137_v32, %v1137_v32  ;;  %2035 = vrcp.f32 %v1316_v7 }
 0xbcd   :  { %2037 = vrcp.f32 %v1258_v35 }
 0xbce   :  { %1884 = vmatmul.msk.bf16.vlgmr.msra.gmra.mxu1 %vm170_vm8, %v1138_v34  ;;  %v1443_v4 = vpop.permute.xlu0 %1442  ;;  %2039 = vrcp.f32 %v1377_v47 }
 0xbcf   :  { %v1448_v39 = vsel %vm207_vm9, %v1443_v4, 0 }
 0xbd1   :  { %v2034_v37 = vpop.eup %2033 }
 0xbd2   :  { %v1198_v61 = vmul.f32 %v2034_v37, %v2024_v12  ;;  %v2036_v40 = vpop.eup %2035 }
 0xbd3   :  { %v2038_v41 = vpop.eup %2037  ;;  %v1318_v42 = vmul.f32 %v2036_v40, %v2639_v0 }
 0xbd4   :  { %v1199_v38 = vpack.c.bf16 %v1198_v61, %v1198_v61  ;;  %v1260_v43 = vmul.f32 %v2038_v41, %v2627_v55  ;;  %v2040_v50 = vpop.eup %2039 }
 0xbd5   :  { %v1319_v49 = vpack.c.bf16 %v1318_v42, %v1318_v42  ;;  %v1379_v51 = vmul.f32 %v2040_v50, %v2634_v52  ;;  %v1904_v50 = vld [vmem:[%s2858_s10 + $0x28] sm:$0xff] }
 0xbd6   :  { %1886 = vmatmul.msk.bf16.vlgmr.msrb.gmra.mxu2 %vm170_vm8, %v1199_v38  ;;  %v1261_v56 = vpack.c.bf16 %v1260_v43, %v1260_v43 }
 0xbd7   :  { %1457 = vmatpush.bf16.msrb.mxu2 %v1448_v39  ;;  %v1380_v31 = vpack.c.bf16 %v1379_v51, %v1379_v51 }
 0xbe2   :  { %v1263_v45 = vpop.permute.xlu1 %1262 }
 0xbe3   :  { %v1268_v46 = vsel %vm207_vm9, %v1263_v45, 0  ;;  %v1906_v45 = vld [vmem:[%s2858_s10 + $0x38] sm:$0xff] }
 0xbe4   :  { %1277 = vmatpush.bf16.msrb.mxu1 %v1268_v46 }
 0xbe6   :  { %1890 = vmatmul.msk.bf16.vlgmr.msra.gmra.mxu2 %vm170_vm8, %v1319_v49 }
 0xbe7   :  { %1888 = vmatmul.msk.bf16.vlgmr.msrb.gmra.mxu1 %vm170_vm8, %v1261_v56  ;;  %v1903_v56 = vld [vmem:[%s2858_s10 + $0x20] sm:$0xff] }
 0xbe8   :  { %1396 = vmatpush.bf16.msra.mxu1 %v1387_v48 }
 0xbf7   :  { %1892 = vmatmul.msk.bf16.vlgmr.msra.gmra.mxu1 %vm170_vm8, %v1380_v31  ;;  %v1566_v31 = vpack.c.bf16 %v1904_v50, %v1903_v56 }
 0xc00   :  { %v1037_v55 = vpop.f32.mrf.mxu1 }
 0xc01   :  { %1041 = vst.msk [vmem:[#allocation2] sm:$0xff] %vm170_vm8, %v1037_v55 }
 0xc08   :  { %v1039_v57 = vpop.f32.mrf.mxu1 }
 0xc0c   :  { %v1095_v58 = vpop.f32.mrf.mxu2 }
 0xc0d   :  { %v1438_v59 = vpop.xlane.xlu1 %1437  ;;  %1100 = vrot.lane.b32.xlu0 %v1095_v58, %s2902_s29 }
 0xc0e   :  { %2041 = vrcp.f32 %v1438_v59 }
 0xc14   :  { %v2042_v63 = vpop.eup %2041  ;;  %v1097_v2 = vpop.f32.mrf.mxu2 }
 0xc15   :  { %v1440_v3 = vmul.f32 %v2042_v63, %v2030_v27 }
 0xc17   :  { %v1441_v0 = vpack.c.bf16 %v1440_v3, %v1440_v3 }
 0xc19   :  { %1894 = vmatmul.msk.bf16.vlgmr.msrb.gmra.mxu2 %vm170_vm8, %v1441_v0 }
 0xc4b   :  { %v1156_v5 = vpop.f32.mrf.mxu1 }
 0xc4c   :  { %1161 = vrot.lane.b32.xlu2 %v1156_v5, %s2903_s0 }
 0xc53   :  { %v1158_v52 = vpop.f32.mrf.mxu1 }
 0xc59   :  { %v1217_v6 = vpop.f32.mrf.mxu2 }
 0xc5a   :  { %1222 = vrot.lane.b32.xlu1 %v1217_v6, %s2904_s21 }
 0xc61   :  { %v1219_v8 = vpop.f32.mrf.mxu2 }
 0xc64   :  { %v1279_v9 = vpop.f32.mrf.mxu1 }
 0xc65   :  { %1283 = vst.msk [vmem:[#allocation2 + $0x8] sm:$0xff] %vm170_vm8, %v1279_v9 }
 0xc69   :  { %v1337_v11 = vpop.f32.mrf.mxu2 }
 0xc6a   :  { %1342 = vrot.lane.b32.xlu0 %v1337_v11, %s2902_s29 }
 0xc6c   :  { %v1281_v12 = vpop.f32.mrf.mxu1 }
 0xc71   :  { %v1339_v14 = vpop.f32.mrf.mxu2 }
 0xc72   :  { %v1953_v14 = vld [vmem:[%s2856_s8 + $0x1] ss:$0 sm:$0xff] }
 0xc74   :  { %v1398_v15 = vpop.f32.mrf.mxu1 }
 0xc75   :  { %1403 = vrot.lane.b32.xlu0 %v1398_v15, %s2903_s0 }
 0xc7c   :  { %v1400_v16 = vpop.f32.mrf.mxu1 }
 0xc7f   :  { %v1101_v17 = vpop.permute.xlu0 %1100 }
 0xc80   :  { %1103 = vst.msk [vmem:[#allocation2] sm:$0xff] %vm286_vm10, %v1101_v17 }
 0xc9c   :  { %v1459_v1 = vpop.f32.mrf.mxu2 }
 0xc9d   :  { %1464 = vrot.lane.b32.xlu2 %v1459_v1, %s2904_s21  ;;  %v1954_v1 = vld [vmem:[%s2857_s9 + $0x1] ss:$0 sm:$0xff]  ;;  %s2098_s21 = smov [#allocation4]  }
 0xca4   :  { %v1461_v53 = vpop.f32.mrf.mxu2 }
 0xca6   :  { %v1162_v18 = vpop.permute.xlu2 %1161 }
 0xca7   :  { %1164 = vst.msk [vmem:[#allocation2] sm:$0xff] %vm348_vm11, %v1162_v18 }
 0xccc   :  { %v1223_v19 = vpop.permute.xlu1 %1222 }
 0xccd   :  { %1225 = vst.msk [vmem:[#allocation2] sm:$0xff] %vm410_vm12, %v1223_v19 }
 0xcd4   :  { %v1468_v26 = vld [vmem:[#allocation2] sm:$0xff] }
 0xcdc   :  { %v1343_v23 = vpop.permute.xlu0 %1342 }
 0xcdd   :  { %1345 = vst.msk [vmem:[#allocation2 + $0x8] sm:$0xff] %vm286_vm10, %v1343_v23 }
 0xce7   :  { %v1404_v13 = vpop.permute.xlu0 %1403 }
 0xce8   :  { %1406 = vst.msk [vmem:[#allocation2 + $0x8] sm:$0xff] %vm348_vm11, %v1404_v13 }
 0xcf7   :  { %v1465_v27 = vpop.permute.xlu2 %1464 }
 0xcf8   :  { %1467 = vst.msk [vmem:[#allocation2 + $0x8] sm:$0xff] %vm410_vm12, %v1465_v27 }
 0xcff   :  { %v1469_v62 = vld [vmem:[#allocation2 + $0x8] sm:$0xff] }
 0xd00   :  { %v1475_v28 = vpack.c.bf16 %v1469_v62, %v1468_v26 }
 0xd02   :  { %1900 = vmatmul.msk.bf16.vlgmr.msrb.gmra.mxu0 %vm72_vm0, %v1475_v28 }
 0xd7f   :  { %v1495_v30 = vpop.f32.mrf.mxu0 }
 0xd80   :  { %v1496_v32 = vadd.f32 %v1952_v29, %v1495_v30 }
 0xd82   :  { %v1500_v33 = vadd.f32 %v1496_v32, %v2539_v24 }
 0xd84   :  { %v1506_v7 = vsel %vm72_vm0, %v1500_v33, 0.0 }
 0xd85   :  { %1507 = vadd.xlane.f32.xlu0 %v1506_v7 }
 0xd87   :  { %v1497_v34 = vpop.f32.mrf.mxu0 }
 0xd88   :  { %v1498_v35 = vadd.f32 %v1952_v29, %v1497_v34 }
 0xd8a   :  { %v1501_v37 = vadd.f32 %v1498_v35, %v2541_v25  ;;  %v1905_v25 = vld [vmem:[%s2858_s10 + $0x30] sm:$0xff] }
 0xd8b   :  { %v1567_v46 = vpack.c.bf16 %v1906_v45, %v1905_v25  ;;  %v1915_v25 = vld [vmem:[%s2860_s12 + $0x60] sm:$0xff]  ;;  %v1916_v45 = vld [vmem:[%s2860_s12 + $0x68] sm:$0xff] }
 0xd8c   :  { %v1509_v61 = vsel %vm72_vm0, %v1501_v37, 0.0 }
 0xd8d   :  { %1510 = vadd.xlane.f32.xlu2 %v1509_v61  ;;  %1582 = vmatpush.bf16.msrb.mxu1 %v1567_v46 }
 0xd91   :  { %1583 = vmatpush.bf16.msrb.mxu1 %v1566_v31 }
 0xdf8   :  { %v1508_v4 = vpop.xlane.xlu0 %1507 }
 0xdf9   :  { %v1512_v38 = vmul.f32 %v1508_v4, %v2212_v10  ;;  %v1917_v4 = vld [vmem:[%s2860_s12 + $0x70] sm:$0xff] }
 0xdfb   :  { %v1514_v39 = vsub.f32 %v1500_v33, %v1512_v38  ;;  %v1918_v38 = vld [vmem:[%s2860_s12 + $0x78] sm:$0xff] }
 0xdfd   :  { %v1516_v47 = vmul.f32 %v1514_v39, %v1514_v39 }
 0xdff   :  { %v1518_v40 = vsel %vm72_vm0, %v1516_v47, 0.0  ;;  %v1691_v47 = vpack.c.bf16 %v1918_v38, %v1917_v4 }
 0xe00   :  { %v1511_v41 = vpop.xlane.xlu2 %1510  ;;  %1519 = vadd.xlane.f32.xlu1 %v1518_v40 }
 0xe01   :  { %v1513_v24 = vmul.f32 %v1511_v41, %v2212_v10  ;;  %1704 = vmatpush.bf16.msrb.mxu3 %v1691_v47 }
 0xe03   :  { %v1515_v42 = vsub.f32 %v1501_v37, %v1513_v24 }
 0xe05   :  { %v1517_v43 = vmul.f32 %v1515_v42, %v1515_v42 }
 0xe07   :  { %v1521_v44 = vsel %vm72_vm0, %v1517_v43, 0.0 }
 0xe08   :  { %1522 = vadd.xlane.f32.xlu0 %v1521_v44 }
 0xe73   :  { %v1520_v48 = vpop.xlane.xlu1 %1519 }
 0xe74   :  { %v1524_v49 = vmul.f32 %v1520_v48, %v2212_v10  ;;  %v1690_v48 = vpack.c.bf16 %v1916_v45, %v1915_v25 }
 0xe76   :  { %v1526_v51 = vadd.f32 1e-12, %v1524_v49  ;;  %1705 = vmatpush.bf16.msrb.mxu3 %v1690_v48 }
 0xe78   :  { %2043 = vrsqrt.f32 %v1526_v51  ;;  %vm1534_vm9 = vweird.f32 %v1526_v51 }
 0xe7b   :  { %v1523_v55 = vpop.xlane.xlu0 %1522 }
 0xe7c   :  { %v1525_v57 = vmul.f32 %v1523_v55, %v2212_v10 }
 0xe7e   :  { %v2044_v58 = vpop.eup %2043  ;;  %v1527_v59 = vadd.f32 1e-12, %v1525_v57  ;;  %v1913_v57 = vld [vmem:[%s2860_s12 + $0x50] sm:$0xff] }
 0xe7f   :  { %v1529_v63 = vmul.f32 %v2044_v58, %v1526_v51  ;;  %vm1535_vm8 = vweird.f32 %v2044_v58 }
 0xe80   :  { %2045 = vrsqrt.f32 %v1527_v59  ;;  %vm1536_vm10 = vmor %vm1534_vm9, %vm1535_vm8  ;;  %vm1544_vm12 = vweird.f32 %v1527_v59 }
 0xe81   :  { %v1530_v2 = vmul.f32 %v2044_v58, %v1529_v63 }
 0xe83   :  { %v1531_v3 = vmul.f32 0.5, %v1530_v2 }
 0xe85   :  { %v1532_v0 = vsub.f32 1.5, %v1531_v3 }
 0xe86   :  { %v2046_v5 = vpop.eup %2045 }
 0xe87   :  { %v1533_v52 = vmul.f32 %v2044_v58, %v1532_v0  ;;  %v1539_v6 = vmul.f32 %v2046_v5, %v1527_v59  ;;  %vm1545_vm11 = vweird.f32 %v2046_v5 }
 0xe88   :  { %vm1546_vm14 = vmor %vm1544_vm12, %vm1545_vm11 }
 0xe89   :  { %v1540_v8 = vmul.f32 %v2046_v5, %v1539_v6  ;;  %v1537_v9 = vsel %vm1536_vm10, %v2044_v58, %v1533_v52  ;;  %v1914_v58 = vld [vmem:[%s2860_s12 + $0x58] sm:$0xff]  ;;  %v1911_v6 = vld [vmem:[%s2860_s12 + $0x40] sm:$0xff]  ;;  %vm1774_vm10 = vcmask 253952  }
 0xe8a   :  { %v1548_v15 = vmul.f32 %v1537_v9, %v1514_v39  ;;  %v1689_v63 = vpack.c.bf16 %v1914_v58, %v1913_v57 }
 0xe8b   :  { %v1541_v11 = vmul.f32 0.5, %v1540_v8  ;;  %v1912_v8 = vld [vmem:[%s2860_s12 + $0x48] sm:$0xff] }
 0xe8c   :  { %v1553_v53 = vmul.f32 %v1953_v14, %v1548_v15  ;;  %1706 = vmatpush.bf16.msrb.mxu3 %v1689_v63 }
 0xe8d   :  { %v1542_v12 = vsub.f32 1.5, %v1541_v11  ;;  %v1688_v11 = vpack.c.bf16 %v1912_v8, %v1911_v6 }
 0xe8e   :  { %v2729_v60 = vadd.f32 %v1954_v1, %v1553_v53 }
 0xe8f   :  { %v1543_v16 = vmul.f32 %v2046_v5, %v1542_v12 }
 0xe90   :  { %1707 = vmatpush.bf16.msrb.mxu3 %v1688_v11 }
 0xe91   :  { %v1547_v17 = vsel %vm1546_vm14, %v2046_v5, %v1543_v16 }
 0xe92   :  { %v1549_v18 = vmul.f32 %v1547_v17, %v1515_v42 }
 0xe94   :  { %v1554_v19 = vmul.f32 %v1953_v14, %v1549_v18 }
 0xe96   :  { %v2731_v54 = vadd.f32 %v1954_v1, %v1554_v19 }
 0xe98   :  { %v1565_v20 = vpack.c.bf16 %v2731_v54, %v2729_v60 }
 0xe9a   :  { %1908 = vmatmul.msk.bf16.vlgmr.msrb.gmra.mxu1 %vm72_vm0, %v1565_v20 }
 0xf17   :  { %v1585_v22 = vpop.f32.mrf.mxu1 }
 0xf18   :  { %v2739_v36 = vadd.f32 %v1955_v21, %v1585_v22 }
 0xf1a   :  { %v2742_v23 = vmul.f32 0.70710677, %v2739_v36 }
 0xf1c   :  { %v1594_v13 = vmul.f32 %v2742_v23, %v2742_v23 }
 0xf1e   :  { %v1595_v27 = vmin.f32 %v1594_v13, 16.0 }
 0xf1f   :  { %v1587_v26 = vpop.f32.mrf.mxu1 }
 0xf20   :  { %v1596_v62 = vmul.f32 2.1237322e-06, %v1595_v27  ;;  %v1607_v28 = vmul.f32 3.8918573e-05, %v1595_v27  ;;  %v2746_v29 = vadd.f32 %v1955_v21, %v1587_v26 }
 0xf22   :  { %v1597_v30 = vadd.f32 0.00028619796, %v1596_v62  ;;  %v1608_v32 = vadd.f32 0.001143296, %v1607_v28  ;;  %v2749_v33 = vmul.f32 0.70710677, %v2746_v29 }
 0xf24   :  { %v1609_v7 = vmul.f32 %v1608_v32, %v1595_v27  ;;  %v1634_v34 = vmul.f32 %v2749_v33, %v2749_v33  ;;  %v1598_v35 = vmul.f32 %v1597_v30, %v1595_v27 }
 0xf26   :  { %v1610_v37 = vadd.f32 0.014752088, %v1609_v7  ;;  %v2753_v61 = vmin.f32 %v1634_v34, 16.0  ;;  %v1599_v24 = vadd.f32 0.0036580483, %v1598_v35 }
 0xf28   :  { %v1611_v39 = vmul.f32 %v1610_v37, %v1595_v27  ;;  %v1636_v40 = vmul.f32 2.1237322e-06, %v2753_v61  ;;  %v1647_v41 = vmul.f32 3.8918573e-05, %v2753_v61  ;;  %v1600_v50 = vmul.f32 %v1599_v24, %v1595_v27 }
 0xf2a   :  { %v1612_v42 = vadd.f32 0.112945676, %v1611_v39  ;;  %v1637_v43 = vadd.f32 0.00028619796, %v1636_v40  ;;  %v1648_v44 = vadd.f32 0.001143296, %v1647_v41 }
 0xf2b   :  { %v1601_v3 = vadd.f32 0.05243302, %v1600_v50 }
 0xf2c   :  { %v1613_v46 = vmul.f32 %v1612_v42, %v1595_v27  ;;  %v1638_v49 = vmul.f32 %v1637_v43, %v2753_v61  ;;  %v1649_v56 = vmul.f32 %v1648_v44, %v2753_v61 }
 0xf2d   :  { %v1602_v12 = vmul.f32 %v1601_v3, %v1595_v27 }
 0xf2e   :  { %v1614_v51 = vadd.f32 0.4994258, %v1613_v46  ;;  %v1639_v31 = vadd.f32 0.0036580483, %v1638_v49  ;;  %v1650_v55 = vadd.f32 0.014752088, %v1649_v56 }
 0xf2f   :  { %v1603_v1 = vadd.f32 0.18741608, %v1602_v12  ;;  %v1590_v49 = vmul.f32 0.5, %v2739_v36  ;;  %v1591_v56 = vmul.f32 0.5, %v2746_v29 }
 0xf30   :  { %v1615_v59 = vmul.f32 %v1614_v51, %v1595_v27  ;;  %v1651_v2 = vmul.f32 %v1650_v55, %v2753_v61  ;;  %v1640_v5 = vmul.f32 %v1639_v31, %v2753_v61 }
 0xf31   :  { %v1604_v21 = vmul.f32 %v1603_v1, %v1595_v27  ;;  %v1781_v1 = vld [vmem:[%s2864_s16 + $0x18] sm:$0xff] }
 0xf32   :  { %v1616_v0 = vadd.f32 1.0, %v1615_v59  ;;  %v1652_v52 = vadd.f32 0.112945676, %v1651_v2  ;;  %v1641_v14 = vadd.f32 0.05243302, %v1640_v5 }
 0xf33   :  { %v1605_v30 = vadd.f32 1.1283791, %v1604_v21 }
 0xf34   :  { %2047 = vrcp.f32 %v1616_v0  ;;  %v1653_v9 = vmul.f32 %v1652_v52, %v2753_v61  ;;  %v1642_v18 = vmul.f32 %v1641_v14, %v2753_v61  ;;  %v1628_v13 = vand.u32 2147483648, %v1616_v0 }
 0xf35   :  { %v1626_v62 = vand.u32 2147483647, %v1616_v0  ;;  %vm1622_vm1 = vweird.f32 %v1616_v0  ;;  %v1606_v38 = vmul.f32 %v1605_v30, %v2742_v23 }
 0xf36   :  { %v1654_v15 = vadd.f32 0.4994258, %v1653_v9  ;;  %v1643_v26 = vadd.f32 0.18741608, %v1642_v18  ;;  %v1629_v34 = vor.u32 1.1754944e-38, %v1628_v13 }
 0xf37   :  { %vm1627_vm4 = vcmp.eq.f32.partialorder %v1626_v62, 8.507059e+37 }
 0xf38   :  { %v1655_v16 = vmul.f32 %v1654_v15, %v2753_v61  ;;  %v1644_v35 = vmul.f32 %v1643_v26, %v2753_v61 }
 0xf3a   :  { %v2048_v17 = vpop.eup %2047  ;;  %v1656_v19 = vadd.f32 1.0, %v1655_v16  ;;  %v1645_v39 = vadd.f32 1.1283791, %v1644_v35 }
 0xf3b   :  { %v1618_v53 = vmul.f32 %v2048_v17, %v1616_v0  ;;  %vm1623_vm15 = vweird.f32 %v2048_v17 }
 0xf3c   :  { %2049 = vrcp.f32 %v1656_v19  ;;  %vm1624_vm3 = vmor %vm1622_vm1, %vm1623_vm15  ;;  %v1668_v47 = vand.u32 2147483648, %v1656_v19  ;;  %v1666_v24 = vand.u32 2147483647, %v1656_v19  ;;  %vm1662_vm6 = vweird.f32 %v1656_v19 }
 0xf3d   :  { %v1619_v20 = vsub.f32 1.0, %v1618_v53  ;;  %v1646_v25 = vmul.f32 %v1645_v39, %v2749_v33  ;;  %v1956_v33 = vld [vmem:[%s2861_s13 + $0x1] ss:$0 sm:$0xff]  ;;  %s1842_s13 = sshll.u32 %s2868_s20, 4  ;;  %vm1833_vm15 = vcmask 17408   ;;  %s1843_s13 = int_to_ptr.hbm [resolvable:$true] %s1842_s13 }
 0xf3e   :  { %v1669_v43 = vor.u32 1.1754944e-38, %v1668_v47  ;;  %vm1667_vm13 = vcmp.eq.f32.partialorder %v1666_v24, 8.507059e+37  ;;  %v1778_v53 = vld [vmem:[%s2864_s16] sm:$0xff] }
 0xf3f   :  { %v1620_v22 = vmul.f32 %v2048_v17, %v1619_v20 }
 0xf41   :  { %v1621_v28 = vadd.f32 %v2048_v17, %v1620_v22 }
 0xf42   :  { %v2050_v32 = vpop.eup %2049 }
 0xf43   :  { %v1625_v7 = vsel %vm1624_vm3, %v2048_v17, %v1621_v28  ;;  %v1658_v37 = vmul.f32 %v2050_v32, %v1656_v19  ;;  %vm1663_vm5 = vweird.f32 %v2050_v32  ;;  %v1780_v17 = vld [vmem:[%s2864_s16 + $0x10] sm:$0xff]  ;;  %v1779_v19 = vld [vmem:[%s2864_s16 + $0x8] sm:$0xff] }
 0xf44   :  { %v1630_v4 = vsel %vm1627_vm4, %v1629_v34, %v1625_v7  ;;  %vm1664_vm7 = vmor %vm1662_vm6, %vm1663_vm5  ;;  %v1784_v18 = vpack.c.bf16 %v1781_v1, %v1780_v17  ;;  %v1783_v21 = vpack.c.bf16 %v1779_v19, %v1778_v53 }
 0xf45   :  { %v1659_v27 = vsub.f32 1.0, %v1658_v37  ;;  %v1631_v40 = vmul.f32 %v1630_v4, %v1606_v38  ;;  %v1957_v37 = vld [vmem:[%s2862_s14 + $0x1] ss:$0 sm:$0xff] }
 0xf46   :  { %1798 = vmatpush.bf16.msra.mxu2 %v1784_v18  ;;  %v1958_v38 = vld [vmem:[%s2863_s15 + $0x1] ss:$0 sm:$0xff] }
 0xf47   :  { %v1660_v41 = vmul.f32 %v2050_v32, %v1659_v27  ;;  %v1909_v44 = vclamps-f32 %v1631_v40, 1.0 }
 0xf49   :  { %v1661_v42 = vadd.f32 %v2050_v32, %v1660_v41  ;;  %v1674_v48 = vadd.f32 1.0, %v1909_v44 }
 0xf4a   :  { %1799 = vmatpush.bf16.msra.mxu2 %v1783_v21 }
 0xf4b   :  { %v1665_v61 = vsel %vm1664_vm7, %v2050_v32, %v1661_v42  ;;  %v1676_v51 = vmul.f32 %v1674_v48, %v1590_v49  ;;  %v1809_v48 = vld [vmem:[%s2866_s18 + $0x18] sm:$0xff]  ;;  %v1806_v49 = vld [vmem:[%s2866_s18] sm:$0xff] }
 0xf4c   :  { %v1670_v45 = vsel %vm1667_vm13, %v1669_v43, %v1665_v61 }
 0xf4d   :  { %v1671_v46 = vmul.f32 %v1670_v45, %v1646_v25 }
 0xf4f   :  { %v1910_v23 = vclamps-f32 %v1671_v46, 1.0  ;;  %v1808_v46 = vld [vmem:[%s2866_s18 + $0x10] sm:$0xff] }
 0xf51   :  { %v1675_v50 = vadd.f32 1.0, %v1910_v23  ;;  %v1812_v23 = vpack.c.bf16 %v1809_v48, %v1808_v46 }
 0xf53   :  { %v1677_v31 = vmul.f32 %v1675_v50, %v1591_v56  ;;  %1826 = vmatpush.bf16.msra.mxu0 %v1812_v23  ;;  %v1807_v56 = vld [vmem:[%s2866_s18 + $0x8] sm:$0xff]  ;;  %s1840_s18 = sshll.u32 %s2098_s21, 4  ;;  %s1841_s18 = int_to_ptr.vmem [resolvable:$true] %s1840_s18 }
 0xf54   :  { %v1811_v50 = vpack.c.bf16 %v1807_v56, %v1806_v49 }
 0xf55   :  { %v1687_v55 = vpack.c.bf16 %v1677_v31, %v1676_v51  ;;  %v1959_v51 = vld [vmem:[%s2865_s17] ss:$0 sm:$0xff] }
 0xf57   :  { %1920 = vmatmul.msk.bf16.vlgmr.msrb.gmra.mxu3 %vm876_vm2, %v1687_v55  ;;  %1827 = vmatpush.bf16.msra.mxu0 %v1811_v50 }
 0xfda   :  { %v1709_v57 = vpop.f32.mrf.mxu3 }
 0xfdb   :  { %v1710_v58 = vadd.f32 %v1956_v33, %v1709_v57 }
 0xfdd   :  { %v1714_v59 = vadd.f32 %v1710_v58, %v2729_v60 }
 0xfdf   :  { %v1720_v63 = vsel %vm72_vm0, %v1714_v59, 0.0 }
 0xfe0   :  { %1721 = vadd.xlane.f32.xlu2 %v1720_v63 }
 0xfe2   :  { %v1711_v36 = vpop.f32.mrf.mxu3 }
 0xfe3   :  { %v1712_v2 = vadd.f32 %v1956_v33, %v1711_v36 }
 0xfe5   :  { %v1715_v29 = vadd.f32 %v1712_v2, %v2731_v54 }
 0xfe7   :  { %v1723_v3 = vsel %vm72_vm0, %v1715_v29, 0.0 }
 0xfe8   :  { %1724 = vadd.xlane.f32.xlu0 %v1723_v3 }
0x1053   :  { %v1722_v0 = vpop.xlane.xlu2 %1721 }
0x1054   :  { %v1726_v5 = vmul.f32 %v1722_v0, %v2212_v10 }
0x1056   :  { %v1728_v52 = vsub.f32 %v1714_v59, %v1726_v5  ;;  %v1960_v59 = vld [vmem:[%s2867_s19] ss:$0 sm:$0xff] }
0x1058   :  { %v1730_v6 = vmul.f32 %v1728_v52, %v1728_v52 }
0x105a   :  { %v1732_v8 = vsel %vm72_vm0, %v1730_v6, 0.0 }
0x105b   :  { %v1725_v9 = vpop.xlane.xlu0 %1724  ;;  %1733 = vadd.xlane.f32.xlu2 %v1732_v8 }
0x105c   :  { %v1727_v60 = vmul.f32 %v1725_v9, %v2212_v10 }
0x105e   :  { %v1729_v11 = vsub.f32 %v1715_v29, %v1727_v60 }
0x1060   :  { %v1731_v12 = vmul.f32 %v1729_v11, %v1729_v11 }
0x1062   :  { %v1735_v14 = vsel %vm72_vm0, %v1731_v12, 0.0 }
0x1063   :  { %1736 = vadd.xlane.f32.xlu0 %v1735_v14 }
0x10ce   :  { %v1734_v54 = vpop.xlane.xlu2 %1733 }
0x10cf   :  { %v1738_v15 = vmul.f32 %v1734_v54, %v2212_v10 }
0x10d1   :  { %v1740_v16 = vadd.f32 1e-12, %v1738_v15 }
0x10d3   :  { %2051 = vrsqrt.f32 %v1740_v16  ;;  %vm1748_vm8 = vweird.f32 %v1740_v16 }
0x10d6   :  { %v1737_v20 = vpop.xlane.xlu0 %1736 }
0x10d7   :  { %v1739_v22 = vmul.f32 %v1737_v20, %v2212_v10 }
0x10d9   :  { %v2052_v13 = vpop.eup %2051  ;;  %v1741_v26 = vadd.f32 1e-12, %v1739_v22 }
0x10da   :  { %v1743_v62 = vmul.f32 %v2052_v13, %v1740_v16  ;;  %vm1749_vm2 = vweird.f32 %v2052_v13 }
0x10db   :  { %2053 = vrsqrt.f32 %v1741_v26  ;;  %vm1750_vm9 = vmor %vm1748_vm8, %vm1749_vm2  ;;  %vm1758_vm12 = vweird.f32 %v1741_v26 }
0x10dc   :  { %v1744_v28 = vmul.f32 %v2052_v13, %v1743_v62 }
0x10de   :  { %v1745_v30 = vmul.f32 0.5, %v1744_v28 }
0x10e0   :  { %v1746_v32 = vsub.f32 1.5, %v1745_v30 }
0x10e1   :  { %v2054_v7 = vpop.eup %2053 }
0x10e2   :  { %v1747_v34 = vmul.f32 %v2052_v13, %v1746_v32  ;;  %v1753_v35 = vmul.f32 %v2054_v7, %v1741_v26  ;;  %vm1759_vm11 = vweird.f32 %v2054_v7 }
0x10e3   :  { %vm1760_vm14 = vmor %vm1758_vm12, %vm1759_vm11 }
0x10e4   :  { %v1751_v4 = vsel %vm1750_vm9, %v2052_v13, %v1747_v34  ;;  %v1754_v10 = vmul.f32 %v2054_v7, %v1753_v35 }
0x10e5   :  { %v1762_v27 = vmul.f32 %v1751_v4, %v1728_v52 }
0x10e6   :  { %v1755_v39 = vmul.f32 0.5, %v1754_v10 }
0x10e7   :  { %v1767_v47 = vmul.f32 %v1957_v37, %v1762_v27 }
0x10e8   :  { %v1756_v40 = vsub.f32 1.5, %v1755_v39 }
0x10e9   :  { %v1772_v41 = vadd.f32 %v1958_v38, %v1767_v47 }
0x10ea   :  { %v1757_v24 = vmul.f32 %v2054_v7, %v1756_v40 }
0x10eb   :  { %1775 = vst.msk [vmem:[#allocation3] sm:$0x1] %vm1774_vm10, %v1772_v41 }
0x10ec   :  { %v1761_v42 = vsel %vm1760_vm14, %v2054_v7, %v1757_v24 }
0x10ed   :  { %v1763_v43 = vmul.f32 %v1761_v42, %v1729_v11 }
0x10ef   :  { %v1768_v44 = vmul.f32 %v1957_v37, %v1763_v43 }
0x10f1   :  { %v1773_v25 = vadd.f32 %v1958_v38, %v1768_v44 }
0x10f3   :  { %1776 = vst.msk [vmem:[#allocation3 + $0x1] sm:$0x1] %vm1774_vm10, %v1773_v25 }
0x10fa   :  { %v1777_v61 = vld [vmem:[#allocation3] sm:$0x3] }
0x10fb   :  { %v1782_v45 = vpack.c.bf16 %v1777_v61, %v1777_v61 }
0x10fd   :  { %1923 = vmatmul.msk.bf16.vlgmr.msra.gmra.mxu2 %vm72_vm0, %v1782_v45 }
0x1180   :  { %v1801_v31 = vpop.f32.mrf.mxu2 }
0x1181   :  { %v1802_v55 = vadd.f32 %v1959_v51, %v1801_v31 }
0x1183   :  { %2055 = vtanh.f32 %v1802_v55 }
0x1188   :  { %v1803_v33 = vpop.f32.mrf.mxu2 }
0x1189   :  { %v2056_v57 = vpop.eup %2055 }
0x118a   :  { %v1810_v58 = vpack.c.bf16 %v2056_v57, %v2056_v57 }
0x118c   :  { %1924 = vmatmul.msk.bf16.vlgmr.msra.gmra.mxu0 %vm72_vm0, %v1810_v58 }
0x1209   :  { %v1829_v63 = vpop.f32.mrf.mxu0 }
0x120a   :  { %v1830_v36 = vadd.f32 %v1960_v59, %v1829_v63 }
0x120c   :  { %1834 = vst.msk [vmem:[#allocation4] sm:$0x3] %vm1833_vm15, %v1830_v36 }
0x120d   :  { %1845 = dma.vmem_to_hbm [thread:$0]  %s1841_s18, 32, %s1843_s13, [#allocation5]  }
0x1211   :  { %v1831_v2 = vpop.f32.mrf.mxu0 }
0x1212   :  { %2081 = dma.done.wait [#allocation5], 32  }
0x1213   :  { %2082 = vsyncadd [#allocation5], 4294967264 }
0x1214   :  { %1850 = vsyncpa [#allocation5], 1 }

</bundles_post_ra>
